<compile_context>
chip_gen: v6e
topology: v6e:2x2x1
jax: 0.10.0
libtpu: 0.0.40
codegen_flags: <defaults>
</compile_context>

<pallas_src>
import jax
import jax.numpy as jnp
from jax.experimental import pallas as pl
from jax.experimental.pallas import tpu as pltpu


def _round_up(x, m):
    return ((x + m - 1) // m) * m


def _im2col_3x3(xp, H, W):
    """Build the 3x3 im2col patch matrix from a zero-padded activation.

    xp: (NB, H+2, W+2, C) value (already VMEM/vreg resident).
    Returns (NB*H*W, 9*C); K axis ordered (dy, dx, c), matching
    jnp.transpose(w, (2, 3, 1, 0)).reshape(9*C, Cout) on the weight side.
    Only the 3 dx slices touch the tiled W (sublane) axis; dy slices are on the
    untiled H axis (free).
    """
    NB = xp.shape[0]
    C = xp.shape[-1]
    # (NB, H+2, W, 3C): lane order (dx, c)
    band = jnp.concatenate([xp[:, :, dx:dx + W, :] for dx in range(3)], axis=-1)
    # (NB, H, W, 9C): lane order (dy, dx, c)
    col = jnp.concatenate([band[:, dy:dy + H, :, :] for dy in range(3)], axis=-1)
    # Cheap regroup (lane dim unchanged; W is a multiple of 8 here).
    return col.reshape(NB * H * W, 9 * C)


def _down_step_kernel(x_ref, w1_ref, b1_ref, w2_ref, b2_ref, o_ref,
                      xp1_ref, xp2_ref):
    """Fused conv3x3+ReLU -> conv3x3+ReLU for one batch block.

    x_ref  : (NB, H, W, Cin)        unpadded NHWC input block
    w1_ref : (9*Cin, Cmid)          conv1 im2col weight
    b1_ref : (1, Cmid)
    w2_ref : (9*Cmid, Cout_p)       conv2 im2col weight, cols zero-padded to 128k
    b2_ref : (1, Cout_p)
    o_ref  : (NB, H*W, Cout_p)      lane-dense output block
    xp1_ref: (NB, H+2, W+2, Cin)    VMEM scratch: zero-padded conv1 input
    xp2_ref: (NB, H+2, W+2, Cmid)   VMEM scratch: zero-padded intermediate
                                    (never written to HBM -> fusion win)
    """
    NB, H, W, _ = x_ref.shape
    Cmid = w1_ref.shape[1]
    Cout_p = w2_ref.shape[1]

    # ---- conv1 + ReLU ----
    # In-kernel halo handling: zero the padded scratch, write the interior.
    xp1_ref[...] = jnp.zeros_like(xp1_ref)
    xp1_ref[:, 1:H + 1, 1:W + 1, :] = x_ref[...]
    col1 = _im2col_3x3(xp1_ref[...], H, W)                        # (NB*H*W, 9*Cin)
    y1 = jnp.dot(col1, w1_ref[...], preferred_element_type=jnp.float32)
    y1 = jnp.maximum(y1 + b1_ref[...], 0.0)                       # (NB*H*W, Cmid)

    # ---- conv2 + ReLU (intermediate stays in VMEM) ----
    xp2_ref[...] = jnp.zeros_like(xp2_ref)
    xp2_ref[:, 1:H + 1, 1:W + 1, :] = y1.reshape(NB, H, W, Cmid)
    col2 = _im2col_3x3(xp2_ref[...], H, W)                        # (NB*H*W, 9*Cmid)
    y2 = jnp.dot(col2, w2_ref[...], preferred_element_type=jnp.float32)
    y2 = jnp.maximum(y2 + b2_ref[...], 0.0)                       # (NB*H*W, Cout_p)

    o_ref[...] = y2.reshape(NB, H * W, Cout_p)                    # unmasked, 128+ lanes


def down_step(x_nchw, params, *, batch_block=1):
    """Forward pass of downStep: relu(conv2(relu(conv1(x)))). Input/output NCHW."""
    N, Cin, H, W = x_nchw.shape
    Cmid = params["w1"].shape[0]
    Cout = params["w2"].shape[0]
    NB = batch_block
    assert N % NB == 0, "batch_block must divide N"
    Cout_p = _round_up(Cout, 128)          # lane-dense HBM writeback

    x = jnp.transpose(x_nchw, (0, 2, 3, 1))                       # NCHW -> NHWC

    # (Cout, Cin, 3, 3) -> (3, 3, Cin, Cout) -> (9*Cin, Cout): K order (dy, dx, c)
    w1 = jnp.transpose(params["w1"], (2, 3, 1, 0)).reshape(9 * Cin, Cmid)
    b1 = params["b1"].reshape(1, Cmid)
    w2 = jnp.transpose(params["w2"], (2, 3, 1, 0)).reshape(9 * Cmid, Cout)
    w2 = jnp.pad(w2, ((0, 0), (0, Cout_p - Cout)))                # tiny weight pad only
    b2 = jnp.pad(params["b2"], (0, Cout_p - Cout)).reshape(1, Cout_p)

    flops = 2 * N * H * W * 9 * (Cin * Cmid + Cmid * Cout_p)
    bytes_accessed = 4 * (N * H * W * Cin + 9 * Cin * Cmid + Cmid
                          + 9 * Cmid * Cout_p + Cout_p + N * H * W * Cout_p)

    out = pl.pallas_call(
        _down_step_kernel,
        out_shape=jax.ShapeDtypeStruct((N, H * W, Cout_p), jnp.float32),
        grid_spec=pltpu.PrefetchScalarGridSpec(
            num_scalar_prefetch=0,
            grid=(N // NB,),
            in_specs=[
                pl.BlockSpec((NB, H, W, Cin), lambda n: (n, 0, 0, 0)),
                pl.BlockSpec((9 * Cin, Cmid), lambda n: (0, 0)),
                pl.BlockSpec((1, Cmid), lambda n: (0, 0)),
                pl.BlockSpec((9 * Cmid, Cout_p), lambda n: (0, 0)),
                pl.BlockSpec((1, Cout_p), lambda n: (0, 0)),
            ],
            out_specs=pl.BlockSpec((NB, H * W, Cout_p), lambda n: (n, 0, 0)),
            scratch_shapes=[
                pltpu.VMEM((NB, H + 2, W + 2, Cin), jnp.float32),
                pltpu.VMEM((NB, H + 2, W + 2, Cmid), jnp.float32),
            ],
        ),
        compiler_params=pltpu.CompilerParams(
            dimension_semantics=("parallel",),
            # Plenty for these shapes (usage << 1 MiB). For full-image blocks at
            # real U-Net sizes raise toward ~100 MiB on v5e/v6e (128 MiB VMEM);
            # keep lower + use H-strips on v7x (64 MiB physical).
            vmem_limit_bytes=32 * 1024 * 1024,
        ),
        cost_estimate=pl.CostEstimate(
            flops=flops, transcendentals=0, bytes_accessed=bytes_accessed),
    )(x, w1, b1, w2, b2)

    y = out[:, :, :Cout].reshape(N, H, W, Cout)                   # drop lane pad
    return jnp.transpose(y, (0, 3, 1, 2))                         # NHWC -> NCHW


def init_params(key, inC, outC):
    k1, k2, k3, k4 = jax.random.split(key, 4)
    # Deterministic kaiming-uniform-ish init (shapes match nn.Conv2d(inC,outC,3)).
    lim1 = (1.0 / (inC * 9)) ** 0.5
    lim2 = (1.0 / (outC * 9)) ** 0.5
    return {
        "w1": jax.random.uniform(k1, (outC, inC, 3, 3), jnp.float32, -lim1, lim1),
        "b1": jax.random.uniform(k2, (outC,), jnp.float32, -lim1, lim1),
        "w2": jax.random.uniform(k3, (outC, outC, 3, 3), jnp.float32, -lim2, lim2),
        "b2": jax.random.uniform(k4, (outC,), jnp.float32, -lim2, lim2),
    }


def _reference(x_nchw, params):
    """Pure-JAX reference (PyTorch Conv2d semantics) for sanity checking."""
    def conv(x, w, b):
        y = jax.lax.conv_general_dilated(
            x, w, window_strides=(1, 1), padding="SAME",
            dimension_numbers=("NCHW", "OIHW", "NCHW"))
        return jax.nn.relu(y + b[None, :, None, None])
    return conv(conv(x_nchw, params["w1"], params["b1"]),
                params["w2"], params["b2"])


if __name__ == "__main__":
    key = jax.random.PRNGKey(0)
    kx, kp = jax.random.split(key)

    N, inC, outC, H, W = 2, 4, 8, 16, 16
    x = jax.random.normal(kx, (N, inC, H, W), jnp.float32)
    params = init_params(kp, inC, outC)

    out = jax.jit(down_step)(x, params)
    jax.block_until_ready(out)

    ref = _reference(x, params)
    assert out.shape == (N, outC, H, W)
    assert jnp.allclose(out, ref, atol=1e-4, rtol=1e-4)

    print("KERNEL_OK")
</pallas_src>

<mosaic_0001>
module attributes {stable_mosaic.version = 11 : i64} {
  func.func @_down_step_kernel(%arg0: i32, %arg1: memref<1x16x16x4xf32, #tpu.memory_space<vmem>>, %arg2: memref<36x8xf32, #tpu.memory_space<vmem>>, %arg3: memref<1x8xf32, #tpu.memory_space<vmem>>, %arg4: memref<72x128xf32, #tpu.memory_space<vmem>>, %arg5: memref<1x128xf32, #tpu.memory_space<vmem>>, %arg6: memref<1x256x128xf32, #tpu.memory_space<vmem>>, %arg7: memref<1x18x18x4xf32, #tpu.memory_space<vmem>>, %arg8: memref<1x18x18x8xf32, #tpu.memory_space<vmem>>) attributes {dimension_semantics = [#tpu.dimension_semantics<parallel>], iteration_bounds = array<i64: 2>, scalar_prefetch = 0 : i64, scratch_operands = 2 : i64, tpu.core_type = #tpu.core_type<tc>, window_params = [{transform_indices = @transform_0, window_bounds = array<i64: 1, 16, 16, 4>}, {pipeline_mode = #tpu.pipeline_mode<synchronous>, transform_indices = @transform_1, window_bounds = array<i64: 36, 8>}, {pipeline_mode = #tpu.pipeline_mode<synchronous>, transform_indices = @transform_2, window_bounds = array<i64: 1, 8>}, {pipeline_mode = #tpu.pipeline_mode<synchronous>, transform_indices = @transform_3, window_bounds = array<i64: 72, 128>}, {pipeline_mode = #tpu.pipeline_mode<synchronous>, transform_indices = @transform_4, window_bounds = array<i64: 1, 128>}, {transform_indices = @transform_5, window_bounds = array<i64: 1, 256, 128>}]} {
    %cst = arith.constant 0.000000e+00 : f32
    %0 = vector.broadcast %cst : f32 to vector<1x18x18x4xf32>
    %c0 = arith.constant 0 : index
    %c0_0 = arith.constant 0 : index
    %c0_1 = arith.constant 0 : index
    %c0_2 = arith.constant 0 : index
    %1 = vector.load %arg7[%c0, %c0_0, %c0_1, %c0_2] : memref<1x18x18x4xf32, #tpu.memory_space<vmem>>, vector<1x18x18x4xf32>
    tpu.vector_store %arg7[%c0, %c0_0, %c0_1, %c0_2], %0 {strides = array<i32>} : memref<1x18x18x4xf32, #tpu.memory_space<vmem>>, vector<1x18x18x4xf32>,
    %c0_3 = arith.constant 0 : index
    %c0_4 = arith.constant 0 : index
    %c0_5 = arith.constant 0 : index
    %c0_6 = arith.constant 0 : index
    %2 = vector.load %arg1[%c0_3, %c0_4, %c0_5, %c0_6] : memref<1x16x16x4xf32, #tpu.memory_space<vmem>>, vector<1x16x16x4xf32>
    %c0_7 = arith.constant 0 : index
    %c1 = arith.constant 1 : index
    %c1_8 = arith.constant 1 : index
    %c0_9 = arith.constant 0 : index
    %3 = vector.load %arg7[%c0_7, %c1, %c1_8, %c0_9] : memref<1x18x18x4xf32, #tpu.memory_space<vmem>>, vector<1x16x16x4xf32>
    tpu.vector_store %arg7[%c0_7, %c1, %c1_8, %c0_9], %2 {strides = array<i32>} : memref<1x18x18x4xf32, #tpu.memory_space<vmem>>, vector<1x16x16x4xf32>,
    %c0_10 = arith.constant 0 : index
    %c0_11 = arith.constant 0 : index
    %c0_12 = arith.constant 0 : index
    %c0_13 = arith.constant 0 : index
    %4 = vector.load %arg7[%c0_10, %c0_11, %c0_12, %c0_13] : memref<1x18x18x4xf32, #tpu.memory_space<vmem>>, vector<1x18x18x4xf32>
    %5 = vector.extract_strided_slice %4 {offsets = [0, 0, 0, 0], sizes = [1, 18, 16, 4], strides = [1, 1, 1, 1]} : vector<1x18x18x4xf32> to vector<1x18x16x4xf32>
    %6 = vector.extract_strided_slice %4 {offsets = [0, 0, 1, 0], sizes = [1, 18, 16, 4], strides = [1, 1, 1, 1]} : vector<1x18x18x4xf32> to vector<1x18x16x4xf32>
    %7 = vector.extract_strided_slice %4 {offsets = [0, 0, 2, 0], sizes = [1, 18, 16, 4], strides = [1, 1, 1, 1]} : vector<1x18x18x4xf32> to vector<1x18x16x4xf32>
    %8 = tpu.concatenate %5, %6, %7 in 3 : vector<1x18x16x4xf32>, vector<1x18x16x4xf32>, vector<1x18x16x4xf32> -> vector<1x18x16x12xf32>
    %9 = vector.extract_strided_slice %8 {offsets = [0, 0, 0, 0], sizes = [1, 16, 16, 12], strides = [1, 1, 1, 1]} : vector<1x18x16x12xf32> to vector<1x16x16x12xf32>
    %10 = vector.extract_strided_slice %8 {offsets = [0, 1, 0, 0], sizes = [1, 16, 16, 12], strides = [1, 1, 1, 1]} : vector<1x18x16x12xf32> to vector<1x16x16x12xf32>
    %11 = vector.extract_strided_slice %8 {offsets = [0, 2, 0, 0], sizes = [1, 16, 16, 12], strides = [1, 1, 1, 1]} : vector<1x18x16x12xf32> to vector<1x16x16x12xf32>
    %12 = tpu.concatenate %9, %10, %11 in 3 : vector<1x16x16x12xf32>, vector<1x16x16x12xf32>, vector<1x16x16x12xf32> -> vector<1x16x16x36xf32>
    %13 = vector.shape_cast %12 : vector<1x16x16x36xf32> to vector<256x36xf32>
    %c0_14 = arith.constant 0 : index
    %c0_15 = arith.constant 0 : index
    %14 = vector.load %arg2[%c0_14, %c0_15] : memref<36x8xf32, #tpu.memory_space<vmem>>, vector<36x8xf32>
    %cst_16 = arith.constant dense<0.000000e+00> : vector<256x8xf32>
    %15 = tpu.matmul %13, %14, %cst_16 {dimension_numbers = #tpu.dot_dimension_numbers<[1], [0], [0], [1], [0, 0, 1, 1], [], []>} : vector<256x36xf32>, vector<36x8xf32>, vector<256x8xf32> -> vector<256x8xf32>
    %c0_17 = arith.constant 0 : index
    %c0_18 = arith.constant 0 : index
    %16 = vector.load %arg3[%c0_17, %c0_18] : memref<1x8xf32, #tpu.memory_space<vmem>>, vector<1x8xf32>
    %17 = vector.broadcast %16 : vector<1x8xf32> to vector<256x8xf32>
    %18 = arith.addf %15, %17 : vector<256x8xf32>
    %cst_19 = arith.constant 0.000000e+00 : f32
    %19 = vector.broadcast %cst_19 : f32 to vector<256x8xf32>
    %20 = arith.maximumf %18, %19 : vector<256x8xf32>
    %cst_20 = arith.constant 0.000000e+00 : f32
    %21 = vector.broadcast %cst_20 : f32 to vector<1x18x18x8xf32>
    %c0_21 = arith.constant 0 : index
    %c0_22 = arith.constant 0 : index
    %c0_23 = arith.constant 0 : index
    %c0_24 = arith.constant 0 : index
    %22 = vector.load %arg8[%c0_21, %c0_22, %c0_23, %c0_24] : memref<1x18x18x8xf32, #tpu.memory_space<vmem>>, vector<1x18x18x8xf32>
    tpu.vector_store %arg8[%c0_21, %c0_22, %c0_23, %c0_24], %21 {strides = array<i32>} : memref<1x18x18x8xf32, #tpu.memory_space<vmem>>, vector<1x18x18x8xf32>,
    %23 = vector.shape_cast %20 : vector<256x8xf32> to vector<1x16x16x8xf32>
    %c0_25 = arith.constant 0 : index
    %c1_26 = arith.constant 1 : index
    %c1_27 = arith.constant 1 : index
    %c0_28 = arith.constant 0 : index
    %24 = vector.load %arg8[%c0_25, %c1_26, %c1_27, %c0_28] : memref<1x18x18x8xf32, #tpu.memory_space<vmem>>, vector<1x16x16x8xf32>
    tpu.vector_store %arg8[%c0_25, %c1_26, %c1_27, %c0_28], %23 {strides = array<i32>} : memref<1x18x18x8xf32, #tpu.memory_space<vmem>>, vector<1x16x16x8xf32>,
    %c0_29 = arith.constant 0 : index
    %c0_30 = arith.constant 0 : index
    %c0_31 = arith.constant 0 : index
    %c0_32 = arith.constant 0 : index
    %25 = vector.load %arg8[%c0_29, %c0_30, %c0_31, %c0_32] : memref<1x18x18x8xf32, #tpu.memory_space<vmem>>, vector<1x18x18x8xf32>
    %26 = vector.extract_strided_slice %25 {offsets = [0, 0, 0, 0], sizes = [1, 18, 16, 8], strides = [1, 1, 1, 1]} : vector<1x18x18x8xf32> to vector<1x18x16x8xf32>
    %27 = vector.extract_strided_slice %25 {offsets = [0, 0, 1, 0], sizes = [1, 18, 16, 8], strides = [1, 1, 1, 1]} : vector<1x18x18x8xf32> to vector<1x18x16x8xf32>
    %28 = vector.extract_strided_slice %25 {offsets = [0, 0, 2, 0], sizes = [1, 18, 16, 8], strides = [1, 1, 1, 1]} : vector<1x18x18x8xf32> to vector<1x18x16x8xf32>
    %29 = tpu.concatenate %26, %27, %28 in 3 : vector<1x18x16x8xf32>, vector<1x18x16x8xf32>, vector<1x18x16x8xf32> -> vector<1x18x16x24xf32>
    %30 = vector.extract_strided_slice %29 {offsets = [0, 0, 0, 0], sizes = [1, 16, 16, 24], strides = [1, 1, 1, 1]} : vector<1x18x16x24xf32> to vector<1x16x16x24xf32>
    %31 = vector.extract_strided_slice %29 {offsets = [0, 1, 0, 0], sizes = [1, 16, 16, 24], strides = [1, 1, 1, 1]} : vector<1x18x16x24xf32> to vector<1x16x16x24xf32>
    %32 = vector.extract_strided_slice %29 {offsets = [0, 2, 0, 0], sizes = [1, 16, 16, 24], strides = [1, 1, 1, 1]} : vector<1x18x16x24xf32> to vector<1x16x16x24xf32>
    %33 = tpu.concatenate %30, %31, %32 in 3 : vector<1x16x16x24xf32>, vector<1x16x16x24xf32>, vector<1x16x16x24xf32> -> vector<1x16x16x72xf32>
    %34 = vector.shape_cast %33 : vector<1x16x16x72xf32> to vector<256x72xf32>
    %c0_33 = arith.constant 0 : index
    %c0_34 = arith.constant 0 : index
    %35 = vector.load %arg4[%c0_33, %c0_34] : memref<72x128xf32, #tpu.memory_space<vmem>>, vector<72x128xf32>
    %cst_35 = arith.constant dense<0.000000e+00> : vector<256x128xf32>
    %36 = tpu.matmul %34, %35, %cst_35 {dimension_numbers = #tpu.dot_dimension_numbers<[1], [0], [0], [1], [0, 0, 1, 1], [], []>} : vector<256x72xf32>, vector<72x128xf32>, vector<256x128xf32> -> vector<256x128xf32>
    %c0_36 = arith.constant 0 : index
    %c0_37 = arith.constant 0 : index
    %37 = vector.load %arg5[%c0_36, %c0_37] : memref<1x128xf32, #tpu.memory_space<vmem>>, vector<1x128xf32>
    %38 = vector.broadcast %37 : vector<1x128xf32> to vector<256x128xf32>
    %39 = arith.addf %36, %38 : vector<256x128xf32>
    %cst_38 = arith.constant 0.000000e+00 : f32
    %40 = vector.broadcast %cst_38 : f32 to vector<256x128xf32>
    %41 = arith.maximumf %39, %40 : vector<256x128xf32>
    %42 = vector.shape_cast %41 : vector<256x128xf32> to vector<1x256x128xf32>
    %c0_39 = arith.constant 0 : index
    %c0_40 = arith.constant 0 : index
    %c0_41 = arith.constant 0 : index
    %43 = vector.load %arg6[%c0_39, %c0_40, %c0_41] : memref<1x256x128xf32, #tpu.memory_space<vmem>>, vector<1x256x128xf32>
    tpu.vector_store %arg6[%c0_39, %c0_40, %c0_41], %42 {strides = array<i32>} : memref<1x256x128xf32, #tpu.memory_space<vmem>>, vector<1x256x128xf32>,
    return
  }
  func.func @transform_0(%arg0: i32) -> (i32, i32, i32, i32) {
    %c0_i32 = arith.constant 0 : i32
    %c0_i32_0 = arith.constant 0 : i32
    %c0_i32_1 = arith.constant 0 : i32
    %c0_i32_2 = arith.constant 0 : i32
    return %arg0, %c0_i32, %c0_i32_0, %c0_i32_1 : i32, i32, i32, i32
  }
  func.func @transform_1(%arg0: i32) -> (i32, i32) {
    %c0_i32 = arith.constant 0 : i32
    %c0_i32_0 = arith.constant 0 : i32
    %c0_i32_1 = arith.constant 0 : i32
    return %c0_i32, %c0_i32_0 : i32, i32
  }
  func.func @transform_2(%arg0: i32) -> (i32, i32) {
    %c0_i32 = arith.constant 0 : i32
    %c0_i32_0 = arith.constant 0 : i32
    %c0_i32_1 = arith.constant 0 : i32
    return %c0_i32, %c0_i32_0 : i32, i32
  }
  func.func @transform_3(%arg0: i32) -> (i32, i32) {
    %c0_i32 = arith.constant 0 : i32
    %c0_i32_0 = arith.constant 0 : i32
    %c0_i32_1 = arith.constant 0 : i32
    return %c0_i32, %c0_i32_0 : i32, i32
  }
  func.func @transform_4(%arg0: i32) -> (i32, i32) {
    %c0_i32 = arith.constant 0 : i32
    %c0_i32_0 = arith.constant 0 : i32
    %c0_i32_1 = arith.constant 0 : i32
    return %c0_i32, %c0_i32_0 : i32, i32
  }
  func.func @transform_5(%arg0: i32) -> (i32, i32, i32) {
    %c0_i32 = arith.constant 0 : i32
    %c0_i32_0 = arith.constant 0 : i32
    %c0_i32_1 = arith.constant 0 : i32
    return %arg0, %c0_i32, %c0_i32_0 : i32, i32, i32
  }
}

</mosaic_0001>

<bundles_post_ra>
// kernel: down_step.1
= control target key start
LH: loop header
LB: loop body
LE: loop exit
PB: predicated region body
PF: predicated region fallthrough
CT: control target
= control target key end

     0   :  { %s3363_s18 = smov 0   ;;  %s5290_s0 = inlined_call_operand.vmem [shape: f32[2,16,16,4], index: 0, kind: input, shape index: {}]   ;;  %s5291_s1 = inlined_call_operand.vmem [shape: f32[36,8], index: 1, kind: input, shape index: {}]   ;;  %s5292_s2 = inlined_call_operand.vmem [shape: f32[1,8], index: 2, kind: input, shape index: {}]   ;;  %s5293_s3 = inlined_call_operand.vmem [shape: f32[72,128], index: 3, kind: input, shape index: {}]   ;;  %s5294_s4 = inlined_call_operand.vmem [shape: f32[1,128], index: 4, kind: input, shape index: {}]   ;;  %s5295_s5 = inlined_call_operand.vmem [shape: f32[2,256,128], index: 5, kind: output, shape index: {}]  }
   0x1 LB: > { %s3000_s19 = sadd.s32 4294967295, %s3324_s18   ;;  %p3004_p0 = scmp.ge.s32.totalorder %s3324_s18, 1  ;;  %s3324_s18 = sphi %s3363_s18, %s15_s18  }
   0x2   : > { %p187_p1 = scmp.lt.s32.totalorder %s3324_s18, 3 }
   0x4   : > { %p188_p2 = pnand %p3004_p0, %p187_p1 }
   0x5   : > { %p3373_p3 = scmp.lt.s32.totalorder (!%p188_p2), %s3000_s19, 1  ;;  %s3327_s25 = smov (!%p188_p2), 4  }
   0x6   : > { %191 = sbr.rel (%p188_p2) target bundleno = 1102 (0x44e), region = 40  ;;  %s3328_s26 = smov (!%p188_p2), 8  }
   0x7   : > { %s3329_s12 = smov (!%p188_p2), 12   ;;  %s3330_s13 = smov (!%p188_p2), 24  }
   0x8   : > { %s3331_s14 = smov (!%p188_p2), 16   ;;  %s3332_s15 = smov (!%p188_p2), 48  }
   0xb   : > { %vm225_vm0 = vcmask 31744   ;;  %vm228_vm1 = vcmask 25600   ;;  %v3326_v0 = vmov 0.0   ;;  %s5298_s19 = smov (!%p3373_p3, %s3000_s19), 1  ;;  %vm888_vm2 = vcmask 64512  }
   0xc   : > { %233 = vst.msk [vmem:[#allocation2 + $0x30] sm:$0xff] %vm225_vm0, %v3326_v0  ;;  %234 = vst.msk [vmem:[#allocation2 + $0x38] sm:$0xff] %vm225_vm0, %v3326_v0  ;;  %s3078_s21 = sshll.u32 %s5298_s19, 8  ;;  %vm454_vm3 = vcmask 1046528   ;;  %vm653_vm4 = vcmask 1045504   ;;  %vm1326_vm5 = vcmask 1043456  }
   0xd   : > { %235 = vst.msk [vmem:[#allocation2 + $0x40] sm:$0x3] %vm228_vm1, %v3326_v0  ;;  %229 = vst.msk [vmem:[#allocation2 + $0x10] sm:$0x3] %vm228_vm1, %v3326_v0  ;;  %s3497_s24 = scalar_lea.vmem %s5290_s0, %s3078_s21  ;;  %vm1589_vm6 = vcmask 58368   ;;  %vm1151_vm7 = vcmask 97280   ;;  %s5222_s20 = scalar_lea.vmem %s5295_s5, %s3078_s21 }
   0xe   : > { %226 = vst.msk [vmem:[#allocation2] sm:$0xff] %vm225_vm0, %v3326_v0  ;;  %227 = vst.msk [vmem:[#allocation2 + $0x8] sm:$0xff] %vm225_vm0, %v3326_v0  ;;  %v283_v1 = vld [vmem:[%s3497_s24 + $0x10] sm:$0xff]  ;;  %v284_v2 = vld [vmem:[%s3497_s24 + $0x18] sm:$0xff]  ;;  %vm1184_vm8 = vcmask 195584   ;;  %vm1229_vm9 = vcmask 293888  }
   0xf   : > { %230 = vst.msk [vmem:[#allocation2 + $0x18] sm:$0xff] %vm225_vm0, %v3326_v0  ;;  %231 = vst.msk [vmem:[#allocation2 + $0x20] sm:$0xff] %vm225_vm0, %v3326_v0  ;;  %v281_v3 = vld [vmem:[%s3497_s24] sm:$0xff]  ;;  %v282_v4 = vld [vmem:[%s3497_s24 + $0x8] sm:$0xff]  ;;  %vm2215_vm10 = vcmask 130048   ;;  %vm2559_vm11 = vcmask 588800  }
  0x10   : > { %232 = vst.msk [vmem:[#allocation2 + $0x28] sm:$0x3] %vm228_vm1, %v3326_v0  ;;  %238 = vst.msk [vmem:[#allocation2 + $0x58] sm:$0x3] %vm228_vm1, %v3326_v0  ;;  %v285_v5 = vld [vmem:[%s3497_s24 + $0x20] sm:$0xff]  ;;  %v286_v6 = vld [vmem:[%s3497_s24 + $0x28] sm:$0xff] }
  0x11   : > { %236 = vst.msk [vmem:[#allocation2 + $0x48] sm:$0xff] %vm225_vm0, %v3326_v0  ;;  %237 = vst.msk [vmem:[#allocation2 + $0x50] sm:$0xff] %vm225_vm0, %v3326_v0  ;;  %v287_v7 = vld [vmem:[%s3497_s24 + $0x30] sm:$0xff]  ;;  %v288_v8 = vld [vmem:[%s3497_s24 + $0x38] sm:$0xff]  ;;  %vm2510_vm12 = vcmask 392192  }
  0x12   : > { %239 = vst.msk [vmem:[#allocation2 + $0x60] sm:$0xff] %vm225_vm0, %v3326_v0  ;;  %240 = vst.msk [vmem:[#allocation2 + $0x68] sm:$0xff] %vm225_vm0, %v3326_v0  ;;  %v289_v9 = vld [vmem:[%s3497_s24 + $0x40] sm:$0xff]  ;;  %v290_v10 = vld [vmem:[%s3497_s24 + $0x48] sm:$0xff] }
  0x13   : > { %241 = vst.msk [vmem:[#allocation2 + $0x70] sm:$0x3] %vm228_vm1, %v3326_v0  ;;  %244 = vst.msk [vmem:[#allocation2 + $0x88] sm:$0x3] %vm228_vm1, %v3326_v0  ;;  %v291_v11 = vld [vmem:[%s3497_s24 + $0x50] sm:$0xff]  ;;  %v292_v12 = vld [vmem:[%s3497_s24 + $0x58] sm:$0xff] }
  0x14   : > { %242 = vst.msk [vmem:[#allocation2 + $0x78] sm:$0xff] %vm225_vm0, %v3326_v0  ;;  %243 = vst.msk [vmem:[#allocation2 + $0x80] sm:$0xff] %vm225_vm0, %v3326_v0  ;;  %v293_v13 = vld [vmem:[%s3497_s24 + $0x60] sm:$0xff]  ;;  %v294_v14 = vld [vmem:[%s3497_s24 + $0x68] sm:$0xff] }
  0x15   : > { %245 = vst.msk [vmem:[#allocation2 + $0x90] sm:$0xff] %vm225_vm0, %v3326_v0  ;;  %246 = vst.msk [vmem:[#allocation2 + $0x98] sm:$0xff] %vm225_vm0, %v3326_v0  ;;  %v295_v15 = vld [vmem:[%s3497_s24 + $0x70] sm:$0xff]  ;;  %v296_v16 = vld [vmem:[%s3497_s24 + $0x78] sm:$0xff] }
  0x16   : > { %247 = vst.msk [vmem:[#allocation2 + $0xa0] sm:$0x3] %vm228_vm1, %v3326_v0  ;;  %250 = vst.msk [vmem:[#allocation2 + $0xb8] sm:$0x3] %vm228_vm1, %v3326_v0  ;;  %v297_v17 = vld [vmem:[%s3497_s24 + $0x80] sm:$0xff]  ;;  %v298_v18 = vld [vmem:[%s3497_s24 + $0x88] sm:$0xff] }
  0x17   : > { %248 = vst.msk [vmem:[#allocation2 + $0xa8] sm:$0xff] %vm225_vm0, %v3326_v0  ;;  %249 = vst.msk [vmem:[#allocation2 + $0xb0] sm:$0xff] %vm225_vm0, %v3326_v0  ;;  %v299_v19 = vld [vmem:[%s3497_s24 + $0x90] sm:$0xff]  ;;  %v300_v20 = vld [vmem:[%s3497_s24 + $0x98] sm:$0xff] }
  0x18   : > { %251 = vst.msk [vmem:[#allocation2 + $0xc0] sm:$0xff] %vm225_vm0, %v3326_v0  ;;  %252 = vst.msk [vmem:[#allocation2 + $0xc8] sm:$0xff] %vm225_vm0, %v3326_v0  ;;  %v301_v21 = vld [vmem:[%s3497_s24 + $0xa0] sm:$0xff]  ;;  %v302_v22 = vld [vmem:[%s3497_s24 + $0xa8] sm:$0xff] }
  0x19   : > { %253 = vst.msk [vmem:[#allocation2 + $0xd0] sm:$0x3] %vm228_vm1, %v3326_v0  ;;  %256 = vst.msk [vmem:[#allocation2 + $0xe8] sm:$0x3] %vm228_vm1, %v3326_v0  ;;  %v303_v23 = vld [vmem:[%s3497_s24 + $0xb0] sm:$0xff]  ;;  %v304_v24 = vld [vmem:[%s3497_s24 + $0xb8] sm:$0xff] }
  0x1a   : > { %254 = vst.msk [vmem:[#allocation2 + $0xd8] sm:$0xff] %vm225_vm0, %v3326_v0  ;;  %255 = vst.msk [vmem:[#allocation2 + $0xe0] sm:$0xff] %vm225_vm0, %v3326_v0  ;;  %v305_v57 = vld [vmem:[%s3497_s24 + $0xc0] sm:$0xff]  ;;  %v306_v58 = vld [vmem:[%s3497_s24 + $0xc8] sm:$0xff] }
  0x1b   : > { %257 = vst.msk [vmem:[#allocation2 + $0xf0] sm:$0xff] %vm225_vm0, %v3326_v0  ;;  %258 = vst.msk [vmem:[#allocation2 + $0xf8] sm:$0xff] %vm225_vm0, %v3326_v0  ;;  %v307_v59 = vld [vmem:[%s3497_s24 + $0xd0] sm:$0xff]  ;;  %v308_v60 = vld [vmem:[%s3497_s24 + $0xd8] sm:$0xff] }
  0x1c   : > { %259 = vst.msk [vmem:[#allocation2 + $0x100] sm:$0x3] %vm228_vm1, %v3326_v0  ;;  %262 = vst.msk [vmem:[#allocation2 + $0x118] sm:$0x3] %vm228_vm1, %v3326_v0  ;;  %v309_v61 = vld [vmem:[%s3497_s24 + $0xe0] sm:$0xff]  ;;  %v310_v62 = vld [vmem:[%s3497_s24 + $0xe8] sm:$0xff] }
  0x1d   : > { %260 = vst.msk [vmem:[#allocation2 + $0x108] sm:$0xff] %vm225_vm0, %v3326_v0  ;;  %261 = vst.msk [vmem:[#allocation2 + $0x110] sm:$0xff] %vm225_vm0, %v3326_v0  ;;  %v311_v63 = vld [vmem:[%s3497_s24 + $0xf0] sm:$0xff] }
  0x1e   : > { %263 = vst.msk [vmem:[#allocation2 + $0x120] sm:$0xff] %vm225_vm0, %v3326_v0  ;;  %264 = vst.msk [vmem:[#allocation2 + $0x128] sm:$0xff] %vm225_vm0, %v3326_v0 }
  0x1f   : > { %265 = vst.msk [vmem:[#allocation2 + $0x130] sm:$0x3] %vm228_vm1, %v3326_v0  ;;  %268 = vst.msk [vmem:[#allocation2 + $0x148] sm:$0x3] %vm228_vm1, %v3326_v0 }
  0x20   : > { %266 = vst.msk [vmem:[#allocation2 + $0x138] sm:$0xff] %vm225_vm0, %v3326_v0  ;;  %267 = vst.msk [vmem:[#allocation2 + $0x140] sm:$0xff] %vm225_vm0, %v3326_v0 }
  0x21   : > { %269 = vst.msk [vmem:[#allocation2 + $0x150] sm:$0xff] %vm225_vm0, %v3326_v0  ;;  %270 = vst.msk [vmem:[#allocation2 + $0x158] sm:$0xff] %vm225_vm0, %v3326_v0 }
  0x22   : > { %271 = vst.msk [vmem:[#allocation2 + $0x160] sm:$0x3] %vm228_vm1, %v3326_v0  ;;  %274 = vst.msk [vmem:[#allocation2 + $0x178] sm:$0x3] %vm228_vm1, %v3326_v0 }
  0x23   : > { %272 = vst.msk [vmem:[#allocation2 + $0x168] sm:$0xff] %vm225_vm0, %v3326_v0  ;;  %273 = vst.msk [vmem:[#allocation2 + $0x170] sm:$0xff] %vm225_vm0, %v3326_v0 }
  0x24   : > { %275 = vst.msk [vmem:[#allocation2 + $0x180] sm:$0xff] %vm225_vm0, %v3326_v0  ;;  %276 = vst.msk [vmem:[#allocation2 + $0x188] sm:$0xff] %vm225_vm0, %v3326_v0 }
  0x25   : > { %277 = vst.msk [vmem:[#allocation2 + $0x190] sm:$0x3] %vm228_vm1, %v3326_v0  ;;  %280 = vst.msk [vmem:[#allocation2 + $0x1a8] sm:$0x3] %vm228_vm1, %v3326_v0 }
  0x26   : > { %278 = vst.msk [vmem:[#allocation2 + $0x198] sm:$0xff] %vm225_vm0, %v3326_v0  ;;  %279 = vst.msk [vmem:[#allocation2 + $0x1a0] sm:$0xff] %vm225_vm0, %v3326_v0 }
  0x27   : > { %316 = vst.msk [vmem:[#allocation2 + $0x31] sm:$0xff] %vm225_vm0, %v283_v1  ;;  %317 = vst.msk [vmem:[#allocation2 + $0x39] sm:$0xff] %vm225_vm0, %v284_v2 }
  0x28   : > { %314 = vst.msk [vmem:[#allocation2 + $0x19] sm:$0xff] %vm225_vm0, %v281_v3  ;;  %315 = vst.msk [vmem:[#allocation2 + $0x21] sm:$0xff] %vm225_vm0, %v282_v4  ;;  %v312_v4 = vld [vmem:[%s3497_s24 + $0xf8] sm:$0xff] }
  0x29   : > { %318 = vst.msk [vmem:[#allocation2 + $0x49] sm:$0xff] %vm225_vm0, %v285_v5  ;;  %319 = vst.msk [vmem:[#allocation2 + $0x51] sm:$0xff] %vm225_vm0, %v286_v6 }
  0x2a   : > { %320 = vst.msk [vmem:[#allocation2 + $0x61] sm:$0xff] %vm225_vm0, %v287_v7  ;;  %321 = vst.msk [vmem:[#allocation2 + $0x69] sm:$0xff] %vm225_vm0, %v288_v8 }
  0x2b   : > { %322 = vst.msk [vmem:[#allocation2 + $0x79] sm:$0xff] %vm225_vm0, %v289_v9  ;;  %323 = vst.msk [vmem:[#allocation2 + $0x81] sm:$0xff] %vm225_vm0, %v290_v10 }
  0x2c   : > { %324 = vst.msk [vmem:[#allocation2 + $0x91] sm:$0xff] %vm225_vm0, %v291_v11  ;;  %325 = vst.msk [vmem:[#allocation2 + $0x99] sm:$0xff] %vm225_vm0, %v292_v12 }
  0x2d   : > { %1587 = vst.msk [vmem:[#allocation3] sm:$0xff] %vm888_vm2, %v3326_v0  ;;  %1588 = vst.msk [vmem:[#allocation3 + $0x8] sm:$0xff] %vm888_vm2, %v3326_v0 }
  0x2e   : > { %1591 = vst.msk [vmem:[#allocation3 + $0x18] sm:$0xff] %vm888_vm2, %v3326_v0  ;;  %1592 = vst.msk [vmem:[#allocation3 + $0x20] sm:$0xff] %vm888_vm2, %v3326_v0  ;;  %v3616_v25 = vld [vmem:[#allocation2 + $0x30] sm:$0xff]  ;;  %v3618_v26 = vld [vmem:[#allocation2 + $0x38] sm:$0xff] }
  0x2f   : > { %1594 = vst.msk [vmem:[#allocation3 + $0x30] sm:$0xff] %vm888_vm2, %v3326_v0  ;;  %1595 = vst.msk [vmem:[#allocation3 + $0x38] sm:$0xff] %vm888_vm2, %v3326_v0  ;;  %v3620_v27 = vld [vmem:[#allocation2 + $0x18] sm:$0xff]  ;;  %v465_v28 = vrot.slane %v3616_v25, 1  ;;  %v466_v29 = vrot.slane %v3618_v26, 1  ;;  %v3627_v30 = vld [vmem:[#allocation2 + $0x20] sm:$0xff] }
  0x30   : > { %1597 = vst.msk [vmem:[#allocation3 + $0x48] sm:$0xff] %vm888_vm2, %v3326_v0  ;;  %1598 = vst.msk [vmem:[#allocation3 + $0x50] sm:$0xff] %vm888_vm2, %v3326_v0  ;;  %v460_v31 = vrot.slane %v3620_v27, 1  ;;  %v659_v32 = vrot.slane %v3620_v27, 2  ;;  %v461_v33 = vrot.slane %v3627_v30, 1  ;;  %v660_v34 = vrot.slane %v3627_v30, 2 }
  0x31   : > { %1600 = vst.msk [vmem:[#allocation3 + $0x60] sm:$0xff] %vm888_vm2, %v3326_v0  ;;  %1601 = vst.msk [vmem:[#allocation3 + $0x68] sm:$0xff] %vm888_vm2, %v3326_v0  ;;  %v351_v35 = vld [vmem:[#allocation2 + $0x28] sm:$0x3]  ;;  %v467_v36 = vsel %vm454_vm3, %v465_v28, %v466_v29  ;;  %v354_v38 = vld [vmem:[#allocation2 + $0x40] sm:$0x3] }
  0x32   : > { %1603 = vst.msk [vmem:[#allocation3 + $0x78] sm:$0xff] %vm888_vm2, %v3326_v0  ;;  %1604 = vst.msk [vmem:[#allocation3 + $0x80] sm:$0xff] %vm888_vm2, %v3326_v0  ;;  %v463_v37 = vrot.slane %v351_v35, 1  ;;  %553 = vrot.lane.b32.xlu1 %v467_v36, %s3327_s25  ;;  %v462_v39 = vsel %vm454_vm3, %v460_v31, %v461_v33  ;;  %v661_v40 = vsel %vm653_vm4, %v659_v32, %v660_v34  ;;  %v662_v41 = vrot.slane %v351_v35, 2  ;;  %v3645_v49 = vld [vmem:[#allocation2 + $0x50] sm:$0xff]  ;;  %v3647_v51 = vld [vmem:[#allocation2 + $0x48] sm:$0xff] }
  0x33   : > { %1606 = vst.msk [vmem:[#allocation3 + $0x90] sm:$0xff] %vm888_vm2, %v3326_v0  ;;  %1607 = vst.msk [vmem:[#allocation3 + $0x98] sm:$0xff] %vm888_vm2, %v3326_v0  ;;  %549 = vrot.lane.b32.xlu0 %v462_v39, %s3327_s25  ;;  %v468_v43 = vrot.slane %v354_v38, 1  ;;  %v665_v45 = vrot.slane %v3618_v26, 2  ;;  %v667_v46 = vrot.slane %v354_v38, 2  ;;  %v664_v48 = vrot.slane %v3616_v25, 2 }
  0x34   : > { %1609 = vst.msk [vmem:[#allocation3 + $0xa8] sm:$0xff] %vm888_vm2, %v3326_v0  ;;  %1610 = vst.msk [vmem:[#allocation3 + $0xb0] sm:$0xff] %vm888_vm2, %v3326_v0  ;;  %v464_v42 = vsel %vm454_vm3, %v461_v33, %v463_v37  ;;  %v663_v44 = vsel %vm653_vm4, %v660_v34, %v662_v41  ;;  %v357_v50 = vld [vmem:[#allocation2 + $0x58] sm:$0x3]  ;;  %v471_v53 = vrot.slane %v3645_v49, 1  ;;  %v470_v56 = vrot.slane %v3647_v51, 1 }
  0x35   : > { %1612 = vst.msk [vmem:[#allocation3 + $0xc0] sm:$0xff] %vm888_vm2, %v3326_v0  ;;  %1613 = vst.msk [vmem:[#allocation3 + $0xc8] sm:$0xff] %vm888_vm2, %v3326_v0  ;;  %v469_v47 = vsel %vm454_vm3, %v466_v29, %v468_v43  ;;  %v668_v52 = vsel %vm653_vm4, %v665_v45, %v667_v46  ;;  %v473_v54 = vrot.slane %v357_v50, 1  ;;  %v666_v55 = vsel %vm653_vm4, %v664_v48, %v665_v45  ;;  %v3676_v7 = vld [vmem:[#allocation2 + $0x68] sm:$0xff]  ;;  %v360_v8 = vld [vmem:[#allocation2 + $0x70] sm:$0x3] }
  0x36   : > { %1615 = vst.msk [vmem:[#allocation3 + $0xd8] sm:$0xff] %vm888_vm2, %v3326_v0  ;;  %1616 = vst.msk [vmem:[#allocation3 + $0xe0] sm:$0xff] %vm888_vm2, %v3326_v0  ;;  %748 = vrot.lane.b32.xlu1 %v661_v40, %s3328_s26  ;;  %v670_v2 = vrot.slane %v3645_v49, 2  ;;  %v672_v3 = vrot.slane %v357_v50, 2  ;;  %v472_v5 = vsel %vm454_vm3, %v470_v56, %v471_v53  ;;  %v669_v6 = vrot.slane %v3647_v51, 2  ;;  %v3679_v9 = vld [vmem:[#allocation2 + $0x60] sm:$0xff] }
  0x37   : > { %1618 = vst.msk [vmem:[#allocation3 + $0xf0] sm:$0xff] %vm888_vm2, %v3326_v0  ;;  %1619 = vst.msk [vmem:[#allocation3 + $0xf8] sm:$0xff] %vm888_vm2, %v3326_v0  ;;  %551 = vrot.lane.b32.xlu0 %v464_v42, %s3327_s25  ;;  %v474_v1 = vsel %vm454_vm3, %v471_v53, %v473_v54  ;;  %v476_v11 = vrot.slane %v3676_v7, 1  ;;  %v478_v12 = vrot.slane %v360_v8, 1  ;;  %v3709_v37 = vld [vmem:[#allocation2 + $0x98] sm:$0xff]  ;;  %v3711_v39 = vld [vmem:[#allocation2 + $0x90] sm:$0xff] }
  0x38   : > { %1621 = vst.msk [vmem:[#allocation3 + $0x108] sm:$0xff] %vm888_vm2, %v3326_v0  ;;  %1622 = vst.msk [vmem:[#allocation3 + $0x110] sm:$0xff] %vm888_vm2, %v3326_v0  ;;  %v673_v10 = vsel %vm653_vm4, %v670_v2, %v672_v3  ;;  %v366_v38 = vld [vmem:[#allocation2 + $0xa0] sm:$0x3]  ;;  %v486_v41 = vrot.slane %v3709_v37, 1  ;;  %v685_v46 = vrot.slane %v3709_v37, 2 }
  0x39   : > { %1624 = vst.msk [vmem:[#allocation3 + $0x120] sm:$0xff] %vm888_vm2, %v3326_v0  ;;  %1625 = vst.msk [vmem:[#allocation3 + $0x128] sm:$0xff] %vm888_vm2, %v3326_v0  ;;  %v488_v42 = vrot.slane %v366_v38, 1  ;;  %v684_v50 = vrot.slane %v3711_v39, 2 }
  0x3a   : > { %1627 = vst.msk [vmem:[#allocation3 + $0x138] sm:$0xff] %vm888_vm2, %v3326_v0  ;;  %1628 = vst.msk [vmem:[#allocation3 + $0x140] sm:$0xff] %vm888_vm2, %v3326_v0  ;;  %750 = vrot.lane.b32.xlu1 %v663_v44, %s3328_s26  ;;  %v485_v44 = vrot.slane %v3711_v39, 1 }
  0x3b   : > { %1630 = vst.msk [vmem:[#allocation3 + $0x150] sm:$0xff] %vm888_vm2, %v3326_v0  ;;  %1631 = vst.msk [vmem:[#allocation3 + $0x158] sm:$0xff] %vm888_vm2, %v3326_v0  ;;  %555 = vrot.lane.b32.xlu0 %v469_v47, %s3327_s25  ;;  %v489_v45 = vsel %vm454_vm3, %v486_v41, %v488_v42  ;;  %v687_v47 = vrot.slane %v366_v38, 2 }
  0x3c   : > { %1633 = vst.msk [vmem:[#allocation3 + $0x168] sm:$0xff] %vm888_vm2, %v3326_v0  ;;  %1634 = vst.msk [vmem:[#allocation3 + $0x170] sm:$0xff] %vm888_vm2, %v3326_v0  ;;  %v487_v48 = vsel %vm454_vm3, %v485_v44, %v486_v41 }
  0x3d   : > { %1636 = vst.msk [vmem:[#allocation3 + $0x180] sm:$0xff] %vm888_vm2, %v3326_v0  ;;  %1637 = vst.msk [vmem:[#allocation3 + $0x188] sm:$0xff] %vm888_vm2, %v3326_v0 }
  0x3e   : > { %1639 = vst.msk [vmem:[#allocation3 + $0x198] sm:$0xff] %vm888_vm2, %v3326_v0  ;;  %1640 = vst.msk [vmem:[#allocation3 + $0x1a0] sm:$0xff] %vm888_vm2, %v3326_v0  ;;  %754 = vrot.lane.b32.xlu1 %v668_v52, %s3328_s26 }
  0x3f   : > { %326 = vst.msk [vmem:[#allocation2 + $0xa9] sm:$0xff] %vm225_vm0, %v293_v13  ;;  %327 = vst.msk [vmem:[#allocation2 + $0xb1] sm:$0xff] %vm225_vm0, %v294_v14  ;;  %752 = vrot.lane.b32.xlu0 %v666_v55, %s3328_s26  ;;  %v671_v13 = vsel %vm653_vm4, %v669_v6, %v670_v2  ;;  %v475_v14 = vrot.slane %v3679_v9, 1  ;;  %v688_v55 = vsel %vm653_vm4, %v685_v46, %v687_v47 }
  0x40   : > { %328 = vst.msk [vmem:[#allocation2 + $0xc1] sm:$0xff] %vm225_vm0, %v295_v15  ;;  %329 = vst.msk [vmem:[#allocation2 + $0xc9] sm:$0xff] %vm225_vm0, %v296_v16  ;;  %v479_v15 = vsel %vm454_vm3, %v476_v11, %v478_v12  ;;  %v675_v16 = vrot.slane %v3676_v7, 2 }
  0x41   : > { %330 = vst.msk [vmem:[#allocation2 + $0xd9] sm:$0xff] %vm225_vm0, %v297_v17  ;;  %331 = vst.msk [vmem:[#allocation2 + $0xe1] sm:$0xff] %vm225_vm0, %v298_v18  ;;  %v677_v17 = vrot.slane %v360_v8, 2  ;;  %v477_v18 = vsel %vm454_vm3, %v475_v14, %v476_v11 }
  0x42   : > { %332 = vst.msk [vmem:[#allocation2 + $0xf1] sm:$0xff] %vm225_vm0, %v299_v19  ;;  %333 = vst.msk [vmem:[#allocation2 + $0xf9] sm:$0xff] %vm225_vm0, %v300_v20  ;;  %559 = vrot.lane.b32.xlu1 %v474_v1, %s3327_s25  ;;  %v674_v19 = vrot.slane %v3679_v9, 2  ;;  %v3693_v20 = vld [vmem:[#allocation2 + $0x80] sm:$0xff] }
  0x43   : > { %334 = vst.msk [vmem:[#allocation2 + $0x109] sm:$0xff] %vm225_vm0, %v301_v21  ;;  %335 = vst.msk [vmem:[#allocation2 + $0x111] sm:$0xff] %vm225_vm0, %v302_v22  ;;  %557 = vrot.lane.b32.xlu0 %v472_v5, %s3327_s25  ;;  %v363_v21 = vld [vmem:[#allocation2 + $0x88] sm:$0x3]  ;;  %v3695_v22 = vld [vmem:[#allocation2 + $0x78] sm:$0xff]  ;;  %v680_v33 = vrot.slane %v3693_v20, 2 }
  0x44   : > { %336 = vst.msk [vmem:[#allocation2 + $0x121] sm:$0xff] %vm225_vm0, %v303_v23  ;;  %337 = vst.msk [vmem:[#allocation2 + $0x129] sm:$0xff] %vm225_vm0, %v304_v24  ;;  %v678_v23 = vsel %vm653_vm4, %v675_v16, %v677_v17  ;;  %v481_v24 = vrot.slane %v3693_v20, 1  ;;  %v483_v28 = vrot.slane %v363_v21, 1  ;;  %v676_v29 = vsel %vm653_vm4, %v674_v19, %v675_v16 }
  0x45   : > { %338 = vst.msk [vmem:[#allocation2 + $0x139] sm:$0xff] %vm225_vm0, %v305_v57  ;;  %339 = vst.msk [vmem:[#allocation2 + $0x141] sm:$0xff] %vm225_vm0, %v306_v58  ;;  %v480_v31 = vrot.slane %v3695_v22, 1  ;;  %v682_v34 = vrot.slane %v363_v21, 2  ;;  %v679_v36 = vrot.slane %v3695_v22, 2  ;;  %v686_v58 = vsel %vm653_vm4, %v684_v50, %v685_v46 }
  0x46   : > { %340 = vst.msk [vmem:[#allocation2 + $0x151] sm:$0xff] %vm225_vm0, %v307_v59  ;;  %341 = vst.msk [vmem:[#allocation2 + $0x159] sm:$0xff] %vm225_vm0, %v308_v60  ;;  %758 = vrot.lane.b32.xlu1 %v673_v10, %s3328_s26  ;;  %v484_v32 = vsel %vm454_vm3, %v481_v24, %v483_v28  ;;  %v3725_v52 = vld [vmem:[#allocation2 + $0xb0] sm:$0xff]  ;;  %v369_v53 = vld [vmem:[#allocation2 + $0xb8] sm:$0x3] }
  0x47   : > { %342 = vst.msk [vmem:[#allocation2 + $0x169] sm:$0xff] %vm225_vm0, %v309_v61  ;;  %343 = vst.msk [vmem:[#allocation2 + $0x171] sm:$0xff] %vm225_vm0, %v310_v62  ;;  %756 = vrot.lane.b32.xlu0 %v671_v13, %s3328_s26  ;;  %v482_v35 = vsel %vm454_vm3, %v480_v31, %v481_v24  ;;  %v683_v40 = vsel %vm653_vm4, %v680_v33, %v682_v34  ;;  %v681_v43 = vsel %vm653_vm4, %v679_v36, %v680_v33  ;;  %v3727_v54 = vld [vmem:[#allocation2 + $0xa8] sm:$0xff]  ;;  %v372_v3 = vld [vmem:[#allocation2 + $0xd0] sm:$0x3] }
  0x48   : > { %344 = vst.msk [vmem:[#allocation2 + $0x181] sm:$0xff] %vm225_vm0, %v311_v63  ;;  %345 = vst.msk [vmem:[#allocation2 + $0x189] sm:$0xff] %vm225_vm0, %v312_v4  ;;  %v491_v56 = vrot.slane %v3725_v52, 1  ;;  %v493_v57 = vrot.slane %v369_v53, 1  ;;  %v490_v59 = vrot.slane %v3727_v54, 1  ;;  %v690_v61 = vrot.slane %v3725_v52, 2 }
  0x49   : > { %v692_v62 = vrot.slane %v369_v53, 2  ;;  %v689_v1 = vrot.slane %v3727_v54, 2  ;;  %v3741_v2 = vld [vmem:[#allocation2 + $0xc8] sm:$0xff]  ;;  %v3743_v4 = vld [vmem:[#allocation2 + $0xc0] sm:$0xff]  ;;  %v498_v8 = vrot.slane %v372_v3, 1  ;;  %v697_v14 = vrot.slane %v372_v3, 2 }
  0x4a   : > { %563 = vrot.lane.b32.xlu1 %v479_v15, %s3327_s25  ;;  %v494_v60 = vsel %vm454_vm3, %v491_v56, %v493_v57  ;;  %v492_v63 = vsel %vm454_vm3, %v490_v59, %v491_v56  ;;  %v496_v6 = vrot.slane %v3741_v2, 1  ;;  %v495_v11 = vrot.slane %v3743_v4, 1  ;;  %v3757_v17 = vld [vmem:[#allocation2 + $0xe0] sm:$0xff]  ;;  %v3759_v19 = vld [vmem:[#allocation2 + $0xd8] sm:$0xff]  ;;  %v3791_v57 = vld [vmem:[#allocation2 + $0x108] sm:$0xff] }
  0x4b   : > { %561 = vrot.lane.b32.xlu0 %v477_v18, %s3327_s25  ;;  %v693_v5 = vsel %vm653_vm4, %v690_v61, %v692_v62  ;;  %v691_v10 = vsel %vm653_vm4, %v689_v1, %v690_v61  ;;  %v695_v13 = vrot.slane %v3741_v2, 2  ;;  %v694_v16 = vrot.slane %v3743_v4, 2  ;;  %v375_v18 = vld [vmem:[#allocation2 + $0xe8] sm:$0x3]  ;;  %v3773_v36 = vld [vmem:[#allocation2 + $0xf8] sm:$0xff] }
  0x4c   : > { %v499_v12 = vsel %vm454_vm3, %v496_v6, %v498_v8  ;;  %v497_v15 = vsel %vm454_vm3, %v495_v11, %v496_v6  ;;  %v503_v24 = vrot.slane %v375_v18, 1  ;;  %v702_v33 = vrot.slane %v375_v18, 2  ;;  %v378_v38 = vld [vmem:[#allocation2 + $0x100] sm:$0x3]  ;;  %v381_v56 = vld [vmem:[#allocation2 + $0x118] sm:$0x3] }
  0x4d   : > { %v698_v21 = vsel %vm653_vm4, %v695_v13, %v697_v14  ;;  %v696_v28 = vsel %vm653_vm4, %v694_v16, %v695_v13  ;;  %v506_v42 = vrot.slane %v3773_v36, 1  ;;  %v705_v47 = vrot.slane %v3773_v36, 2  ;;  %v3805_v8 = vld [vmem:[#allocation2 + $0x128] sm:$0xff]  ;;  %v3807_v11 = vld [vmem:[#allocation2 + $0x120] sm:$0xff]  ;;  %1641 = vst.msk [vmem:[#allocation3 + $0x1a8] sm:$0x3] %vm1589_vm6, %v3326_v0 }
  0x4e   : > { %762 = vrot.lane.b32.xlu1 %v678_v23, %s3328_s26  ;;  %v501_v23 = vrot.slane %v3757_v17, 1  ;;  %v510_v62 = vrot.slane %v3791_v57, 1  ;;  %v712_v3 = vrot.slane %v381_v56, 2  ;;  %v709_v6 = vrot.slane %v3791_v57, 2  ;;  %1590 = vst.msk [vmem:[#allocation3 + $0x10] sm:$0x3] %vm1589_vm6, %v3326_v0 }
  0x4f   : > { %760 = vrot.lane.b32.xlu0 %v676_v29, %s3328_s26  ;;  %v500_v29 = vrot.slane %v3759_v19, 1  ;;  %v516_v13 = vrot.slane %v3805_v8, 1  ;;  %v515_v16 = vrot.slane %v3807_v11, 1  ;;  %1593 = vst.msk [vmem:[#allocation3 + $0x28] sm:$0x3] %vm1589_vm6, %v3326_v0 }
  0x50   : > { %v504_v31 = vsel %vm454_vm3, %v501_v23, %v503_v24  ;;  %1596 = vst.msk [vmem:[#allocation3 + $0x40] sm:$0x3] %vm1589_vm6, %v3326_v0  ;;  %1599 = vst.msk [vmem:[#allocation3 + $0x58] sm:$0x3] %vm1589_vm6, %v3326_v0 }
  0x51   : > { %v502_v34 = vsel %vm454_vm3, %v500_v29, %v501_v23  ;;  %v517_v24 = vsel %vm454_vm3, %v515_v16, %v516_v13  ;;  %v3821_v29 = vld [vmem:[#allocation2 + $0x140] sm:$0xff]  ;;  %1602 = vst.msk [vmem:[#allocation3 + $0x70] sm:$0x3] %vm1589_vm6, %v3326_v0  ;;  %1605 = vst.msk [vmem:[#allocation3 + $0x88] sm:$0x3] %vm1589_vm6, %v3326_v0 }
  0x52   : > { %567 = vrot.lane.b32.xlu1 %v484_v32, %s3327_s25  ;;  %v700_v32 = vrot.slane %v3757_v17, 2  ;;  %1608 = vst.msk [vmem:[#allocation3 + $0xa0] sm:$0x3] %vm1589_vm6, %v3326_v0  ;;  %1611 = vst.msk [vmem:[#allocation3 + $0xb8] sm:$0x3] %vm1589_vm6, %v3326_v0 }
  0x53   : > { %565 = vrot.lane.b32.xlu0 %v482_v35, %s3327_s25  ;;  %v699_v35 = vrot.slane %v3759_v19, 2  ;;  %1614 = vst.msk [vmem:[#allocation3 + $0xd0] sm:$0x3] %vm1589_vm6, %v3326_v0  ;;  %1617 = vst.msk [vmem:[#allocation3 + $0xe8] sm:$0x3] %vm1589_vm6, %v3326_v0 }
  0x54   : > { %v703_v41 = vsel %vm653_vm4, %v700_v32, %v702_v33  ;;  %1620 = vst.msk [vmem:[#allocation3 + $0x100] sm:$0x3] %vm1589_vm6, %v3326_v0  ;;  %1623 = vst.msk [vmem:[#allocation3 + $0x118] sm:$0x3] %vm1589_vm6, %v3326_v0 }
  0x55   : > { %v701_v44 = vsel %vm653_vm4, %v699_v35, %v700_v32  ;;  %v3823_v32 = vld [vmem:[#allocation2 + $0x138] sm:$0xff]  ;;  %1626 = vst.msk [vmem:[#allocation3 + $0x130] sm:$0x3] %vm1589_vm6, %v3326_v0  ;;  %1629 = vst.msk [vmem:[#allocation3 + $0x148] sm:$0x3] %vm1589_vm6, %v3326_v0 }
  0x56   : > { %766 = vrot.lane.b32.xlu1 %v683_v40, %s3328_s26  ;;  %v3775_v40 = vld [vmem:[#allocation2 + $0xf0] sm:$0xff]  ;;  %1632 = vst.msk [vmem:[#allocation3 + $0x160] sm:$0x3] %vm1589_vm6, %v3326_v0  ;;  %1635 = vst.msk [vmem:[#allocation3 + $0x178] sm:$0x3] %vm1589_vm6, %v3326_v0 }
  0x57   : > { %764 = vrot.lane.b32.xlu0 %v681_v43, %s3328_s26  ;;  %v508_v43 = vrot.slane %v378_v38, 1  ;;  %v704_v53 = vrot.slane %v3775_v40, 2  ;;  %1638 = vst.msk [vmem:[#allocation3 + $0x190] sm:$0x3] %vm1589_vm6, %v3326_v0 }
  0x59   : > { %v509_v46 = vsel %vm454_vm3, %v506_v42, %v508_v43  ;;  %v706_v61 = vsel %vm653_vm4, %v704_v53, %v705_v47  ;;  %v720_v43 = vrot.slane %v3821_v29, 2 }
  0x5a   : > { %571 = vrot.lane.b32.xlu1 %v489_v45, %s3327_s25  ;;  %v505_v45 = vrot.slane %v3775_v40, 1 }
  0x5b   : > { %569 = vrot.lane.b32.xlu0 %v487_v48, %s3327_s25  ;;  %v707_v48 = vrot.slane %v378_v38, 2 }
  0x5c   : > { %v507_v50 = vsel %vm454_vm3, %v505_v45, %v506_v42 }
  0x5e   : > { %770 = vrot.lane.b32.xlu1 %v688_v55, %s3328_s26  ;;  %v3789_v55 = vld [vmem:[#allocation2 + $0x110] sm:$0xff] }
  0x5f   : > { %768 = vrot.lane.b32.xlu0 %v686_v58, %s3328_s26  ;;  %v708_v58 = vsel %vm653_vm4, %v705_v47, %v707_v48  ;;  %v511_v59 = vrot.slane %v3789_v55, 1  ;;  %v710_v1 = vrot.slane %v3789_v55, 2  ;;  %v3837_v47 = vld [vmem:[#allocation2 + $0x158] sm:$0xff]  ;;  %v390_v48 = vld [vmem:[#allocation2 + $0x160] sm:$0x3] }
  0x62   : > { %575 = vrot.lane.b32.xlu1 %v494_v60, %s3327_s25  ;;  %v513_v60 = vrot.slane %v381_v56, 1  ;;  %v526_v56 = vrot.slane %v3837_v47, 1 }
  0x63   : > { %573 = vrot.lane.b32.xlu0 %v492_v63, %s3327_s25 }
  0x64   : > { %v514_v63 = vsel %vm454_vm3, %v511_v59, %v513_v60 }
  0x66   : > { %774 = vrot.lane.b32.xlu1 %v693_v5, %s3328_s26  ;;  %v512_v5 = vsel %vm454_vm3, %v510_v62, %v511_v59  ;;  %v725_v62 = vrot.slane %v3837_v47, 2 }
  0x67   : > { %772 = vrot.lane.b32.xlu0 %v691_v10, %s3328_s26  ;;  %v384_v10 = vld [vmem:[#allocation2 + $0x130] sm:$0x3] }
  0x68   : > { %v518_v14 = vrot.slane %v384_v10, 1  ;;  %v717_v23 = vrot.slane %v384_v10, 2  ;;  %v3855_v10 = vld [vmem:[#allocation2 + $0x168] sm:$0xff] }
  0x69   : > { %v530_v16 = vrot.slane %v3855_v10, 1 }
  0x6a   : > { %579 = vrot.lane.b32.xlu1 %v499_v12, %s3327_s25  ;;  %v713_v12 = vsel %vm653_vm4, %v710_v1, %v712_v3  ;;  %v519_v18 = vsel %vm454_vm3, %v516_v13, %v518_v14 }
  0x6b   : > { %577 = vrot.lane.b32.xlu0 %v497_v15, %s3327_s25  ;;  %v711_v15 = vsel %vm653_vm4, %v709_v6, %v710_v1  ;;  %v393_v6 = vld [vmem:[#allocation2 + $0x178] sm:$0x3] }
  0x6c   : > { %v533_v14 = vrot.slane %v393_v6, 1 }
  0x6e   : > { %778 = vrot.lane.b32.xlu1 %v698_v21, %s3328_s26  ;;  %v715_v21 = vrot.slane %v3805_v8, 2 }
  0x6f   : > { %776 = vrot.lane.b32.xlu0 %v696_v28, %s3328_s26  ;;  %v714_v28 = vrot.slane %v3807_v11, 2 }
  0x70   : > { %v718_v33 = vsel %vm653_vm4, %v715_v21, %v717_v23  ;;  %v732_v23 = vrot.slane %v393_v6, 2 }
  0x71   : > { %v716_v38 = vsel %vm653_vm4, %v714_v28, %v715_v21  ;;  %v729_v28 = vrot.slane %v3855_v10, 2 }
  0x72   : > { %583 = vrot.lane.b32.xlu1 %v504_v31, %s3327_s25  ;;  %v387_v31 = vld [vmem:[#allocation2 + $0x148] sm:$0x3] }
  0x73   : > { %581 = vrot.lane.b32.xlu0 %v502_v34, %s3327_s25  ;;  %v521_v34 = vrot.slane %v3821_v29, 1  ;;  %v523_v35 = vrot.slane %v387_v31, 1 }
  0x75   : > { %v524_v42 = vsel %vm454_vm3, %v521_v34, %v523_v35  ;;  %v3875_v35 = vld [vmem:[#allocation2 + $0x188] sm:$0xff] }
  0x76   : > { %782 = vrot.lane.b32.xlu1 %v703_v41, %s3328_s26  ;;  %v520_v41 = vrot.slane %v3823_v32, 1 }
  0x77   : > { %780 = vrot.lane.b32.xlu0 %v701_v44, %s3328_s26  ;;  %v722_v44 = vrot.slane %v387_v31, 2  ;;  %v3869_v31 = vld [vmem:[#allocation2] sm:$0xff] }
  0x78   : > { %v522_v45 = vsel %vm454_vm3, %v520_v41, %v521_v34  ;;  %v3873_v34 = vld [vmem:[#allocation2 + $0x180] sm:$0xff]  ;;  %v455_v41 = vrot.slane %v3869_v31, 1  ;;  %v654_v6 = vrot.slane %v3869_v31, 2 }
  0x79   : > { %v723_v53 = vsel %vm653_vm4, %v720_v43, %v722_v44 }
  0x7a   : > { %587 = vrot.lane.b32.xlu1 %v509_v46, %s3327_s25  ;;  %v719_v46 = vrot.slane %v3823_v32, 2 }
  0x7b   : > { %585 = vrot.lane.b32.xlu0 %v507_v50, %s3327_s25  ;;  %v3839_v50 = vld [vmem:[#allocation2 + $0x150] sm:$0xff] }
  0x7c   : > { %v721_v59 = vsel %vm653_vm4, %v719_v46, %v720_v43  ;;  %v525_v60 = vrot.slane %v3839_v50, 1  ;;  %v724_v3 = vrot.slane %v3839_v50, 2  ;;  %v536_v46 = vrot.slane %v3875_v35, 1 }
  0x7e   : > { %786 = vrot.lane.b32.xlu1 %v708_v58, %s3328_s26  ;;  %v528_v58 = vrot.slane %v390_v48, 1  ;;  %v527_v1 = vsel %vm454_vm3, %v525_v60, %v526_v56 }
  0x7f   : > { %784 = vrot.lane.b32.xlu0 %v706_v61, %s3328_s26 }
  0x80   : > { %v529_v61 = vsel %vm454_vm3, %v526_v56, %v528_v58  ;;  %v734_v58 = vrot.slane %v3873_v34, 2 }
  0x82   : > { %591 = vrot.lane.b32.xlu1 %v514_v63, %s3327_s25  ;;  %v727_v63 = vrot.slane %v390_v48, 2 }
  0x83   : > { %589 = vrot.lane.b32.xlu0 %v512_v5, %s3327_s25  ;;  %v3853_v5 = vld [vmem:[#allocation2 + $0x170] sm:$0xff] }
  0x84   : > { %v531_v13 = vrot.slane %v3853_v5, 1  ;;  %v730_v21 = vrot.slane %v3853_v5, 2 }
  0x86   : > { %790 = vrot.lane.b32.xlu1 %v713_v12, %s3328_s26  ;;  %v728_v12 = vsel %vm653_vm4, %v725_v62, %v727_v63  ;;  %v731_v44 = vsel %vm653_vm4, %v729_v28, %v730_v21 }
  0x87   : > { %788 = vrot.lane.b32.xlu0 %v711_v15, %s3328_s26  ;;  %v726_v15 = vsel %vm653_vm4, %v724_v3, %v725_v62 }
  0x8a   : > { %595 = vrot.lane.b32.xlu1 %v519_v18, %s3327_s25  ;;  %v534_v18 = vsel %vm454_vm3, %v531_v13, %v533_v14 }
  0x8b   : > { %593 = vrot.lane.b32.xlu0 %v517_v24, %s3327_s25  ;;  %v532_v24 = vsel %vm454_vm3, %v530_v16, %v531_v13 }
  0x8e   : > { %794 = vrot.lane.b32.xlu1 %v718_v33, %s3328_s26  ;;  %v3871_v33 = vld [vmem:[#allocation2 + $0x8] sm:$0xff] }
  0x8f   : > { %792 = vrot.lane.b32.xlu0 %v716_v38, %s3328_s26  ;;  %v733_v38 = vsel %vm653_vm4, %v730_v21, %v732_v23  ;;  %v1221_v23 = vld [vmem:[%s5291_s1 + $0x20] sm:$0xf] }
  0x90   : > { %3158 = vmatprep.subr.msk.mxu0 %vm1326_vm5, %v1221_v23 }
  0x91   : > { %3159 = vmatpush3.msk.msra.mxu0 %vm1326_vm5, %v1221_v23 }
  0x92   : > { %599 = vrot.lane.b32.xlu1 %v524_v42, %s3327_s25  ;;  %v456_v42 = vrot.slane %v3871_v33, 1 }
  0x93   : > { %597 = vrot.lane.b32.xlu0 %v522_v45, %s3327_s25  ;;  %v535_v45 = vrot.slane %v3873_v34, 1 }
  0x94   : > { %v457_v56 = vsel %vm454_vm3, %v455_v41, %v456_v42  ;;  %v3910_v41 = vld [vmem:[#allocation2 + $0x198] sm:$0xff] }
  0x95   : > { %v739_v23 = vrot.slane %v3910_v41, 2 }
  0x96   : > { %798 = vrot.lane.b32.xlu1 %v723_v53, %s3328_s26  ;;  %v396_v53 = vld [vmem:[#allocation2 + $0x190] sm:$0x3] }
  0x97   : > { %796 = vrot.lane.b32.xlu0 %v721_v59, %s3328_s26  ;;  %v735_v59 = vrot.slane %v3875_v35, 2  ;;  %v538_v62 = vrot.slane %v396_v53, 1 }
  0x99   : > { %v736_v3 = vsel %vm653_vm4, %v734_v58, %v735_v59  ;;  %v539_v14 = vsel %vm454_vm3, %v536_v46, %v538_v62  ;;  %v1219_v58 = vld [vmem:[%s5291_s1 + $0x10] sm:$0xff] }
  0x9a   : > { %603 = vrot.lane.b32.xlu1 %v529_v61, %s3327_s25  ;;  %v537_v61 = vsel %vm454_vm3, %v535_v45, %v536_v46  ;;  %v1220_v46 = vld [vmem:[%s5291_s1 + $0x18] sm:$0xff] }
  0x9b   : > { %601 = vrot.lane.b32.xlu0 %v527_v1, %s3327_s25  ;;  %v348_v1 = vld [vmem:[#allocation2 + $0x10] sm:$0x3]  ;;  %3160 = vmatprep.subr.mxu0 %v1220_v46 }
  0x9c   : > { %v657_v21 = vrot.slane %v348_v1, 2  ;;  %3161 = vmatpush3.msra.mxu0 %v1220_v46 }
  0x9d   : > { %3162 = vmatprep.subr.mxu0 %v1219_v58 }
  0x9e   : > { %802 = vrot.lane.b32.xlu1 %v728_v12, %s3328_s26  ;;  %v655_v12 = vrot.slane %v3871_v33, 2  ;;  %3163 = vmatpush3.msra.mxu0 %v1219_v58 }
  0x9f   : > { %800 = vrot.lane.b32.xlu0 %v726_v15, %s3328_s26  ;;  %v458_v15 = vrot.slane %v348_v1, 1 }
  0xa1   : > { %v459_v28 = vsel %vm454_vm3, %v456_v42, %v458_v15  ;;  %v540_v42 = vrot.slane %v3910_v41, 1 }
  0xa2   : > { %607 = vrot.lane.b32.xlu1 %v534_v18, %s3327_s25  ;;  %v656_v18 = vsel %vm653_vm4, %v654_v6, %v655_v12 }
  0xa3   : > { %605 = vrot.lane.b32.xlu0 %v532_v24, %s3327_s25 }
  0xa4   : > { %v3882_v43 = vpop.permute.xlu1 %553 }
  0xa5   : > { %v550_v48 = vpop.permute.xlu0 %549 }
  0xa6   : > { %806 = vrot.lane.b32.xlu1 %v733_v38, %s3328_s26  ;;  %v737_v38 = vrot.slane %v396_v53, 2 }
  0xa7   : > { %804 = vrot.lane.b32.xlu0 %v731_v44, %s3328_s26  ;;  %v3912_v44 = vld [vmem:[#allocation2 + $0x1a0] sm:$0xff] }
  0xa8   : > { %v749_v60 = vpop.permute.xlu1 %748  ;;  %v541_v53 = vrot.slane %v3912_v44, 1  ;;  %v738_v62 = vsel %vm653_vm4, %v735_v59, %v737_v38 }
  0xa9   : > { %v552_v63 = vpop.permute.xlu0 %551 }
  0xaa   : > { %545 = vrot.lane.b32.xlu1 %v457_v56, %s3327_s25  ;;  %v658_v56 = vsel %vm653_vm4, %v655_v12, %v657_v21  ;;  %v542_v6 = vsel %vm454_vm3, %v540_v42, %v541_v53  ;;  %v1217_v12 = vld [vmem:[%s5291_s1] sm:$0xff]  ;;  %v855_v46 = vsel %vm225_vm0, %v3627_v30, %v552_v63 }
  0xab   : > { %609 = vrot.lane.b32.xlu0 %v537_v61, %s3327_s25 }
  0xac   : > { %v751_v13 = vpop.permute.xlu1 %750 }
  0xad   : > { %v3899_v16 = vpop.permute.xlu0 %555  ;;  %v3954_v42 = vsel %vm888_vm2, %v855_v46, %v751_v13 }
  0xae   : > { %808 = vrot.lane.b32.xlu1 %v736_v3, %s3328_s26  ;;  %v1218_v3 = vld [vmem:[%s5291_s1 + $0x8] sm:$0xff] }
  0xaf   : > { %611 = vrot.lane.b32.xlu0 %v539_v14, %s3327_s25  ;;  %3164 = vmatprep.subr.mxu0 %v1218_v3  ;;  %v854_v14 = vsel %vm225_vm0, %v3620_v27, %v550_v48  ;;  %v856_v27 = vsel %vm225_vm0, %v3616_v25, %v3882_v43 }
  0xb0   : > { %v3907_v24 = vpop.permute.xlu1 %754  ;;  %3165 = vmatpush3.msra.mxu0 %v1218_v3  ;;  %v3939_v21 = vsel %vm888_vm2, %v854_v14, %v749_v60 }
  0xb1   : > { %v753_v45 = vpop.permute.xlu0 %752  ;;  %3166 = vmatprep.subr.mxu0 %v1217_v12 }
  0xb2   : > { %744 = vrot.lane.b32.xlu1 %v656_v18, %s3328_s26  ;;  %v399_v18 = vld [vmem:[#allocation2 + $0x1a8] sm:$0x3]  ;;  %3167 = vmatpush3.msra.mxu0 %v1217_v12 }
  0xb3   : > { %547 = vrot.lane.b32.xlu0 %v459_v28, %s3327_s25  ;;  %v740_v28 = vrot.slane %v3912_v44, 2  ;;  %v543_v38 = vrot.slane %v399_v18, 1  ;;  %v742_v43 = vrot.slane %v399_v18, 2 }
  0xb4   : > { %v560_v61 = vpop.permute.xlu1 %559 }
  0xb5   : > { %v558_v1 = vpop.permute.xlu0 %557  ;;  %v741_v25 = vsel %vm653_vm4, %v739_v23, %v740_v28  ;;  %v544_v30 = vsel %vm454_vm3, %v541_v53, %v543_v38  ;;  %v743_v13 = vsel %vm653_vm4, %v740_v28, %v742_v43 }
  0xb6   : > { %746 = vrot.lane.b32.xlu1 %v658_v56, %s3328_s26  ;;  %v3951_v56 = vsel %vm888_vm2, %v856_v27, %v753_v45 }
  0xb7   : > { %810 = vrot.lane.b32.xlu0 %v738_v62, %s3328_s26  ;;  %v857_v62 = vsel %vm225_vm0, %v3618_v26, %v3899_v16  ;;  %v859_v26 = vsel %vm225_vm0, %v3645_v49, %v560_v61 }
  0xb8   : > { %v759_v59 = vpop.permute.xlu1 %758 }
  0xb9   : > { %v757_v15 = vpop.permute.xlu0 %756  ;;  %v3984_v18 = vsel %vm888_vm2, %v859_v26, %v759_v59 }
  0xba   : > { %613 = vrot.lane.b32.xlu1 %v542_v6, %s3327_s25  ;;  %v3970_v6 = vsel %vm888_vm2, %v857_v62, %v3907_v24  ;;  %v858_v24 = vsel %vm225_vm0, %v3647_v51, %v558_v1 }
  0xbb   : > { %957 = vrot.lane.b32.xlu0 %v3939_v21, %s3329_s12  ;;  %v3989_v23 = vsel %vm888_vm2, %v858_v24, %v757_v15 }
  0xbc   : > { %v564_v48 = vpop.permute.xlu1 %563 }
  0xbd   : > { %v562_v60 = vpop.permute.xlu0 %561  ;;  %v861_v49 = vsel %vm225_vm0, %v3676_v7, %v564_v48 }
  0xbe   : > { %1055 = vrot.lane.b32.xlu1 %v3951_v56, %s3330_s13  ;;  %v860_v61 = vsel %vm225_vm0, %v3679_v9, %v562_v60 }
  0xbf   : > { %959 = vrot.lane.b32.xlu0 %v3954_v42, %s3329_s12 }
  0xc0   : > { %v763_v58 = vpop.permute.xlu1 %762 }
  0xc1   : > { %v761_v63 = vpop.permute.xlu0 %760  ;;  %v4002_v59 = vsel %vm888_vm2, %v861_v49, %v763_v58 }
  0xc2   : > { %812 = vrot.lane.b32.xlu1 %v741_v25, %s3328_s26  ;;  %v4007_v15 = vsel %vm888_vm2, %v860_v61, %v761_v63 }
  0xc3   : > { %615 = vrot.lane.b32.xlu0 %v544_v30, %s3327_s25 }
  0xc4   : > { %v568_v45 = vpop.permute.xlu1 %567 }
  0xc5   : > { %v566_v3 = vpop.permute.xlu0 %565  ;;  %v863_v7 = vsel %vm225_vm0, %v3693_v20, %v568_v45 }
  0xc6   : > { %814 = vrot.lane.b32.xlu1 %v743_v13, %s3328_s26  ;;  %v862_v48 = vsel %vm225_vm0, %v3695_v22, %v566_v3 }
  0xc7   : > { %1057 = vrot.lane.b32.xlu0 %v3970_v6, %s3330_s13 }
  0xc8   : > { %v767_v53 = vpop.permute.xlu1 %766 }
  0xc9   : > { %v765_v12 = vpop.permute.xlu0 %764  ;;  %v4020_v25 = vsel %vm888_vm2, %v863_v7, %v767_v53 }
  0xca   : > { %963 = vrot.lane.b32.xlu1 %v3970_v6, %s3329_s12  ;;  %v4025_v43 = vsel %vm888_vm2, %v862_v48, %v765_v12 }
  0xcb   : > { %961 = vrot.lane.b32.xlu0 %v3951_v56, %s3329_s12 }
  0xcc   : > { %v572_v16 = vpop.permute.xlu1 %571 }
  0xcd   : > { %v570_v14 = vpop.permute.xlu0 %569  ;;  %v865_v20 = vsel %vm225_vm0, %v3709_v37, %v572_v16 }
  0xce   : > { %1061 = vrot.lane.b32.xlu1 %v3984_v18, %s3330_s13  ;;  %v864_v63 = vsel %vm225_vm0, %v3711_v39, %v570_v14 }
  0xcf   : > { %1059 = vrot.lane.b32.xlu0 %v3989_v23, %s3330_s13 }
  0xd0   : > { %v771_v28 = vpop.permute.xlu1 %770 }
  0xd1   : > { %v769_v27 = vpop.permute.xlu0 %768  ;;  %v4038_v45 = vsel %vm888_vm2, %v865_v20, %v771_v28 }
  0xd2   : > { %967 = vrot.lane.b32.xlu1 %v3984_v18, %s3329_s12  ;;  %v4043_v62 = vsel %vm888_vm2, %v864_v63, %v769_v27 }
  0xd3   : > { %965 = vrot.lane.b32.xlu0 %v3989_v23, %s3329_s12 }
  0xd4   : > { %v576_v51 = vpop.permute.xlu1 %575 }
  0xd5   : > { %v574_v1 = vpop.permute.xlu0 %573  ;;  %v867_v37 = vsel %vm225_vm0, %v3725_v52, %v576_v51 }
  0xd6   : > { %1065 = vrot.lane.b32.xlu1 %v4002_v59, %s3330_s13  ;;  %v866_v12 = vsel %vm225_vm0, %v3727_v54, %v574_v1 }
  0xd7   : > { %1063 = vrot.lane.b32.xlu0 %v4007_v15, %s3330_s13 }
  0xd8   : > { %v775_v38 = vpop.permute.xlu1 %774 }
  0xd9   : > { %v773_v46 = vpop.permute.xlu0 %772  ;;  %v4056_v16 = vsel %vm888_vm2, %v867_v37, %v775_v38 }
  0xda   : > { %971 = vrot.lane.b32.xlu1 %v4002_v59, %s3329_s12  ;;  %v4061_v24 = vsel %vm888_vm2, %v866_v12, %v773_v46 }
  0xdb   : > { %969 = vrot.lane.b32.xlu0 %v4007_v15, %s3329_s12 }
  0xdc   : > { %v580_v9 = vpop.permute.xlu1 %579 }
  0xdd   : > { %v578_v60 = vpop.permute.xlu0 %577  ;;  %v869_v52 = vsel %vm225_vm0, %v3741_v2, %v580_v9 }
  0xde   : > { %1069 = vrot.lane.b32.xlu1 %v4020_v25, %s3330_s13  ;;  %v868_v27 = vsel %vm225_vm0, %v3743_v4, %v578_v60 }
  0xdf   : > { %1067 = vrot.lane.b32.xlu0 %v4025_v43, %s3330_s13 }
  0xe0   : > { %v779_v58 = vpop.permute.xlu1 %778 }
  0xe1   : > { %v777_v30 = vpop.permute.xlu0 %776  ;;  %v4074_v49 = vsel %vm888_vm2, %v869_v52, %v779_v58 }
  0xe2   : > { %975 = vrot.lane.b32.xlu1 %v4020_v25, %s3329_s12  ;;  %v4077_v61 = vsel %vm888_vm2, %v868_v27, %v777_v30 }
  0xe3   : > { %973 = vrot.lane.b32.xlu0 %v4025_v43, %s3329_s12 }
  0xe4   : > { %v584_v22 = vpop.permute.xlu1 %583 }
  0xe5   : > { %v582_v13 = vpop.permute.xlu0 %581  ;;  %v871_v2 = vsel %vm225_vm0, %v3757_v17, %v584_v22 }
  0xe6   : > { %1073 = vrot.lane.b32.xlu1 %v4038_v45, %s3330_s13  ;;  %v870_v46 = vsel %vm225_vm0, %v3759_v19, %v582_v13 }
  0xe7   : > { %1071 = vrot.lane.b32.xlu0 %v4043_v62, %s3330_s13 }
  0xe8   : > { %v783_v3 = vpop.permute.xlu1 %782 }
  0xe9   : > { %v781_v53 = vpop.permute.xlu0 %780  ;;  %v4092_v7 = vsel %vm888_vm2, %v871_v2, %v783_v3 }
  0xea   : > { %979 = vrot.lane.b32.xlu1 %v4038_v45, %s3329_s12  ;;  %v4095_v48 = vsel %vm888_vm2, %v870_v46, %v781_v53 }
  0xeb   : > { %977 = vrot.lane.b32.xlu0 %v4043_v62, %s3329_s12 }
  0xec   : > { %v588_v39 = vpop.permute.xlu1 %587 }
  0xed   : > { %v586_v26 = vpop.permute.xlu0 %585  ;;  %v873_v17 = vsel %vm225_vm0, %v3773_v36, %v588_v39 }
  0xee   : > { %1077 = vrot.lane.b32.xlu1 %v4056_v16, %s3330_s13  ;;  %v872_v30 = vsel %vm225_vm0, %v3775_v40, %v586_v26 }
  0xef   : > { %1075 = vrot.lane.b32.xlu0 %v4061_v24, %s3330_s13 }
  0xf0   : > { %v787_v14 = vpop.permute.xlu1 %786 }
  0xf1   : > { %v785_v28 = vpop.permute.xlu0 %784  ;;  %v4110_v20 = vsel %vm888_vm2, %v873_v17, %v787_v14 }
  0xf2   : > { %983 = vrot.lane.b32.xlu1 %v4056_v16, %s3329_s12  ;;  %v4113_v63 = vsel %vm888_vm2, %v872_v30, %v785_v28 }
  0xf3   : > { %981 = vrot.lane.b32.xlu0 %v4061_v24, %s3329_s12 }
  0xf4   : > { %v592_v54 = vpop.permute.xlu1 %591 }
  0xf5   : > { %v590_v51 = vpop.permute.xlu0 %589  ;;  %v875_v13 = vsel %vm225_vm0, %v3789_v55, %v592_v54 }
  0xf6   : > { %1081 = vrot.lane.b32.xlu1 %v4074_v49, %s3330_s13  ;;  %v874_v53 = vsel %vm225_vm0, %v3791_v57, %v590_v51 }
  0xf7   : > { %1079 = vrot.lane.b32.xlu0 %v4077_v61, %s3330_s13 }
  0xf8   : > { %v791_v1 = vpop.permute.xlu1 %790 }
  0xf9   : > { %v789_v38 = vpop.permute.xlu0 %788  ;;  %v4164_v0 = vsel %vm888_vm2, %v875_v13, %v791_v1 }
  0xfa   : > { %987 = vrot.lane.b32.xlu1 %v4074_v49, %s3329_s12  ;;  %v4167_v39 = vsel %vm888_vm2, %v874_v53, %v789_v38 }
  0xfb   : > { %985 = vrot.lane.b32.xlu0 %v4077_v61, %s3329_s12 }
  0xfc   : > { %v596_v4 = vpop.permute.xlu1 %595 }
  0xfd   : > { %v594_v9 = vpop.permute.xlu0 %593  ;;  %v877_v55 = vsel %vm225_vm0, %v3805_v8, %v596_v4 }
  0xfe   : > { %1085 = vrot.lane.b32.xlu1 %v4092_v7, %s3330_s13  ;;  %v876_v14 = vsel %vm225_vm0, %v3807_v11, %v594_v9 }
  0xff   : > { %1083 = vrot.lane.b32.xlu0 %v4095_v48, %s3330_s13 }
 0x100   : > { %v795_v60 = vpop.permute.xlu1 %794 }
 0x101   : > { %v793_v58 = vpop.permute.xlu0 %792  ;;  %v4182_v28 = vsel %vm888_vm2, %v877_v55, %v795_v60 }
 0x102   : > { %991 = vrot.lane.b32.xlu1 %v4092_v7, %s3329_s12  ;;  %v4185_v54 = vsel %vm888_vm2, %v876_v14, %v793_v58 }
 0x103   : > { %989 = vrot.lane.b32.xlu0 %v4095_v48, %s3329_s12 }
 0x104   : > { %v600_v19 = vpop.permute.xlu1 %599 }
 0x105   : > { %v598_v22 = vpop.permute.xlu0 %597  ;;  %v879_v8 = vsel %vm225_vm0, %v3821_v29, %v600_v19 }
 0x106   : > { %1089 = vrot.lane.b32.xlu1 %v4110_v20, %s3330_s13  ;;  %v878_v1 = vsel %vm225_vm0, %v3823_v32, %v598_v22 }
 0x107   : > { %1087 = vrot.lane.b32.xlu0 %v4113_v63, %s3330_s13 }
 0x108   : > { %v799_v36 = vpop.permute.xlu1 %798 }
 0x109   : > { %v797_v40 = vpop.permute.xlu0 %796  ;;  %v4200_v38 = vsel %vm888_vm2, %v879_v8, %v799_v36 }
 0x10a   : > { %995 = vrot.lane.b32.xlu1 %v4110_v20, %s3329_s12  ;;  %v4203_v4 = vsel %vm888_vm2, %v878_v1, %v797_v40 }
 0x10b   : > { %993 = vrot.lane.b32.xlu0 %v4113_v63, %s3329_s12 }
 0x10c   : > { %v604_v3 = vpop.permute.xlu1 %603 }
 0x10d   : > { %v602_v37 = vpop.permute.xlu0 %601  ;;  %v881_v29 = vsel %vm225_vm0, %v3837_v47, %v604_v3 }
 0x10e   : > { %1093 = vrot.lane.b32.xlu1 %v4164_v0, %s3330_s13  ;;  %v880_v60 = vsel %vm225_vm0, %v3839_v50, %v602_v37 }
 0x10f   : > { %1091 = vrot.lane.b32.xlu0 %v4167_v39, %s3330_s13 }
 0x110   : > { %v803_v12 = vpop.permute.xlu1 %802 }
 0x111   : > { %v801_v26 = vpop.permute.xlu0 %800  ;;  %v4218_v58 = vsel %vm888_vm2, %v881_v29, %v803_v12 }
 0x112   : > { %999 = vrot.lane.b32.xlu1 %v4164_v0, %s3329_s12  ;;  %v4221_v19 = vsel %vm888_vm2, %v880_v60, %v801_v26 }
 0x113   : > { %997 = vrot.lane.b32.xlu0 %v4167_v39, %s3329_s12 }
 0x114   : > { %v608_v57 = vpop.permute.xlu1 %607 }
 0x115   : > { %v606_v52 = vpop.permute.xlu0 %605  ;;  %v883_v47 = vsel %vm225_vm0, %v3853_v5, %v608_v57 }
 0x116   : > { %1097 = vrot.lane.b32.xlu1 %v4182_v28, %s3330_s13  ;;  %v882_v36 = vsel %vm225_vm0, %v3855_v10, %v606_v52 }
 0x117   : > { %1095 = vrot.lane.b32.xlu0 %v4185_v54, %s3330_s13 }
 0x118   : > { %v807_v27 = vpop.permute.xlu1 %806 }
 0x119   : > { %v805_v51 = vpop.permute.xlu0 %804  ;;  %v4236_v40 = vsel %vm888_vm2, %v883_v47, %v807_v27 }
 0x11a   : > { %1003 = vrot.lane.b32.xlu1 %v4182_v28, %s3329_s12  ;;  %v4239_v3 = vsel %vm888_vm2, %v882_v36, %v805_v51 }
 0x11b   : > { %1001 = vrot.lane.b32.xlu0 %v4185_v54, %s3329_s12 }
 0x11c   : > { %v546_v11 = vpop.permute.xlu1 %545 }
 0x11d   : > { %v610_v2 = vpop.permute.xlu0 %609  ;;  %v852_v53 = vsel %vm225_vm0, %v3869_v31, %v546_v11 }
 0x11e   : > { %1101 = vrot.lane.b32.xlu1 %v4200_v38, %s3330_s13  ;;  %v884_v57 = vsel %vm225_vm0, %v3873_v34, %v610_v2  ;;  %v1727_v34 = vld [vmem:[#allocation3 + $0x1a0] sm:$0xff] }
 0x11f   : > { %1099 = vrot.lane.b32.xlu0 %v4203_v4, %s3330_s13  ;;  %v2067_v36 = vrot.slane %v1727_v34, 2 }
 0x120   : > { %v809_v46 = vpop.permute.xlu1 %808 }
 0x121   : > { %v612_v9 = vpop.permute.xlu0 %611  ;;  %v921_v27 = vsel %vm888_vm2, %v884_v57, %v809_v46  ;;  %v1728_v46 = vld [vmem:[#allocation3 + $0x1a8] sm:$0x3] }
 0x122   : > { %1007 = vrot.lane.b32.xlu1 %v4200_v38, %s3329_s12  ;;  %v885_v31 = vsel %vm225_vm0, %v3875_v35, %v612_v9  ;;  %v4267_v9 = vld [vmem:[#allocation3 + $0x198] sm:$0xff] }
 0x123   : > { %1005 = vrot.lane.b32.xlu0 %v4203_v4, %s3329_s12  ;;  %v1868_v60 = vrot.slane %v4267_v9, 1 }
 0x124   : > { %v745_v32 = vpop.permute.xlu1 %744 }
 0x125   : > { %v548_v17 = vpop.permute.xlu0 %547  ;;  %v889_v5 = vsel %vm888_vm2, %v852_v53, %v745_v32 }
 0x126   : > { %1105 = vrot.lane.b32.xlu1 %v4218_v58, %s3330_s13  ;;  %v853_v51 = vsel %vm225_vm0, %v3871_v33, %v548_v17  ;;  %v2069_v33 = vrot.slane %v1728_v46, 2  ;;  %v1869_v17 = vrot.slane %v1727_v34, 1 }
 0x127   : > { %1103 = vrot.lane.b32.xlu0 %v4221_v19, %s3330_s13 }
 0x128   : > { %v747_v30 = vpop.permute.xlu1 %746  ;;  %v2070_v53 = vsel %vm653_vm4, %v2067_v36, %v2069_v33 }
 0x129   : > { %v811_v22 = vpop.permute.xlu0 %810  ;;  %v890_v8 = vsel %vm888_vm2, %v853_v51, %v747_v30 }
 0x12a   : > { %1011 = vrot.lane.b32.xlu1 %v4218_v58, %s3329_s12  ;;  %v922_v14 = vsel %vm888_vm2, %v885_v31, %v811_v22 }
 0x12b   : > { %1009 = vrot.lane.b32.xlu0 %v4221_v19, %s3329_s12 }
 0x12c   : > { %v614_v50 = vpop.permute.xlu1 %613 }
 0x12d   : > { %v958_v13 = vpop.permute.xlu0 %957  ;;  %v886_v30 = vsel %vm225_vm0, %v3910_v41, %v614_v50 }
 0x12e   : > { %1109 = vrot.lane.b32.xlu1 %v4236_v40, %s3330_s13  ;;  %v1152_v10 = vsel %vm1151_vm7, %v889_v5, %v958_v13 }
 0x12f   : > { %1107 = vrot.lane.b32.xlu0 %v4239_v3, %s3330_s13 }
 0x130   : > { %v1056_v37 = vpop.permute.xlu1 %1055 }
 0x131   : > { %v960_v12 = vpop.permute.xlu0 %959  ;;  %v1185_v26 = vsel %vm1184_vm8, %v1152_v10, %v1056_v37  ;;  %v1870_v10 = vsel %vm454_vm3, %v1868_v60, %v1869_v17  ;;  %v1871_v37 = vrot.slane %v1728_v46, 1 }
 0x132   : > { %1015 = vrot.lane.b32.xlu1 %v4236_v40, %s3329_s12  ;;  %3168 = vmatprep.mubr.msk.f32.mxu0 %vm1229_vm9, %v1185_v26  ;;  %v1153_v35 = vsel %vm1151_vm7, %v890_v8, %v960_v12 }
 0x133   : > { %1013 = vrot.lane.b32.xlu0 %v4239_v3, %s3329_s12  ;;  %v1872_v31 = vsel %vm454_vm3, %v1869_v17, %v1871_v37 }
 0x134   : > { %v813_v55 = vpop.permute.xlu1 %812 }
 0x135   : > { %v616_v52 = vpop.permute.xlu0 %615  ;;  %v923_v13 = vsel %vm888_vm2, %v886_v30, %v813_v55  ;;  %v2066_v55 = vrot.slane %v4267_v9, 2 }
 0x136   : > { %1113 = vrot.lane.b32.xlu1 %v922_v14, %s3330_s13  ;;  %v887_v29 = vsel %vm225_vm0, %v3912_v44, %v616_v52 }
 0x137   : > { %1111 = vrot.lane.b32.xlu0 %v921_v27, %s3330_s13  ;;  %v2068_v52 = vsel %vm653_vm4, %v2066_v55, %v2067_v36 }
 0x138   : > { %v815_v11 = vpop.permute.xlu1 %814 }
 0x139   : > { %v1058_v1 = vpop.permute.xlu0 %1057  ;;  %v924_v22 = vsel %vm888_vm2, %v887_v29, %v815_v11 }
 0x13a   : > { %v1186_v2 = vsel %vm1184_vm8, %v1153_v35, %v1058_v1  ;;  %1019 = vrot.lane.b32.xlu1 %v922_v14, %s3329_s12 }
 0x13b   : > { %1017 = vrot.lane.b32.xlu0 %v921_v27, %s3329_s12  ;;  %3169 = vmatmul.mubr.msk.f32.vlgmr.msra.gmra.mxu0 %vm1229_vm9, %v1186_v2 }
 0x13c   : > { %v964_v32 = vpop.permute.xlu1 %963 }
 0x13d   : > { %v962_v47 = vpop.permute.xlu0 %961  ;;  %v1155_v44 = vsel %vm1151_vm7, %v3954_v42, %v964_v32 }
 0x13e   : > { %1117 = vrot.lane.b32.xlu1 %v924_v22, %s3330_s13  ;;  %v1154_v41 = vsel %vm1151_vm7, %v3939_v21, %v962_v47 }
 0x13f   : > { %1115 = vrot.lane.b32.xlu0 %v923_v13, %s3330_s13 }
 0x140   : > { %v1062_v5 = vpop.permute.xlu1 %1061 }
 0x141   : > { %v1188_v50 = vsel %vm1184_vm8, %v1155_v44, %v1062_v5  ;;  %v1060_v12 = vpop.permute.xlu0 %1059 }
 0x142   : > { %v1187_v26 = vsel %vm1184_vm8, %v1154_v41, %v1060_v12  ;;  %2141 = vrot.lane.b32.xlu1 %v2070_v53, %s3331_s14 }
 0x143   : > { %3171 = vmatprep.mubr.msk.f32.mxu0 %vm1229_vm9, %v1187_v26  ;;  %1941 = vrot.lane.b32.xlu0 %v1870_v10, %s3328_s26 }
 0x144   : > { %3172 = vmatmul.mubr.msk.f32.gmra.mxu0 %vm1229_vm9, %v1188_v50  ;;  %v968_v42 = vpop.permute.xlu1 %967 }
 0x145   : > { %v966_v21 = vpop.permute.xlu0 %965  ;;  %v1157_v57 = vsel %vm1151_vm7, %v3970_v6, %v968_v42 }
 0x146   : > { %v1156_v27 = vsel %vm1151_vm7, %v3951_v56, %v966_v21 }
 0x147   : > { %1943 = vrot.lane.b32.xlu0 %v1872_v31, %s3328_s26 }
 0x148   : > { %v1066_v14 = vpop.permute.xlu1 %1065 }
 0x149   : > { %v1190_v51 = vsel %vm1184_vm8, %v1157_v57, %v1066_v14  ;;  %v1064_v8 = vpop.permute.xlu0 %1063 }
 0x14a   : > { %v1189_v11 = vsel %vm1184_vm8, %v1156_v27, %v1064_v8 }
 0x14b   : > { %3174 = vmatprep.mubr.msk.f32.mxu0 %vm1229_vm9, %v1189_v11  ;;  %2139 = vrot.lane.b32.xlu0 %v2068_v52, %s3331_s14 }
 0x14c   : > { %3175 = vmatmul.mubr.msk.f32.gmra.mxu0 %vm1229_vm9, %v1190_v51  ;;  %v972_v35 = vpop.permute.xlu1 %971 }
 0x14d   : > { %v970_v1 = vpop.permute.xlu0 %969  ;;  %v1159_v6 = vsel %vm1151_vm7, %v3984_v18, %v972_v35  ;;  %v1675_v35 = vld [vmem:[#allocation3] sm:$0xff] }
 0x14e   : > { %v1158_v56 = vsel %vm1151_vm7, %v3989_v23, %v970_v1  ;;  %v1676_v1 = vld [vmem:[#allocation3 + $0x8] sm:$0xff] }
 0x150   : > { %v1070_v34 = vpop.permute.xlu1 %1069 }
 0x151   : > { %v1192_v2 = vsel %vm1184_vm8, %v1159_v6, %v1070_v34  ;;  %v1068_v46 = vpop.permute.xlu0 %1067  ;;  %v1783_v34 = vrot.slane %v1675_v35, 1 }
 0x152   : > { %v1191_v33 = vsel %vm1184_vm8, %v1158_v56, %v1068_v46  ;;  %v1784_v56 = vrot.slane %v1676_v1, 1 }
 0x153   : > { %3177 = vmatprep.mubr.msk.f32.mxu0 %vm1229_vm9, %v1191_v33 }
 0x154   : > { %3178 = vmatmul.mubr.msk.f32.gmra.mxu0 %vm1229_vm9, %v1192_v2  ;;  %v976_v29 = vpop.permute.xlu1 %975 }
 0x155   : > { %v974_v32 = vpop.permute.xlu0 %973  ;;  %v1161_v60 = vsel %vm1151_vm7, %v4002_v59, %v976_v29 }
 0x156   : > { %v1160_v18 = vsel %vm1151_vm7, %v4007_v15, %v974_v32 }
 0x158   : > { %v1074_v17 = vpop.permute.xlu1 %1073 }
 0x159   : > { %v1194_v23 = vsel %vm1184_vm8, %v1161_v60, %v1074_v17  ;;  %v1072_v30 = vpop.permute.xlu0 %1071 }
 0x15a   : > { %v1193_v22 = vsel %vm1184_vm8, %v1160_v18, %v1072_v30 }
 0x15b   : > { %3180 = vmatprep.mubr.msk.f32.mxu0 %vm1229_vm9, %v1193_v22  ;;  %v1982_v22 = vrot.slane %v1676_v1, 2 }
 0x15c   : > { %3181 = vmatmul.mubr.msk.f32.gmra.mxu0 %vm1229_vm9, %v1194_v23  ;;  %v980_v47 = vpop.permute.xlu1 %979 }
 0x15d   : > { %v978_v36 = vpop.permute.xlu0 %977  ;;  %v1163_v13 = vsel %vm1151_vm7, %v4020_v25, %v980_v47 }
 0x15e   : > { %v1162_v59 = vsel %vm1151_vm7, %v4025_v43, %v978_v36 }
 0x160   : > { %v1078_v53 = vpop.permute.xlu1 %1077 }
 0x161   : > { %v1196_v15 = vsel %vm1184_vm8, %v1163_v13, %v1078_v53  ;;  %v1076_v44 = vpop.permute.xlu0 %1075  ;;  %v1981_v13 = vrot.slane %v1675_v35, 2 }
 0x162   : > { %v1195_v5 = vsel %vm1184_vm8, %v1162_v59, %v1076_v44 }
 0x163   : > { %3183 = vmatprep.mubr.msk.f32.mxu0 %vm1229_vm9, %v1195_v5 }
 0x164   : > { %3184 = vmatmul.mubr.msk.f32.gmra.mxu0 %vm1229_vm9, %v1196_v15  ;;  %v984_v10 = vpop.permute.xlu1 %983 }
 0x165   : > { %v982_v37 = vpop.permute.xlu0 %981  ;;  %v1165_v41 = vsel %vm1151_vm7, %v4038_v45, %v984_v10 }
 0x166   : > { %v1164_v25 = vsel %vm1151_vm7, %v4043_v62, %v982_v37 }
 0x168   : > { %v1082_v50 = vpop.permute.xlu1 %1081 }
 0x169   : > { %v1198_v43 = vsel %vm1184_vm8, %v1165_v41, %v1082_v50  ;;  %v1080_v12 = vpop.permute.xlu0 %1079 }
 0x16a   : > { %v1197_v26 = vsel %vm1184_vm8, %v1164_v25, %v1080_v12 }
 0x16b   : > { %3186 = vmatprep.mubr.msk.f32.mxu0 %vm1229_vm9, %v1197_v26 }
 0x16c   : > { %3187 = vmatmul.mubr.msk.f32.gmra.mxu0 %vm1229_vm9, %v1198_v43  ;;  %v988_v42 = vpop.permute.xlu1 %987 }
 0x16d   : > { %v986_v31 = vpop.permute.xlu0 %985  ;;  %v1167_v55 = vsel %vm1151_vm7, %v4056_v16, %v988_v42 }
 0x16e   : > { %v1166_v45 = vsel %vm1151_vm7, %v4061_v24, %v986_v31 }
 0x170   : > { %v1086_v21 = vpop.permute.xlu1 %1085 }
 0x171   : > { %v1200_v62 = vsel %vm1184_vm8, %v1167_v55, %v1086_v21  ;;  %v1084_v57 = vpop.permute.xlu0 %1083 }
 0x172   : > { %v1199_v14 = vsel %vm1184_vm8, %v1166_v45, %v1084_v57 }
 0x173   : > { %3189 = vmatprep.mubr.msk.f32.mxu0 %vm1229_vm9, %v1199_v14 }
 0x174   : > { %3190 = vmatmul.mubr.msk.f32.gmra.mxu0 %vm1229_vm9, %v1200_v62  ;;  %v992_v52 = vpop.permute.xlu1 %991 }
 0x175   : > { %v990_v27 = vpop.permute.xlu0 %989  ;;  %v1169_v51 = vsel %vm1151_vm7, %v4074_v49, %v992_v52  ;;  %v1785_v49 = vsel %vm454_vm3, %v1783_v34, %v1784_v56 }
 0x176   : > { %v1168_v16 = vsel %vm1151_vm7, %v4077_v61, %v990_v27  ;;  %1873 = vrot.lane.b32.xlu1 %v1785_v49, %s3328_s26  ;;  %v1677_v61 = vld [vmem:[#allocation3 + $0x10] sm:$0x3] }
 0x177   : > { %v1786_v33 = vrot.slane %v1677_v61, 1  ;;  %v1984_v47 = vrot.slane %v1677_v61, 2 }
 0x178   : > { %v1090_v8 = vpop.permute.xlu1 %1089 }
 0x179   : > { %v1202_v24 = vsel %vm1184_vm8, %v1169_v51, %v1090_v8  ;;  %v1088_v11 = vpop.permute.xlu0 %1087  ;;  %v1787_v60 = vsel %vm454_vm3, %v1784_v56, %v1786_v33  ;;  %v1985_v36 = vsel %vm653_vm4, %v1982_v22, %v1984_v47 }
 0x17a   : > { %v1201_v6 = vsel %vm1184_vm8, %v1168_v16, %v1088_v11  ;;  %1875 = vrot.lane.b32.xlu1 %v1787_v60, %s3328_s26 }
 0x17b   : > { %3192 = vmatprep.mubr.msk.f32.mxu0 %vm1229_vm9, %v1201_v6 }
 0x17c   : > { %3193 = vmatmul.mubr.msk.f32.gmra.mxu0 %vm1229_vm9, %v1202_v24  ;;  %v996_v2 = vpop.permute.xlu1 %995 }
 0x17d   : > { %v994_v46 = vpop.permute.xlu0 %993  ;;  %v1171_v29 = vsel %vm1151_vm7, %v4092_v7, %v996_v2 }
 0x17e   : > { %v1170_v17 = vsel %vm1151_vm7, %v4095_v48, %v994_v46  ;;  %2073 = vrot.lane.b32.xlu1 %v1985_v36, %s3331_s14  ;;  %v1983_v48 = vsel %vm653_vm4, %v1981_v13, %v1982_v22 }
 0x17f   : > { %2071 = vrot.lane.b32.xlu0 %v1983_v48, %s3331_s14 }
 0x180   : > { %v1094_v32 = vpop.permute.xlu1 %1093 }
 0x181   : > { %v1204_v18 = vsel %vm1184_vm8, %v1171_v29, %v1094_v32  ;;  %v1092_v23 = vpop.permute.xlu0 %1091 }
 0x182   : > { %v1203_v30 = vsel %vm1184_vm8, %v1170_v17, %v1092_v23 }
 0x183   : > { %3195 = vmatprep.mubr.msk.f32.mxu0 %vm1229_vm9, %v1203_v30 }
 0x184   : > { %3196 = vmatmul.mubr.msk.f32.gmra.mxu0 %vm1229_vm9, %v1204_v18  ;;  %v1000_v7 = vpop.permute.xlu1 %999 }
 0x185   : > { %v998_v53 = vpop.permute.xlu0 %997  ;;  %v1173_v59 = vsel %vm1151_vm7, %v4110_v20, %v1000_v7 }
 0x186   : > { %v1172_v44 = vsel %vm1151_vm7, %v4113_v63, %v998_v53 }
 0x188   : > { %v1098_v15 = vpop.permute.xlu1 %1097 }
 0x189   : > { %v1206_v5 = vsel %vm1184_vm8, %v1173_v59, %v1098_v15  ;;  %v1096_v10 = vpop.permute.xlu0 %1095 }
 0x18a   : > { %v1205_v37 = vsel %vm1184_vm8, %v1172_v44, %v1096_v10 }
 0x18b   : > { %3198 = vmatprep.mubr.msk.f32.mxu0 %vm1229_vm9, %v1205_v37 }
 0x18c   : > { %3199 = vmatmul.mubr.msk.f32.gmra.mxu0 %vm1229_vm9, %v1206_v5  ;;  %v1004_v41 = vpop.permute.xlu1 %1003 }
 0x18d   : > { %v1002_v50 = vpop.permute.xlu0 %1001  ;;  %v1175_v25 = vsel %vm1151_vm7, %v4164_v0, %v1004_v41 }
 0x18e   : > { %v1174_v20 = vsel %vm1151_vm7, %v4167_v39, %v1002_v50 }
 0x190   : > { %v1102_v43 = vpop.permute.xlu1 %1101 }
 0x191   : > { %v1208_v63 = vsel %vm1184_vm8, %v1175_v25, %v1102_v43  ;;  %v1100_v12 = vpop.permute.xlu0 %1099 }
 0x192   : > { %v1207_v26 = vsel %vm1184_vm8, %v1174_v20, %v1100_v12 }
 0x193   : > { %3201 = vmatprep.mubr.msk.f32.mxu0 %vm1229_vm9, %v1207_v26 }
 0x194   : > { %3202 = vmatmul.mubr.msk.f32.gmra.mxu0 %vm1229_vm9, %v1208_v63  ;;  %v1008_v42 = vpop.permute.xlu1 %1007 }
 0x195   : > { %v1006_v31 = vpop.permute.xlu0 %1005  ;;  %v1177_v55 = vsel %vm1151_vm7, %v4182_v28, %v1008_v42 }
 0x196   : > { %v1176_v0 = vsel %vm1151_vm7, %v4185_v54, %v1006_v31 }
 0x198   : > { %v1106_v21 = vpop.permute.xlu1 %1105 }
 0x199   : > { %v1210_v39 = vsel %vm1184_vm8, %v1177_v55, %v1106_v21  ;;  %v1104_v45 = vpop.permute.xlu0 %1103 }
 0x19a   : > { %v1209_v62 = vsel %vm1184_vm8, %v1176_v0, %v1104_v45 }
 0x19b   : > { %3204 = vmatprep.mubr.msk.f32.mxu0 %vm1229_vm9, %v1209_v62 }
 0x19c   : > { %3205 = vmatmul.mubr.msk.f32.gmra.mxu0 %vm1229_vm9, %v1210_v39  ;;  %v1012_v57 = vpop.permute.xlu1 %1011 }
 0x19d   : > { %v1010_v14 = vpop.permute.xlu0 %1009  ;;  %v1179_v52 = vsel %vm1151_vm7, %v4200_v38, %v1012_v57 }
 0x19e   : > { %v1178_v28 = vsel %vm1151_vm7, %v4203_v4, %v1010_v14 }
 0x1a0   : > { %v1110_v27 = vpop.permute.xlu1 %1109 }
 0x1a1   : > { %v1212_v54 = vsel %vm1184_vm8, %v1179_v52, %v1110_v27  ;;  %v1108_v51 = vpop.permute.xlu0 %1107 }
 0x1a2   : > { %v1211_v8 = vsel %vm1184_vm8, %v1178_v28, %v1108_v51 }
 0x1a3   : > { %3207 = vmatprep.mubr.msk.f32.mxu0 %vm1229_vm9, %v1211_v8 }
 0x1a4   : > { %3208 = vmatmul.mubr.msk.f32.gmra.mxu0 %vm1229_vm9, %v1212_v54  ;;  %v1016_v16 = vpop.permute.xlu1 %1015 }
 0x1a5   : > { %v1014_v24 = vpop.permute.xlu0 %1013  ;;  %v1181_v11 = vsel %vm1151_vm7, %v4218_v58, %v1016_v16 }
 0x1a6   : > { %v1180_v38 = vsel %vm1151_vm7, %v4221_v19, %v1014_v24 }
 0x1a8   : > { %v1114_v35 = vpop.permute.xlu1 %1113 }
 0x1a9   : > { %v1214_v4 = vsel %vm1184_vm8, %v1181_v11, %v1114_v35  ;;  %v1112_v1 = vpop.permute.xlu0 %1111 }
 0x1aa   : > { %v1213_v6 = vsel %vm1184_vm8, %v1180_v38, %v1112_v1 }
 0x1ab   : > { %3210 = vmatprep.mubr.msk.f32.mxu0 %vm1229_vm9, %v1213_v6 }
 0x1ac   : > { %3211 = vmatmul.mubr.msk.f32.gmra.mxu0 %vm1229_vm9, %v1214_v4  ;;  %v1020_v34 = vpop.permute.xlu1 %1019 }
 0x1ad   : > { %v1018_v56 = vpop.permute.xlu0 %1017  ;;  %v1183_v2 = vsel %vm1151_vm7, %v4236_v40, %v1020_v34 }
 0x1ae   : > { %v1182_v58 = vsel %vm1151_vm7, %v4239_v3, %v1018_v56  ;;  %v4428_v3 = vld [vmem:[%s5292_s2] ss:$0 sm:$0xff] }
 0x1b0   : > { %v1118_v49 = vpop.permute.xlu1 %1117 }
 0x1b1   : > { %v1216_v19 = vsel %vm1184_vm8, %v1183_v2, %v1118_v49  ;;  %v1116_v46 = vpop.permute.xlu0 %1115 }
 0x1b2   : > { %v1215_v61 = vsel %vm1184_vm8, %v1182_v58, %v1116_v46 }
 0x1b3   : > { %3213 = vmatprep.mubr.msk.f32.mxu0 %vm1229_vm9, %v1215_v61 }
 0x1b4   : > { %3214 = vmatmul.mubr.msk.f32.gmra.mxu0 %vm1229_vm9, %v1216_v19 }
 0x1b5   : > { %v1942_v33 = vpop.permute.xlu0 %1941 }
 0x1b6   : > { %v2213_v32 = vsel %vm888_vm2, %v4267_v9, %v1942_v33 }
 0x1b9   : > { %v4419_v29 = vpop.permute.xlu0 %1943 }
 0x1bd   : > { %v2140_v40 = vpop.permute.xlu0 %2139 }
 0x1be   : > { %v2250_v60 = vsel %vm2215_vm10, %v2213_v32, %v2140_v40 }
 0x1bf   : > { %2442 = vrot.lane.b32.xlu1 %v2250_v60, %s3332_s15 }
 0x1fb   : > { %v3170_v17 = vpop.f32.mrf.mxu0 }
 0x1fc   : > { %v1402_v18 = vadd.f32 %v3170_v17, %v4428_v3 }
 0x1fd   : > { %v1396_v23 = vpop.f32.mrf.mxu0 }
 0x1fe   : > { %v1556_v30 = vmax.f32 %v1402_v18, 0.0  ;;  %v1397_v22 = vadd.f32 %v4428_v3, %v1396_v23 }
 0x200   : > { %1644 = vst.msk [vmem:[#allocation3 + $0x21] sm:$0xff] %vm888_vm2, %v1556_v30  ;;  %v1555_v9 = vmax.f32 %v1397_v22, 0.0 }
 0x202   : > { %1643 = vst.msk [vmem:[#allocation3 + $0x19] sm:$0xff] %vm888_vm2, %v1555_v9 }
 0x204   : > { %v3173_v47 = vpop.f32.mrf.mxu0 }
 0x205   : > { %v1412_v7 = vadd.f32 %v3173_v47, %v4428_v3 }
 0x206   : > { %v1406_v36 = vpop.f32.mrf.mxu0 }
 0x207   : > { %v1558_v13 = vmax.f32 %v1412_v7, 0.0  ;;  %v1407_v53 = vadd.f32 %v4428_v3, %v1406_v36  ;;  %v1680_v48 = vld [vmem:[#allocation3 + $0x28] sm:$0x3] }
 0x208   : > { %v1791_v37 = vrot.slane %v1680_v48, 1  ;;  %v1989_v21 = vrot.slane %v1680_v48, 2 }
 0x209   : > { %1646 = vst.msk [vmem:[#allocation3 + $0x39] sm:$0xff] %vm888_vm2, %v1558_v13  ;;  %v1557_v59 = vmax.f32 %v1407_v53, 0.0  ;;  %v4437_v15 = vld [vmem:[#allocation3 + $0x18] sm:$0xff]  ;;  %v4439_v44 = vld [vmem:[#allocation3 + $0x20] sm:$0xff] }
 0x20a   : > { %v1788_v5 = vrot.slane %v4437_v15, 1  ;;  %v1789_v10 = vrot.slane %v4439_v44, 1  ;;  %v1986_v43 = vrot.slane %v4437_v15, 2  ;;  %v1987_v20 = vrot.slane %v4439_v44, 2 }
 0x20b   : > { %1645 = vst.msk [vmem:[#allocation3 + $0x31] sm:$0xff] %vm888_vm2, %v1557_v59 }
 0x20c   : > { %v3176_v41 = vpop.f32.mrf.mxu0  ;;  %v1790_v50 = vsel %vm454_vm3, %v1788_v5, %v1789_v10  ;;  %v1792_v25 = vsel %vm454_vm3, %v1789_v10, %v1791_v37  ;;  %v1988_v31 = vsel %vm653_vm4, %v1986_v43, %v1987_v20  ;;  %v1990_v52 = vsel %vm653_vm4, %v1987_v20, %v1989_v21 }
 0x20d   : > { %v1422_v63 = vadd.f32 %v3176_v41, %v4428_v3  ;;  %1877 = vrot.lane.b32.xlu0 %v1790_v50, %s3328_s26  ;;  %1879 = vrot.lane.b32.xlu1 %v1792_v25, %s3328_s26 }
 0x20e   : > { %v1416_v12 = vpop.f32.mrf.mxu0 }
 0x20f   : > { %v1560_v26 = vmax.f32 %v1422_v63, 0.0  ;;  %v1417_v42 = vadd.f32 %v4428_v3, %v1416_v12 }
 0x210   : > { %v1683_v57 = vld [vmem:[#allocation3 + $0x40] sm:$0x3] }
 0x211   : > { %1648 = vst.msk [vmem:[#allocation3 + $0x51] sm:$0xff] %vm888_vm2, %v1560_v26  ;;  %v1559_v55 = vmax.f32 %v1417_v42, 0.0  ;;  %2075 = vrot.lane.b32.xlu1 %v1988_v31, %s3331_s14  ;;  %v1796_v51 = vrot.slane %v1683_v57, 1  ;;  %v1994_v61 = vrot.slane %v1683_v57, 2 }
 0x212   : > { %v4455_v0 = vld [vmem:[#allocation3 + $0x30] sm:$0xff]  ;;  %v4457_v39 = vld [vmem:[#allocation3 + $0x38] sm:$0xff] }
 0x213   : > { %1647 = vst.msk [vmem:[#allocation3 + $0x49] sm:$0xff] %vm888_vm2, %v1559_v55  ;;  %v1793_v45 = vrot.slane %v4455_v0, 1  ;;  %v1794_v62 = vrot.slane %v4457_v39, 1  ;;  %v1991_v11 = vrot.slane %v4455_v0, 2  ;;  %v1992_v35 = vrot.slane %v4457_v39, 2 }
 0x214   : > { %v3179_v14 = vpop.f32.mrf.mxu0 }
 0x215   : > { %v1432_v27 = vadd.f32 %v3179_v14, %v4428_v3  ;;  %2077 = vrot.lane.b32.xlu1 %v1990_v52, %s3331_s14  ;;  %v1795_v28 = vsel %vm454_vm3, %v1793_v45, %v1794_v62  ;;  %v1797_v24 = vsel %vm454_vm3, %v1794_v62, %v1796_v51  ;;  %v1993_v2 = vsel %vm653_vm4, %v1991_v11, %v1992_v35 }
 0x216   : > { %1881 = vrot.lane.b32.xlu0 %v1795_v28, %s3328_s26  ;;  %v1426_v54 = vpop.f32.mrf.mxu0  ;;  %v1995_v60 = vsel %vm653_vm4, %v1992_v35, %v1994_v61 }
 0x217   : > { %v1562_v8 = vmax.f32 %v1432_v27, 0.0  ;;  %v1427_v16 = vadd.f32 %v4428_v3, %v1426_v54 }
 0x218   : > { %v1686_v49 = vld [vmem:[#allocation3 + $0x58] sm:$0x3] }
 0x219   : > { %1650 = vst.msk [vmem:[#allocation3 + $0x69] sm:$0xff] %vm888_vm2, %v1562_v8  ;;  %v1561_v38 = vmax.f32 %v1427_v16, 0.0  ;;  %1883 = vrot.lane.b32.xlu1 %v1797_v24, %s3328_s26  ;;  %v1801_v40 = vrot.slane %v1686_v49, 1  ;;  %v1999_v22 = vrot.slane %v1686_v49, 2 }
 0x21a   : > { %v4473_v4 = vld [vmem:[#allocation3 + $0x48] sm:$0xff]  ;;  %v4475_v1 = vld [vmem:[#allocation3 + $0x50] sm:$0xff] }
 0x21b   : > { %1649 = vst.msk [vmem:[#allocation3 + $0x61] sm:$0xff] %vm888_vm2, %v1561_v38  ;;  %v1798_v6 = vrot.slane %v4473_v4, 1  ;;  %v1799_v34 = vrot.slane %v4475_v1, 1  ;;  %v1997_v17 = vrot.slane %v4475_v1, 2  ;;  %v1996_v30 = vrot.slane %v4473_v4, 2 }
 0x21c   : > { %v3182_v56 = vpop.f32.mrf.mxu0 }
 0x21d   : > { %v1442_v58 = vadd.f32 %v3182_v56, %v4428_v3  ;;  %2079 = vrot.lane.b32.xlu1 %v1993_v2, %s3331_s14  ;;  %v1800_v19 = vsel %vm454_vm3, %v1798_v6, %v1799_v34  ;;  %v1802_v23 = vsel %vm454_vm3, %v1799_v34, %v1801_v40  ;;  %v2000_v13 = vsel %vm653_vm4, %v1997_v17, %v1999_v22 }
 0x21e   : > { %1885 = vrot.lane.b32.xlu0 %v1800_v19, %s3328_s26  ;;  %v1436_v46 = vpop.f32.mrf.mxu0  ;;  %v1998_v59 = vsel %vm653_vm4, %v1996_v30, %v1997_v17 }
 0x21f   : > { %v1564_v33 = vmax.f32 %v1442_v58, 0.0  ;;  %v1437_v32 = vadd.f32 %v4428_v3, %v1436_v46 }
 0x220   : > { %v1689_v7 = vld [vmem:[#allocation3 + $0x70] sm:$0x3] }
 0x221   : > { %1652 = vst.msk [vmem:[#allocation3 + $0x81] sm:$0xff] %vm888_vm2, %v1564_v33  ;;  %v1563_v18 = vmax.f32 %v1437_v32, 0.0  ;;  %2081 = vrot.lane.b32.xlu1 %v1995_v60, %s3331_s14  ;;  %v1806_v37 = vrot.slane %v1689_v7, 1  ;;  %v2004_v26 = vrot.slane %v1689_v7, 2 }
 0x222   : > { %1887 = vrot.lane.b32.xlu0 %v1802_v23, %s3328_s26  ;;  %v4493_v9 = vld [vmem:[#allocation3 + $0x68] sm:$0xff]  ;;  %v4495_v47 = vld [vmem:[#allocation3 + $0x60] sm:$0xff] }
 0x223   : > { %1651 = vst.msk [vmem:[#allocation3 + $0x79] sm:$0xff] %vm888_vm2, %v1563_v18  ;;  %v1804_v53 = vrot.slane %v4493_v9, 1  ;;  %v1803_v5 = vrot.slane %v4495_v47, 1  ;;  %v2002_v43 = vrot.slane %v4493_v9, 2  ;;  %v2001_v12 = vrot.slane %v4495_v47, 2 }
 0x224   : > { %v3185_v36 = vpop.f32.mrf.mxu0 }
 0x225   : > { %v1452_v48 = vadd.f32 %v3185_v36, %v4428_v3  ;;  %2085 = vrot.lane.b32.xlu1 %v2000_v13, %s3331_s14  ;;  %v1807_v25 = vsel %vm454_vm3, %v1804_v53, %v1806_v37  ;;  %v1805_v63 = vsel %vm454_vm3, %v1803_v5, %v1804_v53  ;;  %v2005_v45 = vsel %vm653_vm4, %v2002_v43, %v2004_v26 }
 0x226   : > { %2083 = vrot.lane.b32.xlu0 %v1998_v59, %s3331_s14  ;;  %v1446_v10 = vpop.f32.mrf.mxu0  ;;  %v2003_v14 = vsel %vm653_vm4, %v2001_v12, %v2002_v43 }
 0x227   : > { %v1566_v41 = vmax.f32 %v1452_v48, 0.0  ;;  %v1447_v50 = vadd.f32 %v4428_v3, %v1446_v10 }
 0x228   : > { %v1692_v55 = vld [vmem:[#allocation3 + $0x88] sm:$0x3] }
 0x229   : > { %1654 = vst.msk [vmem:[#allocation3 + $0x99] sm:$0xff] %vm888_vm2, %v1566_v41  ;;  %v1565_v20 = vmax.f32 %v1447_v50, 0.0  ;;  %1891 = vrot.lane.b32.xlu1 %v1807_v25, %s3328_s26  ;;  %v1811_v28 = vrot.slane %v1692_v55, 1  ;;  %v2009_v38 = vrot.slane %v1692_v55, 2 }
 0x22a   : > { %1889 = vrot.lane.b32.xlu0 %v1805_v63, %s3328_s26  ;;  %v4513_v42 = vld [vmem:[#allocation3 + $0x80] sm:$0xff]  ;;  %v4515_v31 = vld [vmem:[#allocation3 + $0x78] sm:$0xff] }
 0x22b   : > { %1653 = vst.msk [vmem:[#allocation3 + $0x91] sm:$0xff] %vm888_vm2, %v1565_v20  ;;  %v1809_v62 = vrot.slane %v4513_v42, 1  ;;  %v1808_v52 = vrot.slane %v4515_v31, 1  ;;  %v2007_v16 = vrot.slane %v4513_v42, 2  ;;  %v2006_v35 = vrot.slane %v4515_v31, 2 }
 0x22c   : > { %v3188_v21 = vpop.f32.mrf.mxu0 }
 0x22d   : > { %v1462_v57 = vadd.f32 %v3188_v21, %v4428_v3  ;;  %2089 = vrot.lane.b32.xlu1 %v2005_v45, %s3331_s14  ;;  %v1812_v8 = vsel %vm454_vm3, %v1809_v62, %v1811_v28  ;;  %v1810_v11 = vsel %vm454_vm3, %v1808_v52, %v1809_v62  ;;  %v2010_v49 = vsel %vm653_vm4, %v2007_v16, %v2009_v38 }
 0x22e   : > { %2087 = vrot.lane.b32.xlu0 %v2003_v14, %s3331_s14  ;;  %v1456_v27 = vpop.f32.mrf.mxu0  ;;  %v2008_v46 = vsel %vm653_vm4, %v2006_v35, %v2007_v16 }
 0x22f   : > { %v1568_v54 = vmax.f32 %v1462_v57, 0.0  ;;  %v1457_v51 = vadd.f32 %v4428_v3, %v1456_v27 }
 0x230   : > { %v1695_v56 = vld [vmem:[#allocation3 + $0xa0] sm:$0x3] }
 0x231   : > { %1656 = vst.msk [vmem:[#allocation3 + $0xb1] sm:$0xff] %vm888_vm2, %v1568_v54  ;;  %v1567_v24 = vmax.f32 %v1457_v51, 0.0  ;;  %1895 = vrot.lane.b32.xlu1 %v1812_v8, %s3328_s26  ;;  %v1816_v32 = vrot.slane %v1695_v56, 1  ;;  %v2014_v7 = vrot.slane %v1695_v56, 2 }
 0x232   : > { %1893 = vrot.lane.b32.xlu0 %v1810_v11, %s3328_s26  ;;  %v4533_v6 = vld [vmem:[#allocation3 + $0x98] sm:$0xff]  ;;  %v4535_v34 = vld [vmem:[#allocation3 + $0x90] sm:$0xff] }
 0x233   : > { %1655 = vst.msk [vmem:[#allocation3 + $0xa9] sm:$0xff] %vm888_vm2, %v1567_v24  ;;  %v1814_v58 = vrot.slane %v4533_v6, 1  ;;  %v1813_v61 = vrot.slane %v4535_v34, 1  ;;  %v2012_v18 = vrot.slane %v4533_v6, 2  ;;  %v2011_v22 = vrot.slane %v4535_v34, 2 }
 0x234   : > { %v3191_v2 = vpop.f32.mrf.mxu0 }
 0x235   : > { %v1472_v19 = vadd.f32 %v3191_v2, %v4428_v3  ;;  %2093 = vrot.lane.b32.xlu1 %v2010_v49, %s3331_s14  ;;  %v1817_v17 = vsel %vm454_vm3, %v1814_v58, %v1816_v32  ;;  %v1815_v30 = vsel %vm454_vm3, %v1813_v61, %v1814_v58  ;;  %v2015_v59 = vsel %vm653_vm4, %v2012_v18, %v2014_v7 }
 0x236   : > { %2091 = vrot.lane.b32.xlu0 %v2008_v46, %s3331_s14  ;;  %v1466_v33 = vpop.f32.mrf.mxu0  ;;  %v2013_v37 = vsel %vm653_vm4, %v2011_v22, %v2012_v18 }
 0x237   : > { %v1570_v40 = vmax.f32 %v1472_v19, 0.0  ;;  %v1467_v60 = vadd.f32 %v4428_v3, %v1466_v33 }
 0x238   : > { %v1698_v53 = vld [vmem:[#allocation3 + $0xb8] sm:$0x3] }
 0x239   : > { %1658 = vst.msk [vmem:[#allocation3 + $0xc9] sm:$0xff] %vm888_vm2, %v1570_v40  ;;  %v1569_v23 = vmax.f32 %v1467_v60, 0.0  ;;  %1899 = vrot.lane.b32.xlu1 %v1817_v17, %s3328_s26  ;;  %v1821_v25 = vrot.slane %v1698_v53, 1  ;;  %v2019_v45 = vrot.slane %v1698_v53, 2 }
 0x23a   : > { %1897 = vrot.lane.b32.xlu0 %v1815_v30, %s3328_s26  ;;  %v4553_v36 = vld [vmem:[#allocation3 + $0xb0] sm:$0xff]  ;;  %v4555_v13 = vld [vmem:[#allocation3 + $0xa8] sm:$0xff] }
 0x23b   : > { %1657 = vst.msk [vmem:[#allocation3 + $0xc1] sm:$0xff] %vm888_vm2, %v1569_v23  ;;  %v1819_v5 = vrot.slane %v4553_v36, 1  ;;  %v1818_v41 = vrot.slane %v4555_v13, 1  ;;  %v2017_v12 = vrot.slane %v4553_v36, 2  ;;  %v2016_v21 = vrot.slane %v4555_v13, 2 }
 0x23c   : > { %v3194_v48 = vpop.f32.mrf.mxu0 }
 0x23d   : > { %v1482_v10 = vadd.f32 %v3194_v48, %v4428_v3  ;;  %2097 = vrot.lane.b32.xlu1 %v2015_v59, %s3331_s14  ;;  %v1822_v63 = vsel %vm454_vm3, %v1819_v5, %v1821_v25  ;;  %v1820_v55 = vsel %vm454_vm3, %v1818_v41, %v1819_v5  ;;  %v2020_v27 = vsel %vm653_vm4, %v2017_v12, %v2019_v45 }
 0x23e   : > { %2095 = vrot.lane.b32.xlu0 %v2013_v37, %s3331_s14  ;;  %v1476_v50 = vpop.f32.mrf.mxu0  ;;  %v2018_v51 = vsel %vm653_vm4, %v2016_v21, %v2017_v12 }
 0x23f   : > { %v1572_v43 = vmax.f32 %v1482_v10, 0.0  ;;  %v1477_v20 = vadd.f32 %v4428_v3, %v1476_v50 }
 0x240   : > { %v1701_v14 = vld [vmem:[#allocation3 + $0xd0] sm:$0x3] }
 0x241   : > { %1660 = vst.msk [vmem:[#allocation3 + $0xe1] sm:$0xff] %vm888_vm2, %v1572_v43  ;;  %v1571_v26 = vmax.f32 %v1477_v20, 0.0  ;;  %1903 = vrot.lane.b32.xlu1 %v1822_v63, %s3328_s26  ;;  %v1826_v24 = vrot.slane %v1701_v14, 1  ;;  %v2024_v19 = vrot.slane %v1701_v14, 2 }
 0x242   : > { %1901 = vrot.lane.b32.xlu0 %v1820_v55, %s3328_s26  ;;  %v4573_v62 = vld [vmem:[#allocation3 + $0xc8] sm:$0xff]  ;;  %v4575_v57 = vld [vmem:[#allocation3 + $0xc0] sm:$0xff] }
 0x243   : > { %1659 = vst.msk [vmem:[#allocation3 + $0xd9] sm:$0xff] %vm888_vm2, %v1571_v26  ;;  %v1824_v28 = vrot.slane %v4573_v62, 1  ;;  %v1823_v8 = vrot.slane %v4575_v57, 1  ;;  %v2022_v56 = vrot.slane %v4573_v62, 2  ;;  %v2021_v58 = vrot.slane %v4575_v57, 2 }
 0x244   : > { %v3197_v52 = vpop.f32.mrf.mxu0 }
 0x245   : > { %v1492_v54 = vadd.f32 %v3197_v52, %v4428_v3  ;;  %2101 = vrot.lane.b32.xlu1 %v2020_v27, %s3331_s14  ;;  %v1827_v38 = vsel %vm454_vm3, %v1824_v28, %v1826_v24  ;;  %v1825_v49 = vsel %vm454_vm3, %v1823_v8, %v1824_v28  ;;  %v2025_v40 = vsel %vm653_vm4, %v2022_v56, %v2024_v19 }
 0x246   : > { %2099 = vrot.lane.b32.xlu0 %v2018_v51, %s3331_s14  ;;  %v1486_v16 = vpop.f32.mrf.mxu0  ;;  %v2023_v18 = vsel %vm653_vm4, %v2021_v58, %v2022_v56 }
 0x247   : > { %v1574_v11 = vmax.f32 %v1492_v54, 0.0  ;;  %v1487_v35 = vadd.f32 %v4428_v3, %v1486_v16 }
 0x248   : > { %v1704_v33 = vld [vmem:[#allocation3 + $0xe8] sm:$0x3] }
 0x249   : > { %1662 = vst.msk [vmem:[#allocation3 + $0xf9] sm:$0xff] %vm888_vm2, %v1574_v11  ;;  %v1573_v2 = vmax.f32 %v1487_v35, 0.0  ;;  %1907 = vrot.lane.b32.xlu1 %v1827_v38, %s3328_s26  ;;  %v1831_v22 = vrot.slane %v1704_v33, 1  ;;  %v2029_v41 = vrot.slane %v1704_v33, 2 }
 0x24a   : > { %1905 = vrot.lane.b32.xlu0 %v1825_v49, %s3328_s26  ;;  %v4593_v46 = vld [vmem:[#allocation3 + $0xe0] sm:$0xff]  ;;  %v4595_v61 = vld [vmem:[#allocation3 + $0xd8] sm:$0xff] }
 0x24b   : > { %1661 = vst.msk [vmem:[#allocation3 + $0xf1] sm:$0xff] %vm888_vm2, %v1573_v2  ;;  %v1829_v60 = vrot.slane %v4593_v46, 1  ;;  %v1828_v23 = vrot.slane %v4595_v61, 1  ;;  %v2027_v59 = vrot.slane %v4593_v46, 2  ;;  %v2026_v37 = vrot.slane %v4595_v61, 2 }
 0x24c   : > { %v3200_v32 = vpop.f32.mrf.mxu0 }
 0x24d   : > { %v1502_v17 = vadd.f32 %v3200_v32, %v4428_v3  ;;  %2105 = vrot.lane.b32.xlu1 %v2025_v40, %s3331_s14  ;;  %v1832_v48 = vsel %vm454_vm3, %v1829_v60, %v1831_v22  ;;  %v1830_v10 = vsel %vm454_vm3, %v1828_v23, %v1829_v60  ;;  %v2030_v63 = vsel %vm653_vm4, %v2027_v59, %v2029_v41 }
 0x24e   : > { %2103 = vrot.lane.b32.xlu0 %v2023_v18, %s3331_s14  ;;  %v1496_v30 = vpop.f32.mrf.mxu0  ;;  %v2028_v55 = vsel %vm653_vm4, %v2026_v37, %v2027_v59 }
 0x24f   : > { %v1576_v7 = vmax.f32 %v1502_v17, 0.0  ;;  %v1497_v53 = vadd.f32 %v4428_v3, %v1496_v30 }
 0x250   : > { %v1707_v43 = vld [vmem:[#allocation3 + $0x100] sm:$0x3] }
 0x251   : > { %1664 = vst.msk [vmem:[#allocation3 + $0x111] sm:$0xff] %vm888_vm2, %v1576_v7  ;;  %v1575_v5 = vmax.f32 %v1497_v53, 0.0  ;;  %1911 = vrot.lane.b32.xlu1 %v1832_v48, %s3328_s26  ;;  %v1836_v14 = vrot.slane %v1707_v43, 1  ;;  %v2034_v24 = vrot.slane %v1707_v43, 2 }
 0x252   : > { %1909 = vrot.lane.b32.xlu0 %v1830_v10, %s3328_s26  ;;  %v4613_v50 = vld [vmem:[#allocation3 + $0xf8] sm:$0xff]  ;;  %v4615_v25 = vld [vmem:[#allocation3 + $0xf0] sm:$0xff] }
 0x253   : > { %1663 = vst.msk [vmem:[#allocation3 + $0x109] sm:$0xff] %vm888_vm2, %v1575_v5  ;;  %v1834_v12 = vrot.slane %v4613_v50, 1  ;;  %v1833_v21 = vrot.slane %v4615_v25, 1  ;;  %v2032_v54 = vrot.slane %v4613_v50, 2  ;;  %v2031_v16 = vrot.slane %v4615_v25, 2  ;;  %v4657_v5 = vpop.permute.xlu1 %2141 }
 0x254   : > { %v3203_v20 = vpop.f32.mrf.mxu0 }
 0x255   : > { %v1512_v26 = vadd.f32 %v3203_v20, %v4428_v3  ;;  %2109 = vrot.lane.b32.xlu1 %v2030_v63, %s3331_s14  ;;  %v1837_v28 = vsel %vm454_vm3, %v1834_v12, %v1836_v14  ;;  %v1835_v8 = vsel %vm454_vm3, %v1833_v21, %v1834_v12  ;;  %v2035_v2 = vsel %vm653_vm4, %v2032_v54, %v2034_v24 }
 0x256   : > { %2107 = vrot.lane.b32.xlu0 %v2028_v55, %s3331_s14  ;;  %v1506_v45 = vpop.f32.mrf.mxu0  ;;  %v2033_v19 = vsel %vm653_vm4, %v2031_v16, %v2032_v54 }
 0x257   : > { %v1578_v52 = vmax.f32 %v1512_v26, 0.0  ;;  %v1507_v27 = vadd.f32 %v4428_v3, %v1506_v45  ;;  %v4668_v14 = vpop.permute.xlu1 %1873 }
 0x258   : > { %v1710_v38 = vld [vmem:[#allocation3 + $0x118] sm:$0x3] }
 0x259   : > { %1666 = vst.msk [vmem:[#allocation3 + $0x129] sm:$0xff] %vm888_vm2, %v1578_v52  ;;  %v1577_v51 = vmax.f32 %v1507_v27, 0.0  ;;  %1915 = vrot.lane.b32.xlu1 %v1837_v28, %s3328_s26  ;;  %v1841_v40 = vrot.slane %v1710_v38, 1  ;;  %v2039_v53 = vrot.slane %v1710_v38, 2 }
 0x25a   : > { %1913 = vrot.lane.b32.xlu0 %v1835_v8, %s3328_s26  ;;  %v4633_v11 = vld [vmem:[#allocation3 + $0x110] sm:$0xff]  ;;  %v4635_v35 = vld [vmem:[#allocation3 + $0x108] sm:$0xff] }
 0x25b   : > { %1665 = vst.msk [vmem:[#allocation3 + $0x121] sm:$0xff] %vm888_vm2, %v1577_v51  ;;  %v1839_v49 = vrot.slane %v4633_v11, 1  ;;  %v1838_v33 = vrot.slane %v4635_v35, 1  ;;  %v2037_v23 = vrot.slane %v4633_v11, 2  ;;  %v2036_v7 = vrot.slane %v4635_v35, 2 }
 0x25c   : > { %v3206_v56 = vpop.f32.mrf.mxu0 }
 0x25d   : > { %v1522_v58 = vadd.f32 %v3206_v56, %v4428_v3  ;;  %2113 = vrot.lane.b32.xlu1 %v2035_v2, %s3331_s14  ;;  %v1842_v18 = vsel %vm454_vm3, %v1839_v49, %v1841_v40  ;;  %v1840_v22 = vsel %vm454_vm3, %v1838_v33, %v1839_v49  ;;  %v2040_v41 = vsel %vm653_vm4, %v2037_v23, %v2039_v53 }
 0x25e   : > { %2111 = vrot.lane.b32.xlu0 %v2033_v19, %s3331_s14  ;;  %v1516_v32 = vpop.f32.mrf.mxu0  ;;  %v2038_v63 = vsel %vm653_vm4, %v2036_v7, %v2037_v23 }
 0x25f   : > { %v1580_v60 = vmax.f32 %v1522_v58, 0.0  ;;  %v1517_v17 = vadd.f32 %v4428_v3, %v1516_v32  ;;  %v4688_v32 = vpop.permute.xlu1 %1875 }
 0x260   : > { %v1713_v10 = vld [vmem:[#allocation3 + $0x130] sm:$0x3] }
 0x261   : > { %1668 = vst.msk [vmem:[#allocation3 + $0x141] sm:$0xff] %vm888_vm2, %v1580_v60  ;;  %v1579_v30 = vmax.f32 %v1517_v17, 0.0  ;;  %1919 = vrot.lane.b32.xlu1 %v1842_v18, %s3328_s26  ;;  %v1846_v55 = vrot.slane %v1713_v10, 1  ;;  %v2044_v8 = vrot.slane %v1713_v10, 2 }
 0x262   : > { %1917 = vrot.lane.b32.xlu0 %v1840_v22, %s3328_s26  ;;  %v4653_v48 = vld [vmem:[#allocation3 + $0x128] sm:$0xff]  ;;  %v4655_v59 = vld [vmem:[#allocation3 + $0x120] sm:$0xff] }
 0x263   : > { %1667 = vst.msk [vmem:[#allocation3 + $0x139] sm:$0xff] %vm888_vm2, %v1579_v30  ;;  %v1844_v43 = vrot.slane %v4653_v48, 1  ;;  %v1843_v12 = vrot.slane %v4655_v59, 1  ;;  %v2042_v27 = vrot.slane %v4653_v48, 2  ;;  %v2041_v51 = vrot.slane %v4655_v59, 2 }
 0x264   : > { %v3209_v37 = vpop.f32.mrf.mxu0 }
 0x265   : > { %v1532_v20 = vadd.f32 %v3209_v37, %v4428_v3  ;;  %2117 = vrot.lane.b32.xlu1 %v2040_v41, %s3331_s14  ;;  %v1847_v52 = vsel %vm454_vm3, %v1844_v43, %v1846_v55  ;;  %v1845_v54 = vsel %vm454_vm3, %v1843_v12, %v1844_v43  ;;  %v2045_v2 = vsel %vm653_vm4, %v2042_v27, %v2044_v8  ;;  %v4704_v43 = vpop.permute.xlu1 %2073 }
 0x266   : > { %2115 = vrot.lane.b32.xlu0 %v2038_v63, %s3331_s14  ;;  %v1526_v26 = vpop.f32.mrf.mxu0  ;;  %v2043_v19 = vsel %vm653_vm4, %v2041_v51, %v2042_v27 }
 0x267   : > { %v1582_v21 = vmax.f32 %v1532_v20, 0.0  ;;  %v1527_v45 = vadd.f32 %v4428_v3, %v1526_v26 }
 0x268   : > { %v1716_v38 = vld [vmem:[#allocation3 + $0x148] sm:$0x3] }
 0x269   : > { %1670 = vst.msk [vmem:[#allocation3 + $0x159] sm:$0xff] %vm888_vm2, %v1582_v21  ;;  %v1581_v28 = vmax.f32 %v1527_v45, 0.0  ;;  %1923 = vrot.lane.b32.xlu1 %v1847_v52, %s3328_s26  ;;  %v1851_v60 = vrot.slane %v1716_v38, 1  ;;  %v2049_v10 = vrot.slane %v1716_v38, 2 }
 0x26a   : > { %1921 = vrot.lane.b32.xlu0 %v1845_v54, %s3328_s26  ;;  %v4677_v16 = vld [vmem:[#allocation3 + $0x140] sm:$0xff]  ;;  %v4679_v24 = vld [vmem:[#allocation3 + $0x138] sm:$0xff] }
 0x26b   : > { %1669 = vst.msk [vmem:[#allocation3 + $0x151] sm:$0xff] %vm888_vm2, %v1581_v28  ;;  %v1849_v49 = vrot.slane %v4677_v16, 1  ;;  %v1848_v33 = vrot.slane %v4679_v24, 1  ;;  %v2047_v30 = vrot.slane %v4677_v16, 2  ;;  %v2046_v53 = vrot.slane %v4679_v24, 2 }
 0x26c   : > { %v3212_v56 = vpop.f32.mrf.mxu0 }
 0x26d   : > { %v1542_v58 = vadd.f32 %v3212_v56, %v4428_v3  ;;  %2121 = vrot.lane.b32.xlu1 %v2045_v2, %s3331_s14  ;;  %v1852_v23 = vsel %vm454_vm3, %v1849_v49, %v1851_v60  ;;  %v1850_v7 = vsel %vm454_vm3, %v1848_v33, %v1849_v49  ;;  %v2050_v12 = vsel %vm653_vm4, %v2047_v30, %v2049_v10  ;;  %v4719_v2 = vpop.permute.xlu1 %2442 }
 0x26e   : > { %2119 = vrot.lane.b32.xlu0 %v2043_v19, %s3331_s14  ;;  %v1536_v40 = vpop.f32.mrf.mxu0  ;;  %v2048_v21 = vsel %vm653_vm4, %v2046_v53, %v2047_v30 }
 0x26f   : > { %v1584_v17 = vmax.f32 %v1542_v58, 0.0  ;;  %v1537_v18 = vadd.f32 %v4428_v3, %v1536_v40 }
 0x270   : > { %v1719_v20 = vld [vmem:[#allocation3 + $0x160] sm:$0x3] }
 0x271   : > { %1672 = vst.msk [vmem:[#allocation3 + $0x171] sm:$0xff] %vm888_vm2, %v1584_v17  ;;  %v1583_v22 = vmax.f32 %v1537_v18, 0.0  ;;  %1927 = vrot.lane.b32.xlu1 %v1852_v23, %s3328_s26  ;;  %v1856_v27 = vrot.slane %v1719_v20, 1  ;;  %v2054_v58 = vrot.slane %v1719_v20, 2 }
 0x272   : > { %1925 = vrot.lane.b32.xlu0 %v1850_v7, %s3328_s26  ;;  %v4699_v37 = vld [vmem:[#allocation3 + $0x158] sm:$0xff]  ;;  %v4701_v41 = vld [vmem:[#allocation3 + $0x150] sm:$0xff] }
 0x273   : > { %1671 = vst.msk [vmem:[#allocation3 + $0x169] sm:$0xff] %vm888_vm2, %v1583_v22  ;;  %v1854_v26 = vrot.slane %v4699_v37, 1  ;;  %v1853_v45 = vrot.slane %v4701_v41, 1  ;;  %v2052_v8 = vrot.slane %v4699_v37, 2  ;;  %v2051_v49 = vrot.slane %v4701_v41, 2 }
 0x274   : > { %v3215_v63 = vpop.f32.mrf.mxu0 }
 0x275   : > { %v1552_v55 = vadd.f32 %v3215_v63, %v4428_v3  ;;  %2125 = vrot.lane.b32.xlu1 %v2050_v12, %s3331_s14  ;;  %v1857_v51 = vsel %vm454_vm3, %v1854_v26, %v1856_v27  ;;  %v1855_v56 = vsel %vm454_vm3, %v1853_v45, %v1854_v26  ;;  %v2055_v40 = vsel %vm653_vm4, %v2052_v8, %v2054_v58 }
 0x276   : > { %2123 = vrot.lane.b32.xlu0 %v2048_v21, %s3331_s14  ;;  %v1546_v52 = vpop.f32.mrf.mxu0  ;;  %v2053_v17 = vsel %vm653_vm4, %v2051_v49, %v2052_v8  ;;  %v4746_v21 = vpop.permute.xlu0 %2071  ;;  %v2550_v8 = vld [vmem:[%s5293_s3 + $0x38] sm:$0xff] }
 0x277   : > { %v1586_v28 = vmax.f32 %v1552_v55, 0.0  ;;  %v1547_v54 = vadd.f32 %v4428_v3, %v1546_v52 }
 0x278   : > { %v1722_v33 = vld [vmem:[#allocation3 + $0x178] sm:$0x3] }
 0x279   : > { %1674 = vst.msk [vmem:[#allocation3 + $0x189] sm:$0xff] %vm888_vm2, %v1586_v28  ;;  %v1585_v38 = vmax.f32 %v1547_v54, 0.0  ;;  %1931 = vrot.lane.b32.xlu1 %v1857_v51, %s3328_s26  ;;  %v1861_v23 = vrot.slane %v1722_v33, 1  ;;  %v2059_v20 = vrot.slane %v1722_v33, 2  ;;  %v2551_v54 = vld [vmem:[%s5293_s3 + $0x40] sm:$0xff] }
 0x27a   : > { %1929 = vrot.lane.b32.xlu0 %v1855_v56, %s3328_s26  ;;  %v4723_v19 = vld [vmem:[#allocation3 + $0x170] sm:$0xff]  ;;  %v4725_v3 = vld [vmem:[#allocation3 + $0x168] sm:$0xff]  ;;  %3282 = vmatprep.subr.mxu1 %v2551_v54 }
 0x27b   : > { %1673 = vst.msk [vmem:[#allocation3 + $0x181] sm:$0xff] %vm888_vm2, %v1585_v38  ;;  %v1859_v60 = vrot.slane %v4723_v19, 1  ;;  %v1858_v18 = vrot.slane %v4725_v3, 1  ;;  %v2057_v7 = vrot.slane %v4723_v19, 2  ;;  %v2056_v10 = vrot.slane %v4725_v3, 2  ;;  %3291 = vmatpush3.msra.mxu1 %v2551_v54  ;;  %3216 = vmatprep.subr.mxu0 %v2551_v54 }
 0x27c   : > { %3283 = vmatprep.subr.mxu1 %v2550_v8  ;;  %3217 = vmatpush3.msra.mxu0 %v2551_v54 }
 0x27d   : > { %2129 = vrot.lane.b32.xlu1 %v2055_v40, %s3331_s14  ;;  %v1862_v22 = vsel %vm454_vm3, %v1859_v60, %v1861_v23  ;;  %v1860_v53 = vsel %vm454_vm3, %v1858_v18, %v1859_v60  ;;  %v2060_v45 = vsel %vm653_vm4, %v2057_v7, %v2059_v20  ;;  %v2058_v27 = vsel %vm653_vm4, %v2056_v10, %v2057_v7  ;;  %v2549_v60 = vld [vmem:[%s5293_s3 + $0x30] sm:$0xff]  ;;  %v2548_v18 = vld [vmem:[%s5293_s3 + $0x28] sm:$0xff]  ;;  %v2547_v10 = vld [vmem:[%s5293_s3 + $0x20] sm:$0xff] }
 0x27e   : > { %2127 = vrot.lane.b32.xlu0 %v2053_v17, %s3331_s14  ;;  %3292 = vmatpush3.msra.mxu1 %v2550_v8  ;;  %v2546_v20 = vld [vmem:[%s5293_s3 + $0x18] sm:$0xff] }
 0x27f   : > { %v4734_v30 = vpop.permute.xlu1 %1879  ;;  %v1878_v56 = vpop.permute.xlu0 %1877  ;;  %3284 = vmatprep.subr.mxu1 %v2549_v60  ;;  %3218 = vmatprep.subr.mxu0 %v2550_v8 }
 0x280   : > { %v1725_v55 = vld [vmem:[#allocation3 + $0x190] sm:$0x3]  ;;  %3293 = vmatpush3.msra.mxu1 %v2549_v60  ;;  %3219 = vmatpush3.msra.mxu0 %v2550_v8 }
 0x281   : > { %1935 = vrot.lane.b32.xlu1 %v1862_v22, %s3328_s26  ;;  %v1866_v51 = vrot.slane %v1725_v55, 1  ;;  %v2064_v17 = vrot.slane %v1725_v55, 2  ;;  %3285 = vmatprep.subr.mxu1 %v2548_v18 }
 0x282   : > { %1933 = vrot.lane.b32.xlu0 %v1860_v53, %s3328_s26  ;;  %v4742_v63 = vld [vmem:[#allocation3 + $0x188] sm:$0xff]  ;;  %v4744_v12 = vld [vmem:[#allocation3 + $0x180] sm:$0xff]  ;;  %3294 = vmatpush3.msra.mxu1 %v2548_v18 }
 0x283   : > { %v2076_v26 = vpop.permute.xlu1 %2075  ;;  %v1864_v52 = vrot.slane %v4742_v63, 1  ;;  %v1863_v28 = vrot.slane %v4744_v12, 1  ;;  %v2062_v58 = vrot.slane %v4742_v63, 2  ;;  %v2061_v40 = vrot.slane %v4744_v12, 2  ;;  %3286 = vmatprep.subr.mxu1 %v2547_v10  ;;  %3220 = vmatprep.subr.mxu0 %v2549_v60 }
 0x284   : > { %3295 = vmatpush3.msra.mxu1 %v2547_v10  ;;  %3221 = vmatpush3.msra.mxu0 %v2549_v60 }
 0x285   : > { %2133 = vrot.lane.b32.xlu1 %v2060_v45, %s3331_s14  ;;  %v1867_v49 = vsel %vm454_vm3, %v1864_v52, %v1866_v51  ;;  %v1865_v33 = vsel %vm454_vm3, %v1863_v28, %v1864_v52  ;;  %v2065_v7 = vsel %vm653_vm4, %v2062_v58, %v2064_v17  ;;  %v2063_v53 = vsel %vm653_vm4, %v2061_v40, %v2062_v58  ;;  %v2545_v28 = vld [vmem:[%s5293_s3 + $0x10] sm:$0xff] }
 0x286   : > { %2131 = vrot.lane.b32.xlu0 %v2058_v27, %s3331_s14  ;;  %v2181_v45 = vsel %vm888_vm2, %v4437_v15, %v1878_v56  ;;  %3287 = vmatprep.subr.mxu1 %v2546_v20  ;;  %v2544_v15 = vld [vmem:[%s5293_s3 + $0x8] sm:$0xff] }
 0x287   : > { %v2078_v38 = vpop.permute.xlu1 %2077  ;;  %v4785_v27 = vsel %vm2215_vm10, %v2181_v45, %v2076_v26  ;;  %3296 = vmatpush3.msra.mxu1 %v2546_v20  ;;  %3222 = vmatprep.subr.mxu0 %v2548_v18  ;;  %v2182_v26 = vsel %vm888_vm2, %v4439_v44, %v4734_v30 }
 0x288   : > { %v1882_v22 = vpop.permute.xlu0 %1881  ;;  %3288 = vmatprep.subr.mxu1 %v2545_v28  ;;  %3223 = vmatpush3.msra.mxu0 %v2548_v18  ;;  %v4807_v58 = vsel %vm2215_vm10, %v2182_v26, %v2078_v38 }
 0x289   : > { %1939 = vrot.lane.b32.xlu1 %v1867_v49, %s3328_s26  ;;  %3297 = vmatpush3.msra.mxu1 %v2545_v28  ;;  %v2543_v49 = vld [vmem:[%s5293_s3] sm:$0xff]  ;;  %v2183_v30 = vsel %vm888_vm2, %v4455_v0, %v1882_v22 }
 0x28a   : > { %1937 = vrot.lane.b32.xlu0 %v1865_v33, %s3328_s26  ;;  %3289 = vmatprep.subr.mxu1 %v2544_v15 }
 0x28b   : > { %v1884_v23 = vpop.permute.xlu1 %1883  ;;  %3224 = vmatprep.subr.mxu0 %v2547_v10  ;;  %3298 = vmatpush3.msra.mxu1 %v2544_v15 }
 0x28c   : > { %v2184_v54 = vsel %vm888_vm2, %v4457_v39, %v1884_v23  ;;  %3290 = vmatprep.subr.mxu1 %v2543_v49  ;;  %3225 = vmatpush3.msra.mxu0 %v2547_v10 }
 0x28d   : > { %2137 = vrot.lane.b32.xlu1 %v2065_v7, %s3331_s14  ;;  %3299 = vmatpush3.msra.mxu1 %v2543_v49 }
 0x28e   : > { %2135 = vrot.lane.b32.xlu0 %v2063_v53, %s3331_s14  ;;  %3226 = vmatprep.subr.mxu0 %v2546_v20 }
 0x28f   : > { %v2080_v55 = vpop.permute.xlu1 %2079  ;;  %3227 = vmatpush3.msra.mxu0 %v2546_v20 }
 0x290   : > { %v1886_v52 = vpop.permute.xlu0 %1885  ;;  %v4821_v40 = vsel %vm2215_vm10, %v2183_v30, %v2080_v55  ;;  %3228 = vmatprep.subr.mxu0 %v2545_v28 }
 0x291   : > { %3229 = vmatpush3.msra.mxu0 %v2545_v28  ;;  %v2185_v18 = vsel %vm888_vm2, %v4473_v4, %v1886_v52 }
 0x292   : > { %2284 = vrot.lane.b32.xlu0 %v4785_v27, %s3330_s13  ;;  %3230 = vmatprep.subr.mxu0 %v2544_v15 }
 0x293   : > { %v2082_v51 = vpop.permute.xlu1 %2081  ;;  %3231 = vmatpush3.msra.mxu0 %v2544_v15 }
 0x294   : > { %v4801_v8 = vsel %vm2215_vm10, %v2184_v54, %v2082_v51  ;;  %v1888_v56 = vpop.permute.xlu0 %1887  ;;  %3232 = vmatprep.subr.mxu0 %v2543_v49 }
 0x295   : > { %2290 = vrot.lane.b32.xlu1 %v4801_v8, %s3330_s13  ;;  %v2186_v44 = vsel %vm888_vm2, %v4475_v1, %v1888_v56  ;;  %3233 = vmatpush3.msra.mxu0 %v2543_v49 }
 0x296   : > { %2286 = vrot.lane.b32.xlu0 %v4807_v58, %s3330_s13 }
 0x297   : > { %v2086_v39 = vpop.permute.xlu1 %2085 }
 0x298   : > { %v4818_v38 = vsel %vm2215_vm10, %v2186_v44, %v2086_v39  ;;  %v2084_v33 = vpop.permute.xlu0 %2083 }
 0x299   : > { %2388 = vrot.lane.b32.xlu1 %v4818_v38, %s3332_s15  ;;  %v4839_v7 = vsel %vm2215_vm10, %v2185_v18, %v2084_v33 }
 0x29a   : > { %2288 = vrot.lane.b32.xlu0 %v4821_v40, %s3330_s13 }
 0x29b   : > { %v1892_v1 = vpop.permute.xlu1 %1891 }
 0x29c   : > { %v1890_v60 = vpop.permute.xlu0 %1889  ;;  %v2188_v0 = vsel %vm888_vm2, %v4493_v9, %v1892_v1 }
 0x29d   : > { %2294 = vrot.lane.b32.xlu1 %v4818_v38, %s3330_s13  ;;  %v2187_v20 = vsel %vm888_vm2, %v4495_v47, %v1890_v60 }
 0x29e   : > { %2382 = vrot.lane.b32.xlu0 %v4821_v40, %s3332_s15 }
 0x29f   : > { %v2090_v17 = vpop.permute.xlu1 %2089 }
 0x2a0   : > { %v4836_v23 = vsel %vm2215_vm10, %v2188_v0, %v2090_v17  ;;  %v2088_v22 = vpop.permute.xlu0 %2087 }
 0x2a1   : > { %2392 = vrot.lane.b32.xlu1 %v4836_v23, %s3332_s15  ;;  %v4857_v52 = vsel %vm2215_vm10, %v2187_v20, %v2088_v22 }
 0x2a2   : > { %2386 = vrot.lane.b32.xlu0 %v4839_v7, %s3332_s15 }
 0x2a3   : > { %v1896_v53 = vpop.permute.xlu1 %1895 }
 0x2a4   : > { %v1894_v9 = vpop.permute.xlu0 %1893  ;;  %v2190_v4 = vsel %vm888_vm2, %v4513_v42, %v1896_v53 }
 0x2a5   : > { %2298 = vrot.lane.b32.xlu1 %v4836_v23, %s3330_s13  ;;  %v2189_v54 = vsel %vm888_vm2, %v4515_v31, %v1894_v9 }
 0x2a6   : > { %2292 = vrot.lane.b32.xlu0 %v4839_v7, %s3330_s13 }
 0x2a7   : > { %v2094_v10 = vpop.permute.xlu1 %2093 }
 0x2a8   : > { %v4854_v55 = vsel %vm2215_vm10, %v2190_v4, %v2094_v10  ;;  %v2092_v45 = vpop.permute.xlu0 %2091 }
 0x2a9   : > { %2396 = vrot.lane.b32.xlu1 %v4854_v55, %s3332_s15  ;;  %v4875_v56 = vsel %vm2215_vm10, %v2189_v54, %v2092_v45 }
 0x2aa   : > { %2390 = vrot.lane.b32.xlu0 %v4857_v52, %s3332_s15 }
 0x2ab   : > { %v1900_v28 = vpop.permute.xlu1 %1899 }
 0x2ac   : > { %v1898_v15 = vpop.permute.xlu0 %1897  ;;  %v2192_v47 = vsel %vm888_vm2, %v4533_v6, %v1900_v28 }
 0x2ad   : > { %2302 = vrot.lane.b32.xlu1 %v4854_v55, %s3330_s13  ;;  %v2191_v39 = vsel %vm888_vm2, %v4535_v34, %v1898_v15 }
 0x2ae   : > { %2296 = vrot.lane.b32.xlu0 %v4857_v52, %s3330_s13 }
 0x2af   : > { %v2098_v42 = vpop.permute.xlu1 %2097 }
 0x2b0   : > { %v4872_v51 = vsel %vm2215_vm10, %v2192_v47, %v2098_v42  ;;  %v2096_v26 = vpop.permute.xlu0 %2095 }
 0x2b1   : > { %2400 = vrot.lane.b32.xlu1 %v4872_v51, %s3332_s15  ;;  %v4893_v1 = vsel %vm2215_vm10, %v2191_v39, %v2096_v26 }
 0x2b2   : > { %2394 = vrot.lane.b32.xlu0 %v4875_v56, %s3332_s15 }
 0x2b3   : > { %v1904_v49 = vpop.permute.xlu1 %1903 }
 0x2b4   : > { %v1902_v44 = vpop.permute.xlu0 %1901  ;;  %v2194_v31 = vsel %vm888_vm2, %v4553_v36, %v1904_v49 }
 0x2b5   : > { %2306 = vrot.lane.b32.xlu1 %v4872_v51, %s3330_s13  ;;  %v2193_v17 = vsel %vm888_vm2, %v4555_v13, %v1902_v44 }
 0x2b6   : > { %2300 = vrot.lane.b32.xlu0 %v4875_v56, %s3330_s13 }
 0x2b7   : > { %v2102_v6 = vpop.permute.xlu1 %2101 }
 0x2b8   : > { %v4890_v30 = vsel %vm2215_vm10, %v2194_v31, %v2102_v6  ;;  %v2100_v33 = vpop.permute.xlu0 %2099 }
 0x2b9   : > { %2404 = vrot.lane.b32.xlu1 %v4890_v30, %s3332_s15  ;;  %v4911_v53 = vsel %vm2215_vm10, %v2193_v17, %v2100_v33 }
 0x2ba   : > { %2398 = vrot.lane.b32.xlu0 %v4893_v1, %s3332_s15 }
 0x2bb   : > { %v1908_v60 = vpop.permute.xlu1 %1907 }
 0x2bc   : > { %v1906_v0 = vpop.permute.xlu0 %1905  ;;  %v2196_v34 = vsel %vm888_vm2, %v4573_v62, %v1908_v60 }
 0x2bd   : > { %2310 = vrot.lane.b32.xlu1 %v4890_v30, %s3330_s13  ;;  %v2195_v10 = vsel %vm888_vm2, %v4575_v57, %v1906_v0 }
 0x2be   : > { %2304 = vrot.lane.b32.xlu0 %v4893_v1, %s3330_s13 }
 0x2bf   : > { %v2106_v36 = vpop.permute.xlu1 %2105 }
 0x2c0   : > { %v4908_v18 = vsel %vm2215_vm10, %v2196_v34, %v2106_v36  ;;  %v2104_v22 = vpop.permute.xlu0 %2103 }
 0x2c1   : > { %2408 = vrot.lane.b32.xlu1 %v4908_v18, %s3332_s15  ;;  %v4929_v28 = vsel %vm2215_vm10, %v2195_v10, %v2104_v22 }
 0x2c2   : > { %2402 = vrot.lane.b32.xlu0 %v4911_v53, %s3332_s15 }
 0x2c3   : > { %v1912_v9 = vpop.permute.xlu1 %1911 }
 0x2c4   : > { %v1910_v4 = vpop.permute.xlu0 %1909  ;;  %v2198_v13 = vsel %vm888_vm2, %v4593_v46, %v1912_v9 }
 0x2c5   : > { %2314 = vrot.lane.b32.xlu1 %v4908_v18, %s3330_s13  ;;  %v2197_v42 = vsel %vm888_vm2, %v4595_v61, %v1910_v4 }
 0x2c6   : > { %2308 = vrot.lane.b32.xlu0 %v4911_v53, %s3330_s13 }
 0x2c7   : > { %v2110_v62 = vpop.permute.xlu1 %2109 }
 0x2c8   : > { %v4926_v20 = vsel %vm2215_vm10, %v2198_v13, %v2110_v62  ;;  %v2108_v45 = vpop.permute.xlu0 %2107 }
 0x2c9   : > { %2412 = vrot.lane.b32.xlu1 %v4926_v20, %s3332_s15  ;;  %v4947_v49 = vsel %vm2215_vm10, %v2197_v42, %v2108_v45 }
 0x2ca   : > { %2406 = vrot.lane.b32.xlu0 %v4929_v28, %s3332_s15 }
 0x2cb   : > { %v1916_v15 = vpop.permute.xlu1 %1915 }
 0x2cc   : > { %v1914_v47 = vpop.permute.xlu0 %1913  ;;  %v2200_v57 = vsel %vm888_vm2, %v4613_v50, %v1916_v15 }
 0x2cd   : > { %2318 = vrot.lane.b32.xlu1 %v4926_v20, %s3330_s13  ;;  %v2199_v6 = vsel %vm888_vm2, %v4615_v25, %v1914_v47 }
 0x2ce   : > { %2312 = vrot.lane.b32.xlu0 %v4929_v28, %s3330_s13 }
 0x2cf   : > { %v2114_v46 = vpop.permute.xlu1 %2113 }
 0x2d0   : > { %v4944_v54 = vsel %vm2215_vm10, %v2200_v57, %v2114_v46  ;;  %v2112_v26 = vpop.permute.xlu0 %2111 }
 0x2d1   : > { %2416 = vrot.lane.b32.xlu1 %v4944_v54, %s3332_s15  ;;  %v4965_v60 = vsel %vm2215_vm10, %v2199_v6, %v2112_v26 }
 0x2d2   : > { %2410 = vrot.lane.b32.xlu0 %v4947_v49, %s3332_s15 }
 0x2d3   : > { %v1920_v44 = vpop.permute.xlu1 %1919 }
 0x2d4   : > { %v1918_v31 = vpop.permute.xlu0 %1917  ;;  %v2202_v61 = vsel %vm888_vm2, %v4633_v11, %v1920_v44 }
 0x2d5   : > { %2322 = vrot.lane.b32.xlu1 %v4944_v54, %s3330_s13  ;;  %v2201_v36 = vsel %vm888_vm2, %v4635_v35, %v1918_v31 }
 0x2d6   : > { %2316 = vrot.lane.b32.xlu0 %v4947_v49, %s3330_s13 }
 0x2d7   : > { %v2118_v50 = vpop.permute.xlu1 %2117 }
 0x2d8   : > { %v4962_v39 = vsel %vm2215_vm10, %v2202_v61, %v2118_v50  ;;  %v2116_v33 = vpop.permute.xlu0 %2115 }
 0x2d9   : > { %2420 = vrot.lane.b32.xlu1 %v4962_v39, %s3332_s15  ;;  %v4983_v9 = vsel %vm2215_vm10, %v2201_v36, %v2116_v33 }
 0x2da   : > { %2414 = vrot.lane.b32.xlu0 %v4965_v60, %s3332_s15 }
 0x2db   : > { %v1924_v0 = vpop.permute.xlu1 %1923 }
 0x2dc   : > { %v1922_v34 = vpop.permute.xlu0 %1921  ;;  %v2204_v25 = vsel %vm888_vm2, %v4653_v48, %v1924_v0 }
 0x2dd   : > { %2326 = vrot.lane.b32.xlu1 %v4962_v39, %s3330_s13  ;;  %v2203_v62 = vsel %vm888_vm2, %v4655_v59, %v1922_v34 }
 0x2de   : > { %2320 = vrot.lane.b32.xlu0 %v4965_v60, %s3330_s13 }
 0x2df   : > { %v2122_v11 = vpop.permute.xlu1 %2121 }
 0x2e0   : > { %v4980_v17 = vsel %vm2215_vm10, %v2204_v25, %v2122_v11  ;;  %v2120_v22 = vpop.permute.xlu0 %2119 }
 0x2e1   : > { %2424 = vrot.lane.b32.xlu1 %v4980_v17, %s3332_s15  ;;  %v5001_v15 = vsel %vm2215_vm10, %v2203_v62, %v2120_v22 }
 0x2e2   : > { %2418 = vrot.lane.b32.xlu0 %v4983_v9, %s3332_s15 }
 0x2e3   : > { %v1928_v4 = vpop.permute.xlu1 %1927 }
 0x2e4   : > { %v1926_v13 = vpop.permute.xlu0 %1925  ;;  %v2206_v35 = vsel %vm888_vm2, %v4677_v16, %v1928_v4 }
 0x2e5   : > { %2330 = vrot.lane.b32.xlu1 %v4980_v17, %s3330_s13  ;;  %v2205_v46 = vsel %vm888_vm2, %v4679_v24, %v1926_v13 }
 0x2e6   : > { %2324 = vrot.lane.b32.xlu0 %v4983_v9, %s3330_s13 }
 0x2e7   : > { %v2126_v48 = vpop.permute.xlu1 %2125 }
 0x2e8   : > { %v4998_v10 = vsel %vm2215_vm10, %v2206_v35, %v2126_v48  ;;  %v2124_v45 = vpop.permute.xlu0 %2123  ;;  %v3315_v48 = vld [vmem:[#allocation3 + $0x1a0] sm:$0xff] }
 0x2e9   : > { %2428 = vrot.lane.b32.xlu1 %v4998_v10, %s3332_s15  ;;  %v5019_v44 = vsel %vm2215_vm10, %v2205_v46, %v2124_v45 }
 0x2ea   : > { %2422 = vrot.lane.b32.xlu0 %v5001_v15, %s3332_s15 }
 0x2eb   : > { %v1932_v47 = vpop.permute.xlu1 %1931 }
 0x2ec   : > { %v1930_v57 = vpop.permute.xlu0 %1929  ;;  %v2208_v59 = vsel %vm888_vm2, %v4699_v37, %v1932_v47 }
 0x2ed   : > { %2334 = vrot.lane.b32.xlu1 %v4998_v10, %s3330_s13  ;;  %v2207_v50 = vsel %vm888_vm2, %v4701_v41, %v1930_v57  ;;  %v3316_v57 = vld [vmem:[#allocation3] sm:$0xff] }
 0x2ee   : > { %2328 = vrot.lane.b32.xlu0 %v5001_v15, %s3330_s13 }
 0x2ef   : > { %v2130_v16 = vpop.permute.xlu1 %2129 }
 0x2f0   : > { %v5016_v42 = vsel %vm2215_vm10, %v2208_v59, %v2130_v16  ;;  %v2128_v26 = vpop.permute.xlu0 %2127 }
 0x2f1   : > { %2432 = vrot.lane.b32.xlu1 %v5016_v42, %s3332_s15  ;;  %v5037_v0 = vsel %vm2215_vm10, %v2207_v50, %v2128_v26 }
 0x2f2   : > { %2426 = vrot.lane.b32.xlu0 %v5019_v44, %s3332_s15 }
 0x2f3   : > { %v1936_v31 = vpop.permute.xlu1 %1935 }
 0x2f4   : > { %v1934_v61 = vpop.permute.xlu0 %1933  ;;  %v2210_v24 = vsel %vm888_vm2, %v4723_v19, %v1936_v31 }
 0x2f5   : > { %2338 = vrot.lane.b32.xlu1 %v5016_v42, %s3330_s13  ;;  %v2209_v41 = vsel %vm888_vm2, %v4725_v3, %v1934_v61 }
 0x2f6   : > { %2332 = vrot.lane.b32.xlu0 %v5019_v44, %s3330_s13 }
 0x2f7   : > { %v2134_v37 = vpop.permute.xlu1 %2133 }
 0x2f8   : > { %v5034_v6 = vsel %vm2215_vm10, %v2210_v24, %v2134_v37  ;;  %v2132_v33 = vpop.permute.xlu0 %2131 }
 0x2f9   : > { %2436 = vrot.lane.b32.xlu1 %v5034_v6, %s3332_s15  ;;  %v5052_v36 = vsel %vm2215_vm10, %v2209_v41, %v2132_v33 }
 0x2fa   : > { %2430 = vrot.lane.b32.xlu0 %v5037_v0, %s3332_s15 }
 0x2fb   : > { %v1940_v34 = vpop.permute.xlu1 %1939 }
 0x2fc   : > { %v1938_v25 = vpop.permute.xlu0 %1937  ;;  %v2212_v13 = vsel %vm888_vm2, %v4742_v63, %v1940_v34 }
 0x2fd   : > { %2342 = vrot.lane.b32.xlu1 %v5034_v6, %s3330_s13  ;;  %v2211_v19 = vsel %vm888_vm2, %v4744_v12, %v1938_v25  ;;  %v2214_v12 = vsel %vm888_vm2, %v3315_v48, %v4419_v29  ;;  %v2179_v29 = vsel %vm888_vm2, %v3316_v57, %v4668_v14 }
 0x2fe   : > { %2336 = vrot.lane.b32.xlu0 %v5037_v0, %s3330_s13  ;;  %v2251_v47 = vsel %vm2215_vm10, %v2214_v12, %v4657_v5  ;;  %v2216_v16 = vsel %vm2215_vm10, %v2179_v29, %v4746_v21 }
 0x2ff   : > { %v2138_v4 = vpop.permute.xlu1 %2137 }
 0x300   : > { %v2136_v11 = vpop.permute.xlu0 %2135  ;;  %v2249_v3 = vsel %vm2215_vm10, %v2212_v13, %v2138_v4 }
 0x301   : > { %v2248_v22 = vsel %vm2215_vm10, %v2211_v19, %v2136_v11 }
 0x302   : > { %2434 = vrot.lane.b32.xlu0 %v5052_v36, %s3332_s15  ;;  %2344 = vrot.lane.b32.xlu1 %v2248_v22, %s3330_s13 }
 0x304   : > { %v2285_v35 = vpop.permute.xlu0 %2284 }
 0x305   : > { %v2478_v26 = vsel %vm1184_vm8, %v2216_v16, %v2285_v35 }
 0x306   : > { %2340 = vrot.lane.b32.xlu0 %v5052_v36, %s3330_s13  ;;  %2346 = vrot.lane.b32.xlu1 %v2249_v3, %s3330_s13 }
 0x307   : > { %v2291_v62 = vpop.permute.xlu1 %2290 }
 0x308   : > { %v5066_v45 = vpop.permute.xlu0 %2286  ;;  %v2481_v21 = vsel %vm1184_vm8, %v4807_v58, %v2291_v62 }
 0x30a   : > { %2444 = vrot.lane.b32.xlu1 %v2251_v47, %s3332_s15  ;;  %2438 = vrot.lane.b32.xlu0 %v2248_v22, %s3332_s15 }
 0x30b   : > { %v2389_v63 = vpop.permute.xlu1 %2388 }
 0x30c   : > { %v2289_v59 = vpop.permute.xlu0 %2288  ;;  %v2514_v50 = vsel %vm2510_vm12, %v2481_v21, %v2389_v63 }
 0x30d   : > { %v2480_v61 = vsel %vm1184_vm8, %v4785_v27, %v2289_v59 }
 0x30e   : > { %2440 = vrot.lane.b32.xlu0 %v2249_v3, %s3332_s15 }
 0x30f   : > { %v2295_v46 = vpop.permute.xlu1 %2294 }
 0x310   : > { %v2383_v5 = vpop.permute.xlu0 %2382  ;;  %v2483_v27 = vsel %vm1184_vm8, %v4801_v8, %v2295_v46 }
 0x311   : > { %v2511_v31 = vsel %vm2510_vm12, %v2478_v26, %v2383_v5 }
 0x312   : > { %2384 = vrot.lane.b32.xlu0 %v4801_v8, %s3332_s15  ;;  %3234 = vmatprep.mubr.msk.f32.mxu0 %vm2559_vm11, %v2511_v31 }
 0x313   : > { %v2393_v14 = vpop.permute.xlu1 %2392 }
 0x314   : > { %v2387_v24 = vpop.permute.xlu0 %2386  ;;  %v2516_v11 = vsel %vm2510_vm12, %v2483_v27, %v2393_v14 }
 0x315   : > { %v2513_v37 = vsel %vm2510_vm12, %v2480_v61, %v2387_v24 }
 0x316   : > { %3237 = vmatprep.mubr.msk.f32.mxu1 %vm2559_vm11, %v2513_v37 }
 0x317   : > { %v2299_v33 = vpop.permute.xlu1 %2298  ;;  %3238 = vmatmul.mubr.msk.f32.vlgmr.msra.gmra.mxu1 %vm2559_vm11, %v2514_v50 }
 0x318   : > { %v2293_v34 = vpop.permute.xlu0 %2292 }
 0x319   : > { %v2482_v41 = vsel %vm1184_vm8, %v4821_v40, %v2293_v34  ;;  %v2485_v40 = vsel %vm1184_vm8, %v4818_v38, %v2299_v33 }
 0x31b   : > { %v2397_v25 = vpop.permute.xlu1 %2396 }
 0x31c   : > { %v2391_v19 = vpop.permute.xlu0 %2390  ;;  %v2518_v48 = vsel %vm2510_vm12, %v2485_v40, %v2397_v25 }
 0x31d   : > { %v2515_v58 = vsel %vm2510_vm12, %v2482_v41, %v2391_v19 }
 0x31e   : > { %3240 = vmatprep.mubr.msk.f32.mxu1 %vm2559_vm11, %v2515_v58 }
 0x31f   : > { %v2303_v22 = vpop.permute.xlu1 %2302  ;;  %3241 = vmatmul.mubr.msk.f32.gmra.mxu1 %vm2559_vm11, %v2516_v11 }
 0x320   : > { %v2297_v4 = vpop.permute.xlu0 %2296 }
 0x321   : > { %v2484_v35 = vsel %vm1184_vm8, %v4839_v7, %v2297_v4  ;;  %v2487_v7 = vsel %vm1184_vm8, %v4836_v23, %v2303_v22 }
 0x323   : > { %v2401_v13 = vpop.permute.xlu1 %2400 }
 0x324   : > { %v2395_v3 = vpop.permute.xlu0 %2394  ;;  %v2520_v29 = vsel %vm2510_vm12, %v2487_v7, %v2401_v13 }
 0x325   : > { %v2517_v8 = vsel %vm2510_vm12, %v2484_v35, %v2395_v3 }
 0x326   : > { %3243 = vmatprep.mubr.msk.f32.mxu1 %vm2559_vm11, %v2517_v8 }
 0x327   : > { %v2307_v12 = vpop.permute.xlu1 %2306  ;;  %3244 = vmatmul.mubr.msk.f32.gmra.mxu1 %vm2559_vm11, %v2518_v48 }
 0x328   : > { %v2301_v62 = vpop.permute.xlu0 %2300 }
 0x329   : > { %v2486_v63 = vsel %vm1184_vm8, %v4857_v52, %v2301_v62  ;;  %v2489_v52 = vsel %vm1184_vm8, %v4854_v55, %v2307_v12 }
 0x32b   : > { %v2405_v47 = vpop.permute.xlu1 %2404 }
 0x32c   : > { %v2399_v57 = vpop.permute.xlu0 %2398  ;;  %v2522_v31 = vsel %vm2510_vm12, %v2489_v52, %v2405_v47 }
 0x32d   : > { %v2519_v38 = vsel %vm2510_vm12, %v2486_v63, %v2399_v57 }
 0x32e   : > { %3246 = vmatprep.mubr.msk.f32.mxu1 %vm2559_vm11, %v2519_v38 }
 0x32f   : > { %v2311_v59 = vpop.permute.xlu1 %2310  ;;  %3247 = vmatmul.mubr.msk.f32.gmra.mxu1 %vm2559_vm11, %v2520_v29 }
 0x330   : > { %v2305_v16 = vpop.permute.xlu0 %2304 }
 0x331   : > { %v2488_v26 = vsel %vm1184_vm8, %v4875_v56, %v2305_v16  ;;  %v2491_v56 = vsel %vm1184_vm8, %v4872_v51, %v2311_v59 }
 0x333   : > { %v2409_v46 = vpop.permute.xlu1 %2408 }
 0x334   : > { %v2403_v5 = vpop.permute.xlu0 %2402  ;;  %v2524_v50 = vsel %vm2510_vm12, %v2491_v56, %v2409_v46 }
 0x335   : > { %v2521_v23 = vsel %vm2510_vm12, %v2488_v26, %v2403_v5 }
 0x336   : > { %3249 = vmatprep.mubr.msk.f32.mxu1 %vm2559_vm11, %v2521_v23 }
 0x337   : > { %v2315_v14 = vpop.permute.xlu1 %2314  ;;  %3250 = vmatmul.mubr.msk.f32.gmra.mxu1 %vm2559_vm11, %v2522_v31 }
 0x338   : > { %v2309_v61 = vpop.permute.xlu0 %2308 }
 0x339   : > { %v2490_v21 = vsel %vm1184_vm8, %v4893_v1, %v2309_v61  ;;  %v2493_v1 = vsel %vm1184_vm8, %v4890_v30, %v2315_v14 }
 0x33b   : > { %v2413_v24 = vpop.permute.xlu1 %2412 }
 0x33c   : > { %v2407_v37 = vpop.permute.xlu0 %2406  ;;  %v2526_v27 = vsel %vm2510_vm12, %v2493_v1, %v2413_v24 }
 0x33d   : > { %v2523_v55 = vsel %vm2510_vm12, %v2490_v21, %v2407_v37 }
 0x33e   : > { %3252 = vmatprep.mubr.msk.f32.mxu1 %vm2559_vm11, %v2523_v55 }
 0x33f   : > { %v2319_v33 = vpop.permute.xlu1 %2318  ;;  %3253 = vmatmul.mubr.msk.f32.gmra.mxu1 %vm2559_vm11, %v2524_v50 }
 0x340   : > { %v2313_v34 = vpop.permute.xlu0 %2312 }
 0x341   : > { %v2492_v41 = vsel %vm1184_vm8, %v4911_v53, %v2313_v34  ;;  %v2495_v53 = vsel %vm1184_vm8, %v4908_v18, %v2319_v33 }
 0x343   : > { %v2417_v25 = vpop.permute.xlu1 %2416 }
 0x344   : > { %v2411_v19 = vpop.permute.xlu0 %2410  ;;  %v2528_v35 = vsel %vm2510_vm12, %v2495_v53, %v2417_v25 }
 0x345   : > { %v2525_v51 = vsel %vm2510_vm12, %v2492_v41, %v2411_v19 }
 0x346   : > { %3255 = vmatprep.mubr.msk.f32.mxu1 %vm2559_vm11, %v2525_v51  ;;  %v3317_v51 = vld [vmem:[#allocation3 + $0x8] sm:$0xff] }
 0x347   : > { %v2323_v58 = vpop.permute.xlu1 %2322  ;;  %3256 = vmatmul.mubr.msk.f32.gmra.mxu1 %vm2559_vm11, %v2526_v27  ;;  %v2180_v27 = vsel %vm888_vm2, %v3317_v51, %v4688_v32 }
 0x348   : > { %v2317_v11 = vpop.permute.xlu0 %2316 }
 0x349   : > { %v2494_v4 = vsel %vm1184_vm8, %v4929_v28, %v2317_v11  ;;  %v2497_v28 = vsel %vm1184_vm8, %v4926_v20, %v2323_v58 }
 0x34b   : > { %v2421_v22 = vpop.permute.xlu1 %2420 }
 0x34c   : > { %v2415_v13 = vpop.permute.xlu0 %2414  ;;  %v2530_v62 = vsel %vm2510_vm12, %v2497_v28, %v2421_v22 }
 0x34d   : > { %v2527_v30 = vsel %vm2510_vm12, %v2494_v4, %v2415_v13 }
 0x34e   : > { %3258 = vmatprep.mubr.msk.f32.mxu1 %vm2559_vm11, %v2527_v30 }
 0x34f   : > { %v2327_v3 = vpop.permute.xlu1 %2326  ;;  %3259 = vmatmul.mubr.msk.f32.gmra.mxu1 %vm2559_vm11, %v2528_v35 }
 0x350   : > { %v2321_v40 = vpop.permute.xlu0 %2320 }
 0x351   : > { %v2496_v48 = vsel %vm1184_vm8, %v4947_v49, %v2321_v40  ;;  %v2499_v49 = vsel %vm1184_vm8, %v4944_v54, %v2327_v3 }
 0x353   : > { %v2425_v8 = vpop.permute.xlu1 %2424 }
 0x354   : > { %v2419_v12 = vpop.permute.xlu0 %2418  ;;  %v2532_v29 = vsel %vm2510_vm12, %v2499_v49, %v2425_v8 }
 0x355   : > { %v2529_v18 = vsel %vm2510_vm12, %v2496_v48, %v2419_v12 }
 0x356   : > { %3261 = vmatprep.mubr.msk.f32.mxu1 %vm2559_vm11, %v2529_v18 }
 0x357   : > { %v2331_v47 = vpop.permute.xlu1 %2330  ;;  %3262 = vmatmul.mubr.msk.f32.gmra.mxu1 %vm2559_vm11, %v2530_v62 }
 0x358   : > { %v2325_v63 = vpop.permute.xlu0 %2324 }
 0x359   : > { %v2498_v7 = vsel %vm1184_vm8, %v4965_v60, %v2325_v63  ;;  %v2501_v60 = vsel %vm1184_vm8, %v4962_v39, %v2331_v47 }
 0x35b   : > { %v2429_v57 = vpop.permute.xlu1 %2428 }
 0x35c   : > { %v2423_v38 = vpop.permute.xlu0 %2422  ;;  %v2534_v52 = vsel %vm2510_vm12, %v2501_v60, %v2429_v57 }
 0x35d   : > { %v2531_v20 = vsel %vm2510_vm12, %v2498_v7, %v2423_v38 }
 0x35e   : > { %3264 = vmatprep.mubr.msk.f32.mxu1 %vm2559_vm11, %v2531_v20 }
 0x35f   : > { %v2335_v59 = vpop.permute.xlu1 %2334  ;;  %3265 = vmatmul.mubr.msk.f32.gmra.mxu1 %vm2559_vm11, %v2532_v29 }
 0x360   : > { %v2329_v16 = vpop.permute.xlu0 %2328 }
 0x361   : > { %v2500_v26 = vsel %vm1184_vm8, %v4983_v9, %v2329_v16  ;;  %v2503_v9 = vsel %vm1184_vm8, %v4980_v17, %v2335_v59 }
 0x363   : > { %v2433_v46 = vpop.permute.xlu1 %2432 }
 0x364   : > { %v2427_v5 = vpop.permute.xlu0 %2426  ;;  %v2536_v21 = vsel %vm2510_vm12, %v2503_v9, %v2433_v46 }
 0x365   : > { %v2533_v54 = vsel %vm2510_vm12, %v2500_v26, %v2427_v5 }
 0x366   : > { %3267 = vmatprep.mubr.msk.f32.mxu1 %vm2559_vm11, %v2533_v54 }
 0x367   : > { %v2339_v23 = vpop.permute.xlu1 %2338  ;;  %3268 = vmatmul.mubr.msk.f32.gmra.mxu1 %vm2559_vm11, %v2534_v52 }
 0x368   : > { %v2333_v31 = vpop.permute.xlu0 %2332 }
 0x369   : > { %v2502_v61 = vsel %vm1184_vm8, %v5001_v15, %v2333_v31  ;;  %v2505_v15 = vsel %vm1184_vm8, %v4998_v10, %v2339_v23 }
 0x36b   : > { %v2437_v14 = vpop.permute.xlu1 %2436 }
 0x36c   : > { %v2431_v24 = vpop.permute.xlu0 %2430  ;;  %v2538_v17 = vsel %vm2510_vm12, %v2505_v15, %v2437_v14 }
 0x36d   : > { %v2535_v39 = vsel %vm2510_vm12, %v2502_v61, %v2431_v24 }
 0x36e   : > { %3270 = vmatprep.mubr.msk.f32.mxu1 %vm2559_vm11, %v2535_v39 }
 0x36f   : > { %3271 = vmatmul.mubr.msk.f32.gmra.mxu1 %vm2559_vm11, %v2536_v21  ;;  %v2343_v37 = vpop.permute.xlu1 %2342 }
 0x370   : > { %v2337_v56 = vpop.permute.xlu0 %2336  ;;  %v2507_v58 = vsel %vm1184_vm8, %v5016_v42, %v2343_v37 }
 0x371   : > { %v2504_v55 = vsel %vm1184_vm8, %v5019_v44, %v2337_v56 }
 0x374   : > { %v2435_v50 = vpop.permute.xlu0 %2434  ;;  %v2345_v34 = vpop.permute.xlu1 %2344 }
 0x375   : > { %v2537_v33 = vsel %vm2510_vm12, %v2504_v55, %v2435_v50  ;;  %v2508_v10 = vsel %vm1184_vm8, %v5052_v36, %v2345_v34  ;;  %v2217_v36 = vsel %vm2215_vm10, %v2180_v27, %v4704_v43  ;;  %v5214_v43 = vld [vmem:[%s5294_s4] ss:$0 sm:$0xff] }
 0x376   : > { %3273 = vmatprep.mubr.msk.f32.mxu1 %vm2559_vm11, %v2537_v33  ;;  %v2541_v4 = vsel %vm2510_vm12, %v2508_v10, %v4719_v2  ;;  %v2479_v32 = vsel %vm1184_vm8, %v2217_v36, %v5066_v45 }
 0x377   : > { %3274 = vmatmul.mubr.msk.f32.gmra.mxu1 %vm2559_vm11, %v2538_v17 }
 0x378   : > { %v2341_v25 = vpop.permute.xlu0 %2340  ;;  %v2347_v41 = vpop.permute.xlu1 %2346 }
 0x379   : > { %v2506_v19 = vsel %vm1184_vm8, %v5037_v0, %v2341_v25  ;;  %v2509_v42 = vsel %vm1184_vm8, %v5034_v6, %v2347_v41 }
 0x37c   : > { %v2439_v1 = vpop.permute.xlu0 %2438  ;;  %v2445_v0 = vpop.permute.xlu1 %2444 }
 0x37d   : > { %v2539_v44 = vsel %vm2510_vm12, %v2506_v19, %v2439_v1  ;;  %v2542_v53 = vsel %vm2510_vm12, %v2509_v42, %v2445_v0 }
 0x37e   : > { %3276 = vmatprep.mubr.msk.f32.mxu1 %vm2559_vm11, %v2539_v44 }
 0x380   : > { %v2441_v11 = vpop.permute.xlu0 %2440 }
 0x381   : > { %v2540_v22 = vsel %vm2510_vm12, %v2507_v58, %v2441_v11 }
 0x382   : > { %3277 = vmatmul.mubr.msk.f32.gmra.mxu1 %vm2559_vm11, %v2540_v22 }
 0x383   : > { %3279 = vmatprep.mubr.msk.f32.mxu1 %vm2559_vm11, %v2541_v4 }
 0x384   : > { %v2385_v13 = vpop.permute.xlu0 %2384 }
 0x385   : > { %v2512_v30 = vsel %vm2510_vm12, %v2479_v32, %v2385_v13 }
 0x386   : > { %3235 = vmatmul.mubr.msk.f32.vlgmr.msra.gmra.mxu0 %vm2559_vm11, %v2512_v30  ;;  %3280 = vmatmul.mubr.msk.f32.gmra.mxu1 %vm2559_vm11, %v2542_v53 }
 0x3d7   : > { %v3239_v2 = vpop.f32.mrf.mxu1 }
 0x3d8   : > { %v2738_v45 = vadd.f32 %v3239_v2, %v5214_v43 }
 0x3d9   : > { %v2732_v6 = vpop.f32.mrf.mxu1 }
 0x3da   : > { %v2884_v35 = vmax.f32 %v2738_v45, 0.0  ;;  %v2733_v3 = vadd.f32 %v5214_v43, %v2732_v6 }
 0x3dc   : > { %2916 = vst [vmem:[%s5222_s20 + $0x18] sm:$0xff] %v2884_v35  ;;  %v2883_v40 = vmax.f32 %v2733_v3, 0.0 }
 0x3de   : > { %2915 = vst [vmem:[%s5222_s20 + $0x10] sm:$0xff] %v2883_v40 }
 0x3df   : > { %v3242_v8 = vpop.f32.mrf.mxu1 }
 0x3e0   : > { %v2748_v48 = vadd.f32 %v3242_v8, %v5214_v43 }
 0x3e1   : > { %v2742_v12 = vpop.f32.mrf.mxu1 }
 0x3e2   : > { %v2886_v28 = vmax.f32 %v2748_v48, 0.0  ;;  %v2743_v18 = vadd.f32 %v5214_v43, %v2742_v12 }
 0x3e4   : > { %2918 = vst [vmem:[%s5222_s20 + $0x28] sm:$0xff] %v2886_v28  ;;  %v2885_v62 = vmax.f32 %v2743_v18, 0.0 }
 0x3e6   : > { %2917 = vst [vmem:[%s5222_s20 + $0x20] sm:$0xff] %v2885_v62 }
 0x3e7   : > { %v3245_v47 = vpop.f32.mrf.mxu1 }
 0x3e8   : > { %v2758_v63 = vadd.f32 %v3245_v47, %v5214_v43 }
 0x3e9   : > { %v2752_v57 = vpop.f32.mrf.mxu1 }
 0x3ea   : > { %v2888_v7 = vmax.f32 %v2758_v63, 0.0  ;;  %v2753_v38 = vadd.f32 %v5214_v43, %v2752_v57 }
 0x3ec   : > { %2920 = vst [vmem:[%s5222_s20 + $0x38] sm:$0xff] %v2888_v7  ;;  %v2887_v49 = vmax.f32 %v2753_v38, 0.0 }
 0x3ee   : > { %2919 = vst [vmem:[%s5222_s20 + $0x30] sm:$0xff] %v2887_v49 }
 0x3ef   : > { %v3248_v20 = vpop.f32.mrf.mxu1 }
 0x3f0   : > { %v2768_v29 = vadd.f32 %v3248_v20, %v5214_v43 }
 0x3f1   : > { %v2762_v59 = vpop.f32.mrf.mxu1 }
 0x3f2   : > { %v2890_v16 = vmax.f32 %v2768_v29, 0.0  ;;  %v2763_v46 = vadd.f32 %v5214_v43, %v2762_v59 }
 0x3f4   : > { %2922 = vst [vmem:[%s5222_s20 + $0x48] sm:$0xff] %v2890_v16  ;;  %v2889_v26 = vmax.f32 %v2763_v46, 0.0 }
 0x3f6   : > { %2921 = vst [vmem:[%s5222_s20 + $0x40] sm:$0xff] %v2889_v26 }
 0x3f7   : > { %v3251_v5 = vpop.f32.mrf.mxu1 }
 0x3f8   : > { %v2778_v60 = vadd.f32 %v3251_v5, %v5214_v43 }
 0x3f9   : > { %v2772_v54 = vpop.f32.mrf.mxu1 }
 0x3fa   : > { %v2892_v52 = vmax.f32 %v2778_v60, 0.0  ;;  %v2773_v23 = vadd.f32 %v5214_v43, %v2772_v54 }
 0x3fc   : > { %2924 = vst [vmem:[%s5222_s20 + $0x58] sm:$0xff] %v2892_v52  ;;  %v2891_v31 = vmax.f32 %v2773_v23, 0.0 }
 0x3fe   : > { %2923 = vst [vmem:[%s5222_s20 + $0x50] sm:$0xff] %v2891_v31 }
 0x3ff   : > { %v3254_v14 = vpop.f32.mrf.mxu1 }
 0x400   : > { %v2788_v61 = vadd.f32 %v3254_v14, %v5214_v43 }
 0x401   : > { %v2782_v24 = vpop.f32.mrf.mxu1 }
 0x402   : > { %v2894_v9 = vmax.f32 %v2788_v61, 0.0  ;;  %v2783_v39 = vadd.f32 %v5214_v43, %v2782_v24 }
 0x404   : > { %2926 = vst [vmem:[%s5222_s20 + $0x68] sm:$0xff] %v2894_v9  ;;  %v2893_v21 = vmax.f32 %v2783_v39, 0.0 }
 0x406   : > { %2925 = vst [vmem:[%s5222_s20 + $0x60] sm:$0xff] %v2893_v21 }
 0x407   : > { %v3257_v37 = vpop.f32.mrf.mxu1 }
 0x408   : > { %v2798_v56 = vadd.f32 %v3257_v37, %v5214_v43 }
 0x409   : > { %v2792_v55 = vpop.f32.mrf.mxu1 }
 0x40a   : > { %v2896_v50 = vmax.f32 %v2798_v56, 0.0  ;;  %v2793_v15 = vadd.f32 %v5214_v43, %v2792_v55 }
 0x40c   : > { %2928 = vst [vmem:[%s5222_s20 + $0x78] sm:$0xff] %v2896_v50  ;;  %v2895_v33 = vmax.f32 %v2793_v15, 0.0 }
 0x40e   : > { %2927 = vst [vmem:[%s5222_s20 + $0x70] sm:$0xff] %v2895_v33 }
 0x40f   : > { %v3260_v17 = vpop.f32.mrf.mxu1 }
 0x410   : > { %v2808_v34 = vadd.f32 %v3260_v17, %v5214_v43 }
 0x411   : > { %v2802_v25 = vpop.f32.mrf.mxu1 }
 0x412   : > { %v2898_v41 = vmax.f32 %v2808_v34, 0.0  ;;  %v2803_v19 = vadd.f32 %v5214_v43, %v2802_v25 }
 0x414   : > { %2930 = vst [vmem:[%s5222_s20 + $0x88] sm:$0xff] %v2898_v41  ;;  %v2897_v1 = vmax.f32 %v2803_v19, 0.0 }
 0x416   : > { %2929 = vst [vmem:[%s5222_s20 + $0x80] sm:$0xff] %v2897_v1 }
 0x417   : > { %v3263_v44 = vpop.f32.mrf.mxu1 }
 0x418   : > { %v2818_v10 = vadd.f32 %v3263_v44, %v5214_v43 }
 0x419   : > { %v2812_v51 = vpop.f32.mrf.mxu1 }
 0x41a   : > { %v2900_v27 = vmax.f32 %v2818_v10, 0.0  ;;  %v2813_v58 = vadd.f32 %v5214_v43, %v2812_v51 }
 0x41c   : > { %2932 = vst [vmem:[%s5222_s20 + $0x98] sm:$0xff] %v2900_v27  ;;  %v2899_v11 = vmax.f32 %v2813_v58, 0.0 }
 0x41e   : > { %2931 = vst [vmem:[%s5222_s20 + $0x90] sm:$0xff] %v2899_v11 }
 0x41f   : > { %v3266_v22 = vpop.f32.mrf.mxu1 }
 0x420   : > { %v2828_v0 = vadd.f32 %v3266_v22, %v5214_v43 }
 0x421   : > { %v2822_v4 = vpop.f32.mrf.mxu1 }
 0x422   : > { %v2902_v36 = vmax.f32 %v2828_v0, 0.0  ;;  %v2823_v32 = vadd.f32 %v5214_v43, %v2822_v4 }
 0x424   : > { %2934 = vst [vmem:[%s5222_s20 + $0xa8] sm:$0xff] %v2902_v36  ;;  %v2901_v42 = vmax.f32 %v2823_v32, 0.0 }
 0x426   : > { %2933 = vst [vmem:[%s5222_s20 + $0xa0] sm:$0xff] %v2901_v42 }
 0x427   : > { %v3269_v13 = vpop.f32.mrf.mxu1 }
 0x428   : > { %v2838_v53 = vadd.f32 %v3269_v13, %v5214_v43 }
 0x429   : > { %v2832_v30 = vpop.f32.mrf.mxu1 }
 0x42a   : > { %v2904_v2 = vmax.f32 %v2838_v53, 0.0  ;;  %v2833_v45 = vadd.f32 %v5214_v43, %v2832_v30 }
 0x42c   : > { %2936 = vst [vmem:[%s5222_s20 + $0xb8] sm:$0xff] %v2904_v2  ;;  %v2903_v6 = vmax.f32 %v2833_v45, 0.0 }
 0x42e   : > { %2935 = vst [vmem:[%s5222_s20 + $0xb0] sm:$0xff] %v2903_v6 }
 0x42f   : > { %v3272_v35 = vpop.f32.mrf.mxu1 }
 0x430   : > { %v2848_v3 = vadd.f32 %v3272_v35, %v5214_v43 }
 0x431   : > { %v2842_v40 = vpop.f32.mrf.mxu1 }
 0x432   : > { %v2906_v8 = vmax.f32 %v2848_v3, 0.0  ;;  %v2843_v48 = vadd.f32 %v5214_v43, %v2842_v40 }
 0x434   : > { %2938 = vst [vmem:[%s5222_s20 + $0xc8] sm:$0xff] %v2906_v8  ;;  %v2905_v12 = vmax.f32 %v2843_v48, 0.0 }
 0x436   : > { %2937 = vst [vmem:[%s5222_s20 + $0xc0] sm:$0xff] %v2905_v12 }
 0x437   : > { %v3275_v28 = vpop.f32.mrf.mxu1 }
 0x438   : > { %v2858_v18 = vadd.f32 %v3275_v28, %v5214_v43 }
 0x439   : > { %v2852_v62 = vpop.f32.mrf.mxu1 }
 0x43a   : > { %v2908_v47 = vmax.f32 %v2858_v18, 0.0  ;;  %v2853_v63 = vadd.f32 %v5214_v43, %v2852_v62 }
 0x43c   : > { %2940 = vst [vmem:[%s5222_s20 + $0xd8] sm:$0xff] %v2908_v47  ;;  %v2907_v57 = vmax.f32 %v2853_v63, 0.0 }
 0x43e   : > { %2939 = vst [vmem:[%s5222_s20 + $0xd0] sm:$0xff] %v2907_v57 }
 0x442   : > { %v3278_v7 = vpop.f32.mrf.mxu1 }
 0x443   : > { %v2868_v38 = vadd.f32 %v3278_v7, %v5214_v43 }
 0x444   : > { %v2862_v49 = vpop.f32.mrf.mxu1 }
 0x445   : > { %v2910_v20 = vmax.f32 %v2868_v38, 0.0  ;;  %v2863_v29 = vadd.f32 %v5214_v43, %v2862_v49 }
 0x446   : > { %v3236_v59 = vpop.f32.mrf.mxu0  ;;  %v3281_v16 = vpop.f32.mrf.mxu1 }
 0x447   : > { %2942 = vst [vmem:[%s5222_s20 + $0xe8] sm:$0xff] %v2910_v20  ;;  %v2909_v46 = vmax.f32 %v2863_v29, 0.0  ;;  %v2728_v26 = vadd.f32 %v3236_v59, %v5214_v43  ;;  %v2878_v5 = vadd.f32 %v3281_v16, %v5214_v43 }
 0x448   : > { %v2722_v60 = vpop.f32.mrf.mxu0  ;;  %v2872_v54 = vpop.f32.mrf.mxu1 }
 0x449   : > { %2941 = vst [vmem:[%s5222_s20 + $0xe0] sm:$0xff] %v2909_v46  ;;  %v2882_v52 = vmax.f32 %v2728_v26, 0.0  ;;  %v2912_v23 = vmax.f32 %v2878_v5, 0.0  ;;  %v2723_v31 = vadd.f32 %v5214_v43, %v2722_v60  ;;  %v2873_v14 = vadd.f32 %v5214_v43, %v2872_v54 }
 0x44b   : > { %2914 = vst [vmem:[%s5222_s20 + $0x8] sm:$0xff] %v2882_v52  ;;  %2944 = vst [vmem:[%s5222_s20 + $0xf8] sm:$0xff] %v2912_v23  ;;  %v2881_v61 = vmax.f32 %v2723_v31, 0.0  ;;  %v2911_v24 = vmax.f32 %v2873_v14, 0.0 }
 0x44d   : > { %2913 = vst [vmem:[%s5222_s20] sm:$0xff] %v2881_v61  ;;  %2943 = vst [vmem:[%s5222_s20 + $0xf0] sm:$0xff] %v2911_v24 }
 0x44e PF: > { %s15_s18 = sadd.s32 1, %s3324_s18  }
 0x44f   : > { %p12_p4 = scmp.ge.s32.totalorder %s15_s18, 4  }
 0x451   :  { %14 = sbr.rel (!%p12_p4) target bundleno = 1 (0x1), region = 72 }

</bundles_post_ra>
